<compile_context>
chip_gen: v6e
topology: v6e:2x2x1
jax: 0.10.0
libtpu: 0.0.40
codegen_flags: <defaults>
</compile_context>

<pallas_src>
import jax
import jax.numpy as jnp
from jax.experimental import pallas as pl
from jax.experimental.pallas import tpu as pltpu

EPS = 1e-5  # torch.nn.InstanceNorm2d default eps


def _make_jnet_kernel(H, W, NB, num):
    HW = H * W
    L = NB * HW
    inv_hw = 1.0 / float(HW)

    def kernel(x_ref, seg_ref, w1_ref, w2_ref, w3_ref, w4_ref,
               wf_ref, bf_ref, o_ref):
        f32 = jnp.float32

        # ---- boundary masks: ONE iota, hoisted out of all shifts/layers ----
        p = jax.lax.broadcasted_iota(jnp.int32, (num, L), 1)
        phw = p % HW                      # spatial position within a sample
        col = p % W                       # column index (W divides HW)
        m_row0 = phw < W
        m_rowl = phw >= (H - 1) * W
        m_col0 = col == 0
        m_coll = col == (W - 1)

        seg_t = seg_ref[...]              # (NB, L) per-sample segment indicator

        def seg_sum(a):                   # per-sample spatial sums on the MXU
            return jax.lax.dot_general(
                a, seg_t, (((1,), (1,)), ((), ())),
                preferred_element_type=f32)                 # (C, NB)

        def seg_bcast(s):                 # per-sample scalars back onto lanes
            return jnp.dot(s, seg_t, preferred_element_type=f32)   # (C, L)

        def taps9(x):
            # 8 XLU rolls per layer (opposite shifts share their rolls);
            # reflection handled by selects against the hoisted masks.
            x_dn = pltpu.roll(x, W, 1)         # out[p] = x[p - W]  (row above)
            x_up = pltpu.roll(x, L - W, 1)     # out[p] = x[p + W]  (row below)
            up = jnp.where(m_row0, x_up, x_dn)   # in_reflect[y-1, x]
            dn = jnp.where(m_rowl, x_dn, x_up)   # in_reflect[y+1, x]
            taps = []
            for r in (up, x, dn):              # ky = 0, 1, 2
                r_r = pltpu.roll(r, 1, 1)      # out[p] = r[p - 1]
                r_l = pltpu.roll(r, L - 1, 1)  # out[p] = r[p + 1]
                lft = jnp.where(m_col0, r_l, r_r)   # in_reflect[., x-1]
                rgt = jnp.where(m_coll, r_r, r_l)   # in_reflect[., x+1]
                taps += [lft, r, rgt]          # kx = 0, 1, 2
            return taps

        def conv_in_relu(x, w_ref):
            # Stack the 9 taps along the contraction dim -> single K=9*num
            # bf16 MXU matmul with f32 accumulation (one push/pop sequence
            # instead of 9 dots + 8 VPU adds).
            stacked = jnp.concatenate(
                [t.astype(jnp.bfloat16) for t in taps9(x)], axis=0)  # (9*num, L)
            acc = jnp.dot(w_ref[...], stacked,
                          preferred_element_type=f32)               # (num, L)
            # InstanceNorm2d(affine=False): per-(channel, sample), biased var,
            # eps=1e-5.  Spatial reductions run as tiny MXU matmuls against
            # the segment matrix (keeps the XLU free for the rolls); centered
            # second moment for numerical safety.
            mean = seg_sum(acc) * inv_hw
            cen = acc - seg_bcast(mean)
            var = seg_sum(cen * cen) * inv_hw
            y = cen * jax.lax.rsqrt(seg_bcast(var) + EPS)
            return jnp.maximum(y, 0.0)                               # ReLU

        x = x_ref[0]                       # (num, L) channel-padded, lane-dense
        y = conv_in_relu(x, w1_ref)
        y = conv_in_relu(y, w2_ref)
        y = conv_in_relu(y, w3_ref)
        y = conv_in_relu(y, w4_ref)
        # Final 1x1 conv + sigmoid fused as epilogue; lane-dense (3, L) store.
        out = jnp.dot(wf_ref[...], y, preferred_element_type=f32)
        out = jax.nn.sigmoid(out + bf_ref[...])
        o_ref[...] = out.reshape(1, 3, L).astype(o_ref.dtype)

    return kernel


def _pick_sample_block(N, HW, max_lanes=4096):
    """Largest divisor of N whose packed lane width stays modest."""
    nb = 1
    for d in range(1, N + 1):
        if N % d == 0 and d * HW <= max_lanes:
            nb = d
    return nb


def jnet_forward(x_nchw, params, max_lanes=4096):
    """Forward pass of JNet.  Input/output are NCHW float32, like PyTorch."""
    N, C0, H, W = x_nchw.shape
    HW = H * W
    num = params["w1"].shape[0]
    assert num >= C0, "layer-1 input channels are zero-padded up to `num`"

    NB = _pick_sample_block(N, HW, max_lanes)   # samples lane-packed per step
    G = N // NB
    L = NB * HW

    def prep3x3(w_oihw, cin_pad):
        # PyTorch OIHW (O, I, 3, 3) -> (O, 9*cin_pad), flattened as
        # t*cin_pad + i with tap t = ky*3 + kx (matches the stacked taps).
        i = w_oihw.shape[1]
        w = jnp.transpose(w_oihw, (0, 2, 3, 1))           # (O, ky, kx, I)
        if cin_pad > i:
            w = jnp.pad(w, ((0, 0), (0, 0), (0, 0), (0, cin_pad - i)))
        return w.reshape(w.shape[0], 9 * cin_pad).astype(jnp.bfloat16)

    w1 = prep3x3(params["w1"], num)      # layer-1 Cin zero-padded 3 -> num
    w2 = prep3x3(params["w2"], num)
    w3 = prep3x3(params["w3"], num)
    w4 = prep3x3(params["w4"], num)
    wf = params["wf"].reshape(3, num).astype(jnp.float32)  # (3,num,1,1)->(3,num)
    bf = params["bf"].reshape(3, 1).astype(jnp.float32)
    # NOTE: params["b1".."b4"] (conv biases) are deliberately unused --
    # InstanceNorm2d(affine=False) subtracts the per-channel mean, cancelling
    # a constant per-channel bias exactly (variance is shift-invariant too).

    # Lane-pack NB samples per grid step: (G, num, NB*HW) -- sample+spatial on
    # the lanes, channels (zero-padded 3 -> num) on the sublanes.
    x = x_nchw.reshape(G, NB, C0, HW)
    x = jnp.transpose(x, (0, 2, 1, 3)).reshape(G, C0, L)
    x = jnp.pad(x, ((0, 0), (0, num - C0), (0, 0))).astype(jnp.float32)

    # Per-sample segment indicator (NB, L): seg[k, p] = 1 iff p // HW == k.
    seg = (jnp.arange(L, dtype=jnp.int32)[None, :] // HW
           == jnp.arange(NB, dtype=jnp.int32)[:, None]).astype(jnp.float32)

    out = pl.pallas_call(
        _make_jnet_kernel(H, W, NB, num),
        out_shape=jax.ShapeDtypeStruct((G, 3, L), jnp.float32),
        grid_spec=pltpu.PrefetchScalarGridSpec(
            num_scalar_prefetch=0,
            grid=(G,),
            in_specs=[
                pl.BlockSpec((1, num, L), lambda g: (g, 0, 0)),
                pl.BlockSpec((NB, L), lambda g: (0, 0)),
                pl.BlockSpec((num, 9 * num), lambda g: (0, 0)),
                pl.BlockSpec((num, 9 * num), lambda g: (0, 0)),
                pl.BlockSpec((num, 9 * num), lambda g: (0, 0)),
                pl.BlockSpec((num, 9 * num), lambda g: (0, 0)),
                pl.BlockSpec((3, num), lambda g: (0, 0)),
                pl.BlockSpec((3, 1), lambda g: (0, 0)),
            ],
            out_specs=pl.BlockSpec((1, 3, L), lambda g: (g, 0, 0)),
        ),
        # On v7x, pltpu.CORE_PARALLEL here would shard sample groups across
        # the two TensorCores; "parallel" is kept for portability.
        compiler_params=pltpu.CompilerParams(
            dimension_semantics=("parallel",)),
    )(x, seg, w1, w2, w3, w4, wf, bf)

    out = out.reshape(G, 3, NB, HW)
    out = jnp.transpose(out, (0, 2, 1, 3)).reshape(N, 3, H, W)
    return out


def init_jnet_params(key, num=16):
    """Deterministic synthetic parameters in PyTorch-native layouts."""
    ks = jax.random.split(key, 10)
    p = {}
    p["w1"] = 0.1 * jax.random.normal(ks[0], (num, 3, 3, 3), jnp.float32)   # OIHW
    p["b1"] = 0.1 * jax.random.normal(ks[1], (num,), jnp.float32)
    p["w2"] = 0.1 * jax.random.normal(ks[2], (num, num, 3, 3), jnp.float32)
    p["b2"] = 0.1 * jax.random.normal(ks[3], (num,), jnp.float32)
    p["w3"] = 0.1 * jax.random.normal(ks[4], (num, num, 3, 3), jnp.float32)
    p["b3"] = 0.1 * jax.random.normal(ks[5], (num,), jnp.float32)
    p["w4"] = 0.1 * jax.random.normal(ks[6], (num, num, 3, 3), jnp.float32)
    p["b4"] = 0.1 * jax.random.normal(ks[7], (num,), jnp.float32)
    p["wf"] = 0.1 * jax.random.normal(ks[8], (3, num, 1, 1), jnp.float32)
    p["bf"] = 0.1 * jax.random.normal(ks[9], (3,), jnp.float32)
    return p


if __name__ == "__main__":
    key = jax.random.PRNGKey(0)
    k_x, k_p = jax.random.split(key)
    # Small shapes consistent with the module: N=2, C=3 (RGB), 16x16, num=16.
    x = jax.random.uniform(k_x, (2, 3, 16, 16), jnp.float32)
    params = init_jnet_params(k_p, num=16)

    fwd = jax.jit(jnet_forward)
    out = jax.block_until_ready(fwd(x, params))
    assert out.shape == (2, 3, 16, 16), out.shape
    assert bool(jnp.isfinite(out).all())
    print("KERNEL_OK")
</pallas_src>

<mosaic_0001>
module attributes {stable_mosaic.version = 11 : i64} {
  func.func @kernel(%arg0: i32, %arg1: memref<1x16x512xf32, #tpu.memory_space<vmem>>, %arg2: memref<2x512xf32, #tpu.memory_space<vmem>>, %arg3: memref<16x144xbf16, #tpu.memory_space<vmem>>, %arg4: memref<16x144xbf16, #tpu.memory_space<vmem>>, %arg5: memref<16x144xbf16, #tpu.memory_space<vmem>>, %arg6: memref<16x144xbf16, #tpu.memory_space<vmem>>, %arg7: memref<3x16xf32, #tpu.memory_space<vmem>>, %arg8: memref<3x1xf32, #tpu.memory_space<vmem>>, %arg9: memref<1x3x512xf32, #tpu.memory_space<vmem>>) attributes {dimension_semantics = [#tpu.dimension_semantics<parallel>], iteration_bounds = array<i64: 1>, scalar_prefetch = 0 : i64, scratch_operands = 0 : i64, tpu.core_type = #tpu.core_type<tc>, window_params = [{transform_indices = @transform_0, window_bounds = array<i64: 1, 16, 512>}, {pipeline_mode = #tpu.pipeline_mode<synchronous>, transform_indices = @transform_1, window_bounds = array<i64: 2, 512>}, {pipeline_mode = #tpu.pipeline_mode<synchronous>, transform_indices = @transform_2, window_bounds = array<i64: 16, 144>}, {pipeline_mode = #tpu.pipeline_mode<synchronous>, transform_indices = @transform_3, window_bounds = array<i64: 16, 144>}, {pipeline_mode = #tpu.pipeline_mode<synchronous>, transform_indices = @transform_4, window_bounds = array<i64: 16, 144>}, {pipeline_mode = #tpu.pipeline_mode<synchronous>, transform_indices = @transform_5, window_bounds = array<i64: 16, 144>}, {pipeline_mode = #tpu.pipeline_mode<synchronous>, transform_indices = @transform_6, window_bounds = array<i64: 3, 16>}, {pipeline_mode = #tpu.pipeline_mode<synchronous>, transform_indices = @transform_7, window_bounds = array<i64: 3, 1>}, {transform_indices = @transform_8, window_bounds = array<i64: 1, 3, 512>}]} {
    %0 = tpu.iota {dimensions = array<i32: 1>} : vector<16x512xi32>
    %c256_i32 = arith.constant 256 : i32
    %c0_i32 = arith.constant 0 : i32
    %1 = arith.cmpi eq, %c256_i32, %c0_i32 : i32
    %c1_i32 = arith.constant 1 : i32
    %2 = arith.select %1, %c1_i32, %c256_i32 : i32
    %3 = vector.broadcast %2 : i32 to vector<16x512xi32>
    %4 = arith.remsi %0, %3 : vector<16x512xi32>
    %c0_i32_0 = arith.constant 0 : i32
    %5 = vector.broadcast %c0_i32_0 : i32 to vector<16x512xi32>
    %6 = arith.cmpi ne, %4, %5 : vector<16x512xi32>
    %c0_i32_1 = arith.constant 0 : i32
    %7 = vector.broadcast %c0_i32_1 : i32 to vector<16x512xi32>
    %8 = arith.cmpi slt, %4, %7 : vector<16x512xi32>
    %c0_i32_2 = arith.constant 0 : i32
    %9 = arith.cmpi slt, %2, %c0_i32_2 : i32
    %10 = vector.broadcast %9 : i1 to vector<16x512xi1>
    %11 = vector.broadcast %10 : vector<16x512xi1> to vector<16x512xi1>
    %12 = arith.xori %8, %11 : vector<16x512xi1>
    %13 = arith.andi %12, %6 : vector<16x512xi1>
    %14 = vector.broadcast %2 : i32 to vector<16x512xi32>
    %15 = arith.addi %4, %14 : vector<16x512xi32>
    %16 = arith.select %13, %15, %4 : vector<16x512xi1>, vector<16x512xi32>
    %c16_i32 = arith.constant 16 : i32
    %c0_i32_3 = arith.constant 0 : i32
    %17 = arith.cmpi eq, %c16_i32, %c0_i32_3 : i32
    %c1_i32_4 = arith.constant 1 : i32
    %18 = arith.select %17, %c1_i32_4, %c16_i32 : i32
    %19 = vector.broadcast %18 : i32 to vector<16x512xi32>
    %20 = arith.remsi %0, %19 : vector<16x512xi32>
    %c0_i32_5 = arith.constant 0 : i32
    %21 = vector.broadcast %c0_i32_5 : i32 to vector<16x512xi32>
    %22 = arith.cmpi ne, %20, %21 : vector<16x512xi32>
    %c0_i32_6 = arith.constant 0 : i32
    %23 = vector.broadcast %c0_i32_6 : i32 to vector<16x512xi32>
    %24 = arith.cmpi slt, %20, %23 : vector<16x512xi32>
    %c0_i32_7 = arith.constant 0 : i32
    %25 = arith.cmpi slt, %18, %c0_i32_7 : i32
    %26 = vector.broadcast %25 : i1 to vector<16x512xi1>
    %27 = vector.broadcast %26 : vector<16x512xi1> to vector<16x512xi1>
    %28 = arith.xori %24, %27 : vector<16x512xi1>
    %29 = arith.andi %28, %22 : vector<16x512xi1>
    %30 = vector.broadcast %18 : i32 to vector<16x512xi32>
    %31 = arith.addi %20, %30 : vector<16x512xi32>
    %32 = arith.select %29, %31, %20 : vector<16x512xi1>, vector<16x512xi32>
    %c16_i32_8 = arith.constant 16 : i32
    %33 = vector.broadcast %c16_i32_8 : i32 to vector<16x512xi32>
    %34 = arith.cmpi slt, %16, %33 : vector<16x512xi32>
    %c240_i32 = arith.constant 240 : i32
    %35 = vector.broadcast %c240_i32 : i32 to vector<16x512xi32>
    %36 = arith.cmpi sge, %16, %35 : vector<16x512xi32>
    %c0_i32_9 = arith.constant 0 : i32
    %37 = vector.broadcast %c0_i32_9 : i32 to vector<16x512xi32>
    %38 = arith.cmpi eq, %32, %37 : vector<16x512xi32>
    %c15_i32 = arith.constant 15 : i32
    %39 = vector.broadcast %c15_i32 : i32 to vector<16x512xi32>
    %40 = arith.cmpi eq, %32, %39 : vector<16x512xi32>
    %c0 = arith.constant 0 : index
    %c0_10 = arith.constant 0 : index
    %41 = vector.load %arg2[%c0, %c0_10] : memref<2x512xf32, #tpu.memory_space<vmem>>, vector<2x512xf32>
    %c0_11 = arith.constant 0 : index
    %c0_12 = arith.constant 0 : index
    %c0_13 = arith.constant 0 : index
    %42 = vector.load %arg1[%c0_11, %c0_12, %c0_13] : memref<1x16x512xf32, #tpu.memory_space<vmem>>, vector<1x16x512xf32>
    %43 = vector.shape_cast %42 : vector<1x16x512xf32> to vector<16x512xf32>
    %c16_i32_14 = arith.constant 16 : i32
    %44 = tpu.dynamic_rotate %43 by %c16_i32_14 dim 1 : vector<16x512xf32>, i32 -> vector<16x512xf32>
    %c496_i32 = arith.constant 496 : i32
    %45 = tpu.dynamic_rotate %43 by %c496_i32 dim 1 : vector<16x512xf32>, i32 -> vector<16x512xf32>
    %46 = arith.select %34, %45, %44 : vector<16x512xi1>, vector<16x512xf32>
    %47 = arith.select %36, %44, %45 : vector<16x512xi1>, vector<16x512xf32>
    %c1_i32_15 = arith.constant 1 : i32
    %48 = tpu.dynamic_rotate %46 by %c1_i32_15 dim 1 : vector<16x512xf32>, i32 -> vector<16x512xf32>
    %c511_i32 = arith.constant 511 : i32
    %49 = tpu.dynamic_rotate %46 by %c511_i32 dim 1 : vector<16x512xf32>, i32 -> vector<16x512xf32>
    %50 = arith.select %38, %49, %48 : vector<16x512xi1>, vector<16x512xf32>
    %51 = arith.select %40, %48, %49 : vector<16x512xi1>, vector<16x512xf32>
    %c1_i32_16 = arith.constant 1 : i32
    %52 = tpu.dynamic_rotate %43 by %c1_i32_16 dim 1 : vector<16x512xf32>, i32 -> vector<16x512xf32>
    %c511_i32_17 = arith.constant 511 : i32
    %53 = tpu.dynamic_rotate %43 by %c511_i32_17 dim 1 : vector<16x512xf32>, i32 -> vector<16x512xf32>
    %54 = arith.select %38, %53, %52 : vector<16x512xi1>, vector<16x512xf32>
    %55 = arith.select %40, %52, %53 : vector<16x512xi1>, vector<16x512xf32>
    %c1_i32_18 = arith.constant 1 : i32
    %56 = tpu.dynamic_rotate %47 by %c1_i32_18 dim 1 : vector<16x512xf32>, i32 -> vector<16x512xf32>
    %c511_i32_19 = arith.constant 511 : i32
    %57 = tpu.dynamic_rotate %47 by %c511_i32_19 dim 1 : vector<16x512xf32>, i32 -> vector<16x512xf32>
    %58 = arith.select %38, %57, %56 : vector<16x512xi1>, vector<16x512xf32>
    %59 = arith.select %40, %56, %57 : vector<16x512xi1>, vector<16x512xf32>
    %60 = arith.truncf %50 : vector<16x512xf32> to vector<16x512xbf16>
    %61 = arith.truncf %46 : vector<16x512xf32> to vector<16x512xbf16>
    %62 = arith.truncf %51 : vector<16x512xf32> to vector<16x512xbf16>
    %63 = arith.truncf %54 : vector<16x512xf32> to vector<16x512xbf16>
    %64 = arith.truncf %43 : vector<16x512xf32> to vector<16x512xbf16>
    %65 = arith.truncf %55 : vector<16x512xf32> to vector<16x512xbf16>
    %66 = arith.truncf %58 : vector<16x512xf32> to vector<16x512xbf16>
    %67 = arith.truncf %47 : vector<16x512xf32> to vector<16x512xbf16>
    %68 = arith.truncf %59 : vector<16x512xf32> to vector<16x512xbf16>
    %69 = tpu.concatenate %60, %61, %62, %63, %64, %65, %66, %67, %68 in 0 : vector<16x512xbf16>, vector<16x512xbf16>, vector<16x512xbf16>, vector<16x512xbf16>, vector<16x512xbf16>, vector<16x512xbf16>, vector<16x512xbf16>, vector<16x512xbf16>, vector<16x512xbf16> -> vector<144x512xbf16>
    %c0_20 = arith.constant 0 : index
    %c0_21 = arith.constant 0 : index
    %70 = vector.load %arg3[%c0_20, %c0_21] : memref<16x144xbf16, #tpu.memory_space<vmem>>, vector<16x144xbf16>
    %cst = arith.constant dense<0.000000e+00> : vector<16x512xf32>
    %71 = tpu.matmul %70, %69, %cst {dimension_numbers = #tpu.dot_dimension_numbers<[1], [0], [0], [1], [0, 0, 1, 1], [], []>} : vector<16x144xbf16>, vector<144x512xbf16>, vector<16x512xf32> -> vector<16x512xf32>
    %cst_22 = arith.constant dense<0.000000e+00> : vector<16x2xf32>
    %72 = tpu.matmul %71, %41, %cst_22 {dimension_numbers = #tpu.dot_dimension_numbers<[1], [1], [0], [0], [0, 0, 1, 0], [], []>} : vector<16x512xf32>, vector<2x512xf32>, vector<16x2xf32> -> vector<16x2xf32>
    %cst_23 = arith.constant 3.906250e-03 : f32
    %73 = vector.broadcast %cst_23 : f32 to vector<16x2xf32>
    %74 = arith.mulf %72, %73 : vector<16x2xf32>
    %cst_24 = arith.constant dense<0.000000e+00> : vector<16x512xf32>
    %75 = tpu.matmul %74, %41, %cst_24 {dimension_numbers = #tpu.dot_dimension_numbers<[1], [0], [0], [1], [0, 0, 1, 1], [], []>} : vector<16x2xf32>, vector<2x512xf32>, vector<16x512xf32> -> vector<16x512xf32>
    %76 = arith.subf %71, %75 : vector<16x512xf32>
    %77 = arith.mulf %76, %76 : vector<16x512xf32>
    %cst_25 = arith.constant dense<0.000000e+00> : vector<16x2xf32>
    %78 = tpu.matmul %77, %41, %cst_25 {dimension_numbers = #tpu.dot_dimension_numbers<[1], [1], [0], [0], [0, 0, 1, 0], [], []>} : vector<16x512xf32>, vector<2x512xf32>, vector<16x2xf32> -> vector<16x2xf32>
    %cst_26 = arith.constant 3.906250e-03 : f32
    %79 = vector.broadcast %cst_26 : f32 to vector<16x2xf32>
    %80 = arith.mulf %78, %79 : vector<16x2xf32>
    %cst_27 = arith.constant dense<0.000000e+00> : vector<16x512xf32>
    %81 = tpu.matmul %80, %41, %cst_27 {dimension_numbers = #tpu.dot_dimension_numbers<[1], [0], [0], [1], [0, 0, 1, 1], [], []>} : vector<16x2xf32>, vector<2x512xf32>, vector<16x512xf32> -> vector<16x512xf32>
    %cst_28 = arith.constant 9.99999974E-6 : f32
    %82 = vector.broadcast %cst_28 : f32 to vector<16x512xf32>
    %83 = arith.addf %81, %82 : vector<16x512xf32>
    %84 = math.rsqrt %83 : vector<16x512xf32>
    %85 = arith.mulf %76, %84 : vector<16x512xf32>
    %cst_29 = arith.constant 0.000000e+00 : f32
    %86 = vector.broadcast %cst_29 : f32 to vector<16x512xf32>
    %87 = arith.maximumf %85, %86 : vector<16x512xf32>
    %c16_i32_30 = arith.constant 16 : i32
    %88 = tpu.dynamic_rotate %87 by %c16_i32_30 dim 1 : vector<16x512xf32>, i32 -> vector<16x512xf32>
    %c496_i32_31 = arith.constant 496 : i32
    %89 = tpu.dynamic_rotate %87 by %c496_i32_31 dim 1 : vector<16x512xf32>, i32 -> vector<16x512xf32>
    %90 = arith.select %34, %89, %88 : vector<16x512xi1>, vector<16x512xf32>
    %91 = arith.select %36, %88, %89 : vector<16x512xi1>, vector<16x512xf32>
    %c1_i32_32 = arith.constant 1 : i32
    %92 = tpu.dynamic_rotate %90 by %c1_i32_32 dim 1 : vector<16x512xf32>, i32 -> vector<16x512xf32>
    %c511_i32_33 = arith.constant 511 : i32
    %93 = tpu.dynamic_rotate %90 by %c511_i32_33 dim 1 : vector<16x512xf32>, i32 -> vector<16x512xf32>
    %94 = arith.select %38, %93, %92 : vector<16x512xi1>, vector<16x512xf32>
    %95 = arith.select %40, %92, %93 : vector<16x512xi1>, vector<16x512xf32>
    %c1_i32_34 = arith.constant 1 : i32
    %96 = tpu.dynamic_rotate %87 by %c1_i32_34 dim 1 : vector<16x512xf32>, i32 -> vector<16x512xf32>
    %c511_i32_35 = arith.constant 511 : i32
    %97 = tpu.dynamic_rotate %87 by %c511_i32_35 dim 1 : vector<16x512xf32>, i32 -> vector<16x512xf32>
    %98 = arith.select %38, %97, %96 : vector<16x512xi1>, vector<16x512xf32>
    %99 = arith.select %40, %96, %97 : vector<16x512xi1>, vector<16x512xf32>
    %c1_i32_36 = arith.constant 1 : i32
    %100 = tpu.dynamic_rotate %91 by %c1_i32_36 dim 1 : vector<16x512xf32>, i32 -> vector<16x512xf32>
    %c511_i32_37 = arith.constant 511 : i32
    %101 = tpu.dynamic_rotate %91 by %c511_i32_37 dim 1 : vector<16x512xf32>, i32 -> vector<16x512xf32>
    %102 = arith.select %38, %101, %100 : vector<16x512xi1>, vector<16x512xf32>
    %103 = arith.select %40, %100, %101 : vector<16x512xi1>, vector<16x512xf32>
    %104 = arith.truncf %94 : vector<16x512xf32> to vector<16x512xbf16>
    %105 = arith.truncf %90 : vector<16x512xf32> to vector<16x512xbf16>
    %106 = arith.truncf %95 : vector<16x512xf32> to vector<16x512xbf16>
    %107 = arith.truncf %98 : vector<16x512xf32> to vector<16x512xbf16>
    %108 = arith.truncf %87 : vector<16x512xf32> to vector<16x512xbf16>
    %109 = arith.truncf %99 : vector<16x512xf32> to vector<16x512xbf16>
    %110 = arith.truncf %102 : vector<16x512xf32> to vector<16x512xbf16>
    %111 = arith.truncf %91 : vector<16x512xf32> to vector<16x512xbf16>
    %112 = arith.truncf %103 : vector<16x512xf32> to vector<16x512xbf16>
    %113 = tpu.concatenate %104, %105, %106, %107, %108, %109, %110, %111, %112 in 0 : vector<16x512xbf16>, vector<16x512xbf16>, vector<16x512xbf16>, vector<16x512xbf16>, vector<16x512xbf16>, vector<16x512xbf16>, vector<16x512xbf16>, vector<16x512xbf16>, vector<16x512xbf16> -> vector<144x512xbf16>
    %c0_38 = arith.constant 0 : index
    %c0_39 = arith.constant 0 : index
    %114 = vector.load %arg4[%c0_38, %c0_39] : memref<16x144xbf16, #tpu.memory_space<vmem>>, vector<16x144xbf16>
    %cst_40 = arith.constant dense<0.000000e+00> : vector<16x512xf32>
    %115 = tpu.matmul %114, %113, %cst_40 {dimension_numbers = #tpu.dot_dimension_numbers<[1], [0], [0], [1], [0, 0, 1, 1], [], []>} : vector<16x144xbf16>, vector<144x512xbf16>, vector<16x512xf32> -> vector<16x512xf32>
    %cst_41 = arith.constant dense<0.000000e+00> : vector<16x2xf32>
    %116 = tpu.matmul %115, %41, %cst_41 {dimension_numbers = #tpu.dot_dimension_numbers<[1], [1], [0], [0], [0, 0, 1, 0], [], []>} : vector<16x512xf32>, vector<2x512xf32>, vector<16x2xf32> -> vector<16x2xf32>
    %cst_42 = arith.constant 3.906250e-03 : f32
    %117 = vector.broadcast %cst_42 : f32 to vector<16x2xf32>
    %118 = arith.mulf %116, %117 : vector<16x2xf32>
    %cst_43 = arith.constant dense<0.000000e+00> : vector<16x512xf32>
    %119 = tpu.matmul %118, %41, %cst_43 {dimension_numbers = #tpu.dot_dimension_numbers<[1], [0], [0], [1], [0, 0, 1, 1], [], []>} : vector<16x2xf32>, vector<2x512xf32>, vector<16x512xf32> -> vector<16x512xf32>
    %120 = arith.subf %115, %119 : vector<16x512xf32>
    %121 = arith.mulf %120, %120 : vector<16x512xf32>
    %cst_44 = arith.constant dense<0.000000e+00> : vector<16x2xf32>
    %122 = tpu.matmul %121, %41, %cst_44 {dimension_numbers = #tpu.dot_dimension_numbers<[1], [1], [0], [0], [0, 0, 1, 0], [], []>} : vector<16x512xf32>, vector<2x512xf32>, vector<16x2xf32> -> vector<16x2xf32>
    %cst_45 = arith.constant 3.906250e-03 : f32
    %123 = vector.broadcast %cst_45 : f32 to vector<16x2xf32>
    %124 = arith.mulf %122, %123 : vector<16x2xf32>
    %cst_46 = arith.constant dense<0.000000e+00> : vector<16x512xf32>
    %125 = tpu.matmul %124, %41, %cst_46 {dimension_numbers = #tpu.dot_dimension_numbers<[1], [0], [0], [1], [0, 0, 1, 1], [], []>} : vector<16x2xf32>, vector<2x512xf32>, vector<16x512xf32> -> vector<16x512xf32>
    %cst_47 = arith.constant 9.99999974E-6 : f32
    %126 = vector.broadcast %cst_47 : f32 to vector<16x512xf32>
    %127 = arith.addf %125, %126 : vector<16x512xf32>
    %128 = math.rsqrt %127 : vector<16x512xf32>
    %129 = arith.mulf %120, %128 : vector<16x512xf32>
    %cst_48 = arith.constant 0.000000e+00 : f32
    %130 = vector.broadcast %cst_48 : f32 to vector<16x512xf32>
    %131 = arith.maximumf %129, %130 : vector<16x512xf32>
    %c16_i32_49 = arith.constant 16 : i32
    %132 = tpu.dynamic_rotate %131 by %c16_i32_49 dim 1 : vector<16x512xf32>, i32 -> vector<16x512xf32>
    %c496_i32_50 = arith.constant 496 : i32
    %133 = tpu.dynamic_rotate %131 by %c496_i32_50 dim 1 : vector<16x512xf32>, i32 -> vector<16x512xf32>
    %134 = arith.select %34, %133, %132 : vector<16x512xi1>, vector<16x512xf32>
    %135 = arith.select %36, %132, %133 : vector<16x512xi1>, vector<16x512xf32>
    %c1_i32_51 = arith.constant 1 : i32
    %136 = tpu.dynamic_rotate %134 by %c1_i32_51 dim 1 : vector<16x512xf32>, i32 -> vector<16x512xf32>
    %c511_i32_52 = arith.constant 511 : i32
    %137 = tpu.dynamic_rotate %134 by %c511_i32_52 dim 1 : vector<16x512xf32>, i32 -> vector<16x512xf32>
    %138 = arith.select %38, %137, %136 : vector<16x512xi1>, vector<16x512xf32>
    %139 = arith.select %40, %136, %137 : vector<16x512xi1>, vector<16x512xf32>
    %c1_i32_53 = arith.constant 1 : i32
    %140 = tpu.dynamic_rotate %131 by %c1_i32_53 dim 1 : vector<16x512xf32>, i32 -> vector<16x512xf32>
    %c511_i32_54 = arith.constant 511 : i32
    %141 = tpu.dynamic_rotate %131 by %c511_i32_54 dim 1 : vector<16x512xf32>, i32 -> vector<16x512xf32>
    %142 = arith.select %38, %141, %140 : vector<16x512xi1>, vector<16x512xf32>
    %143 = arith.select %40, %140, %141 : vector<16x512xi1>, vector<16x512xf32>
    %c1_i32_55 = arith.constant 1 : i32
    %144 = tpu.dynamic_rotate %135 by %c1_i32_55 dim 1 : vector<16x512xf32>, i32 -> vector<16x512xf32>
    %c511_i32_56 = arith.constant 511 : i32
    %145 = tpu.dynamic_rotate %135 by %c511_i32_56 dim 1 : vector<16x512xf32>, i32 -> vector<16x512xf32>
    %146 = arith.select %38, %145, %144 : vector<16x512xi1>, vector<16x512xf32>
    %147 = arith.select %40, %144, %145 : vector<16x512xi1>, vector<16x512xf32>
    %148 = arith.truncf %138 : vector<16x512xf32> to vector<16x512xbf16>
    %149 = arith.truncf %134 : vector<16x512xf32> to vector<16x512xbf16>
    %150 = arith.truncf %139 : vector<16x512xf32> to vector<16x512xbf16>
    %151 = arith.truncf %142 : vector<16x512xf32> to vector<16x512xbf16>
    %152 = arith.truncf %131 : vector<16x512xf32> to vector<16x512xbf16>
    %153 = arith.truncf %143 : vector<16x512xf32> to vector<16x512xbf16>
    %154 = arith.truncf %146 : vector<16x512xf32> to vector<16x512xbf16>
    %155 = arith.truncf %135 : vector<16x512xf32> to vector<16x512xbf16>
    %156 = arith.truncf %147 : vector<16x512xf32> to vector<16x512xbf16>
    %157 = tpu.concatenate %148, %149, %150, %151, %152, %153, %154, %155, %156 in 0 : vector<16x512xbf16>, vector<16x512xbf16>, vector<16x512xbf16>, vector<16x512xbf16>, vector<16x512xbf16>, vector<16x512xbf16>, vector<16x512xbf16>, vector<16x512xbf16>, vector<16x512xbf16> -> vector<144x512xbf16>
    %c0_57 = arith.constant 0 : index
    %c0_58 = arith.constant 0 : index
    %158 = vector.load %arg5[%c0_57, %c0_58] : memref<16x144xbf16, #tpu.memory_space<vmem>>, vector<16x144xbf16>
    %cst_59 = arith.constant dense<0.000000e+00> : vector<16x512xf32>
    %159 = tpu.matmul %158, %157, %cst_59 {dimension_numbers = #tpu.dot_dimension_numbers<[1], [0], [0], [1], [0, 0, 1, 1], [], []>} : vector<16x144xbf16>, vector<144x512xbf16>, vector<16x512xf32> -> vector<16x512xf32>
    %cst_60 = arith.constant dense<0.000000e+00> : vector<16x2xf32>
    %160 = tpu.matmul %159, %41, %cst_60 {dimension_numbers = #tpu.dot_dimension_numbers<[1], [1], [0], [0], [0, 0, 1, 0], [], []>} : vector<16x512xf32>, vector<2x512xf32>, vector<16x2xf32> -> vector<16x2xf32>
    %cst_61 = arith.constant 3.906250e-03 : f32
    %161 = vector.broadcast %cst_61 : f32 to vector<16x2xf32>
    %162 = arith.mulf %160, %161 : vector<16x2xf32>
    %cst_62 = arith.constant dense<0.000000e+00> : vector<16x512xf32>
    %163 = tpu.matmul %162, %41, %cst_62 {dimension_numbers = #tpu.dot_dimension_numbers<[1], [0], [0], [1], [0, 0, 1, 1], [], []>} : vector<16x2xf32>, vector<2x512xf32>, vector<16x512xf32> -> vector<16x512xf32>
    %164 = arith.subf %159, %163 : vector<16x512xf32>
    %165 = arith.mulf %164, %164 : vector<16x512xf32>
    %cst_63 = arith.constant dense<0.000000e+00> : vector<16x2xf32>
    %166 = tpu.matmul %165, %41, %cst_63 {dimension_numbers = #tpu.dot_dimension_numbers<[1], [1], [0], [0], [0, 0, 1, 0], [], []>} : vector<16x512xf32>, vector<2x512xf32>, vector<16x2xf32> -> vector<16x2xf32>
    %cst_64 = arith.constant 3.906250e-03 : f32
    %167 = vector.broadcast %cst_64 : f32 to vector<16x2xf32>
    %168 = arith.mulf %166, %167 : vector<16x2xf32>
    %cst_65 = arith.constant dense<0.000000e+00> : vector<16x512xf32>
    %169 = tpu.matmul %168, %41, %cst_65 {dimension_numbers = #tpu.dot_dimension_numbers<[1], [0], [0], [1], [0, 0, 1, 1], [], []>} : vector<16x2xf32>, vector<2x512xf32>, vector<16x512xf32> -> vector<16x512xf32>
    %cst_66 = arith.constant 9.99999974E-6 : f32
    %170 = vector.broadcast %cst_66 : f32 to vector<16x512xf32>
    %171 = arith.addf %169, %170 : vector<16x512xf32>
    %172 = math.rsqrt %171 : vector<16x512xf32>
    %173 = arith.mulf %164, %172 : vector<16x512xf32>
    %cst_67 = arith.constant 0.000000e+00 : f32
    %174 = vector.broadcast %cst_67 : f32 to vector<16x512xf32>
    %175 = arith.maximumf %173, %174 : vector<16x512xf32>
    %c16_i32_68 = arith.constant 16 : i32
    %176 = tpu.dynamic_rotate %175 by %c16_i32_68 dim 1 : vector<16x512xf32>, i32 -> vector<16x512xf32>
    %c496_i32_69 = arith.constant 496 : i32
    %177 = tpu.dynamic_rotate %175 by %c496_i32_69 dim 1 : vector<16x512xf32>, i32 -> vector<16x512xf32>
    %178 = arith.select %34, %177, %176 : vector<16x512xi1>, vector<16x512xf32>
    %179 = arith.select %36, %176, %177 : vector<16x512xi1>, vector<16x512xf32>
    %c1_i32_70 = arith.constant 1 : i32
    %180 = tpu.dynamic_rotate %178 by %c1_i32_70 dim 1 : vector<16x512xf32>, i32 -> vector<16x512xf32>
    %c511_i32_71 = arith.constant 511 : i32
    %181 = tpu.dynamic_rotate %178 by %c511_i32_71 dim 1 : vector<16x512xf32>, i32 -> vector<16x512xf32>
    %182 = arith.select %38, %181, %180 : vector<16x512xi1>, vector<16x512xf32>
    %183 = arith.select %40, %180, %181 : vector<16x512xi1>, vector<16x512xf32>
    %c1_i32_72 = arith.constant 1 : i32
    %184 = tpu.dynamic_rotate %175 by %c1_i32_72 dim 1 : vector<16x512xf32>, i32 -> vector<16x512xf32>
    %c511_i32_73 = arith.constant 511 : i32
    %185 = tpu.dynamic_rotate %175 by %c511_i32_73 dim 1 : vector<16x512xf32>, i32 -> vector<16x512xf32>
    %186 = arith.select %38, %185, %184 : vector<16x512xi1>, vector<16x512xf32>
    %187 = arith.select %40, %184, %185 : vector<16x512xi1>, vector<16x512xf32>
    %c1_i32_74 = arith.constant 1 : i32
    %188 = tpu.dynamic_rotate %179 by %c1_i32_74 dim 1 : vector<16x512xf32>, i32 -> vector<16x512xf32>
    %c511_i32_75 = arith.constant 511 : i32
    %189 = tpu.dynamic_rotate %179 by %c511_i32_75 dim 1 : vector<16x512xf32>, i32 -> vector<16x512xf32>
    %190 = arith.select %38, %189, %188 : vector<16x512xi1>, vector<16x512xf32>
    %191 = arith.select %40, %188, %189 : vector<16x512xi1>, vector<16x512xf32>
    %192 = arith.truncf %182 : vector<16x512xf32> to vector<16x512xbf16>
    %193 = arith.truncf %178 : vector<16x512xf32> to vector<16x512xbf16>
    %194 = arith.truncf %183 : vector<16x512xf32> to vector<16x512xbf16>
    %195 = arith.truncf %186 : vector<16x512xf32> to vector<16x512xbf16>
    %196 = arith.truncf %175 : vector<16x512xf32> to vector<16x512xbf16>
    %197 = arith.truncf %187 : vector<16x512xf32> to vector<16x512xbf16>
    %198 = arith.truncf %190 : vector<16x512xf32> to vector<16x512xbf16>
    %199 = arith.truncf %179 : vector<16x512xf32> to vector<16x512xbf16>
    %200 = arith.truncf %191 : vector<16x512xf32> to vector<16x512xbf16>
    %201 = tpu.concatenate %192, %193, %194, %195, %196, %197, %198, %199, %200 in 0 : vector<16x512xbf16>, vector<16x512xbf16>, vector<16x512xbf16>, vector<16x512xbf16>, vector<16x512xbf16>, vector<16x512xbf16>, vector<16x512xbf16>, vector<16x512xbf16>, vector<16x512xbf16> -> vector<144x512xbf16>
    %c0_76 = arith.constant 0 : index
    %c0_77 = arith.constant 0 : index
    %202 = vector.load %arg6[%c0_76, %c0_77] : memref<16x144xbf16, #tpu.memory_space<vmem>>, vector<16x144xbf16>
    %cst_78 = arith.constant dense<0.000000e+00> : vector<16x512xf32>
    %203 = tpu.matmul %202, %201, %cst_78 {dimension_numbers = #tpu.dot_dimension_numbers<[1], [0], [0], [1], [0, 0, 1, 1], [], []>} : vector<16x144xbf16>, vector<144x512xbf16>, vector<16x512xf32> -> vector<16x512xf32>
    %cst_79 = arith.constant dense<0.000000e+00> : vector<16x2xf32>
    %204 = tpu.matmul %203, %41, %cst_79 {dimension_numbers = #tpu.dot_dimension_numbers<[1], [1], [0], [0], [0, 0, 1, 0], [], []>} : vector<16x512xf32>, vector<2x512xf32>, vector<16x2xf32> -> vector<16x2xf32>
    %cst_80 = arith.constant 3.906250e-03 : f32
    %205 = vector.broadcast %cst_80 : f32 to vector<16x2xf32>
    %206 = arith.mulf %204, %205 : vector<16x2xf32>
    %cst_81 = arith.constant dense<0.000000e+00> : vector<16x512xf32>
    %207 = tpu.matmul %206, %41, %cst_81 {dimension_numbers = #tpu.dot_dimension_numbers<[1], [0], [0], [1], [0, 0, 1, 1], [], []>} : vector<16x2xf32>, vector<2x512xf32>, vector<16x512xf32> -> vector<16x512xf32>
    %208 = arith.subf %203, %207 : vector<16x512xf32>
    %209 = arith.mulf %208, %208 : vector<16x512xf32>
    %cst_82 = arith.constant dense<0.000000e+00> : vector<16x2xf32>
    %210 = tpu.matmul %209, %41, %cst_82 {dimension_numbers = #tpu.dot_dimension_numbers<[1], [1], [0], [0], [0, 0, 1, 0], [], []>} : vector<16x512xf32>, vector<2x512xf32>, vector<16x2xf32> -> vector<16x2xf32>
    %cst_83 = arith.constant 3.906250e-03 : f32
    %211 = vector.broadcast %cst_83 : f32 to vector<16x2xf32>
    %212 = arith.mulf %210, %211 : vector<16x2xf32>
    %cst_84 = arith.constant dense<0.000000e+00> : vector<16x512xf32>
    %213 = tpu.matmul %212, %41, %cst_84 {dimension_numbers = #tpu.dot_dimension_numbers<[1], [0], [0], [1], [0, 0, 1, 1], [], []>} : vector<16x2xf32>, vector<2x512xf32>, vector<16x512xf32> -> vector<16x512xf32>
    %cst_85 = arith.constant 9.99999974E-6 : f32
    %214 = vector.broadcast %cst_85 : f32 to vector<16x512xf32>
    %215 = arith.addf %213, %214 : vector<16x512xf32>
    %216 = math.rsqrt %215 : vector<16x512xf32>
    %217 = arith.mulf %208, %216 : vector<16x512xf32>
    %cst_86 = arith.constant 0.000000e+00 : f32
    %218 = vector.broadcast %cst_86 : f32 to vector<16x512xf32>
    %219 = arith.maximumf %217, %218 : vector<16x512xf32>
    %c0_87 = arith.constant 0 : index
    %c0_88 = arith.constant 0 : index
    %220 = vector.load %arg7[%c0_87, %c0_88] : memref<3x16xf32, #tpu.memory_space<vmem>>, vector<3x16xf32>
    %cst_89 = arith.constant dense<0.000000e+00> : vector<3x512xf32>
    %221 = tpu.matmul %220, %219, %cst_89 {dimension_numbers = #tpu.dot_dimension_numbers<[1], [0], [0], [1], [0, 0, 1, 1], [], []>} : vector<3x16xf32>, vector<16x512xf32>, vector<3x512xf32> -> vector<3x512xf32>
    %c0_90 = arith.constant 0 : index
    %c0_91 = arith.constant 0 : index
    %222 = vector.load %arg8[%c0_90, %c0_91] : memref<3x1xf32, #tpu.memory_space<vmem>>, vector<3x1xf32>
    %223 = vector.broadcast %222 : vector<3x1xf32> to vector<3x512xf32>
    %224 = arith.addf %221, %223 : vector<3x512xf32>
    %225 = arith.negf %224 : vector<3x512xf32>
    %226 = math.exp %225 : vector<3x512xf32>
    %cst_92 = arith.constant 1.000000e+00 : f32
    %227 = vector.broadcast %cst_92 : f32 to vector<3x512xf32>
    %228 = arith.addf %227, %226 : vector<3x512xf32>
    %229 = arith.divf %227, %228 : vector<3x512xf32>
    %230 = vector.shape_cast %229 : vector<3x512xf32> to vector<1x3x512xf32>
    %c0_93 = arith.constant 0 : index
    %c0_94 = arith.constant 0 : index
    %c0_95 = arith.constant 0 : index
    %231 = vector.load %arg9[%c0_93, %c0_94, %c0_95] : memref<1x3x512xf32, #tpu.memory_space<vmem>>, vector<1x3x512xf32>
    tpu.vector_store %arg9[%c0_93, %c0_94, %c0_95], %230 {strides = array<i32>} : memref<1x3x512xf32, #tpu.memory_space<vmem>>, vector<1x3x512xf32>,
    return
  }
  func.func @transform_0(%arg0: i32) -> (i32, i32, i32) {
    %c0_i32 = arith.constant 0 : i32
    %c0_i32_0 = arith.constant 0 : i32
    %c0_i32_1 = arith.constant 0 : i32
    return %arg0, %c0_i32, %c0_i32_0 : i32, i32, i32
  }
  func.func @transform_1(%arg0: i32) -> (i32, i32) {
    %c0_i32 = arith.constant 0 : i32
    %c0_i32_0 = arith.constant 0 : i32
    %c0_i32_1 = arith.constant 0 : i32
    return %c0_i32, %c0_i32_0 : i32, i32
  }
  func.func @transform_2(%arg0: i32) -> (i32, i32) {
    %c0_i32 = arith.constant 0 : i32
    %c0_i32_0 = arith.constant 0 : i32
    %c0_i32_1 = arith.constant 0 : i32
    return %c0_i32, %c0_i32_0 : i32, i32
  }
  func.func @transform_3(%arg0: i32) -> (i32, i32) {
    %c0_i32 = arith.constant 0 : i32
    %c0_i32_0 = arith.constant 0 : i32
    %c0_i32_1 = arith.constant 0 : i32
    return %c0_i32, %c0_i32_0 : i32, i32
  }
  func.func @transform_4(%arg0: i32) -> (i32, i32) {
    %c0_i32 = arith.constant 0 : i32
    %c0_i32_0 = arith.constant 0 : i32
    %c0_i32_1 = arith.constant 0 : i32
    return %c0_i32, %c0_i32_0 : i32, i32
  }
  func.func @transform_5(%arg0: i32) -> (i32, i32) {
    %c0_i32 = arith.constant 0 : i32
    %c0_i32_0 = arith.constant 0 : i32
    %c0_i32_1 = arith.constant 0 : i32
    return %c0_i32, %c0_i32_0 : i32, i32
  }
  func.func @transform_6(%arg0: i32) -> (i32, i32) {
    %c0_i32 = arith.constant 0 : i32
    %c0_i32_0 = arith.constant 0 : i32
    %c0_i32_1 = arith.constant 0 : i32
    return %c0_i32, %c0_i32_0 : i32, i32
  }
  func.func @transform_7(%arg0: i32) -> (i32, i32) {
    %c0_i32 = arith.constant 0 : i32
    %c0_i32_0 = arith.constant 0 : i32
    %c0_i32_1 = arith.constant 0 : i32
    return %c0_i32, %c0_i32_0 : i32, i32
  }
  func.func @transform_8(%arg0: i32) -> (i32, i32, i32) {
    %c0_i32 = arith.constant 0 : i32
    %c0_i32_0 = arith.constant 0 : i32
    %c0_i32_1 = arith.constant 0 : i32
    return %arg0, %c0_i32, %c0_i32_0 : i32, i32, i32
  }
}

</mosaic_0001>

<bundles_post_ra>
// kernel: jnet_forward.1
= control target key start
LH: loop header
LB: loop body
LE: loop exit
PB: predicated region body
PF: predicated region fallthrough
CT: control target
= control target key end

     0   :  { %s5434_s21 = smov 16   ;;  %s5435_s22 = smov 112   ;;  %v8059_v12 = vlaneseq  ;;  %v8144_v54 = vmov 0  ;;  %v8147_v55 = vmov 0  ;;  %v8150_v58 = vmov 0  ;;  %s8050_s0 = inlined_call_operand.vmem [shape: f32[1,16,512], index: 0, kind: input, shape index: {}]   ;;  %s8051_s2 = inlined_call_operand.vmem [shape: bf16[16,144], index: 2, kind: input, shape index: {}]   ;;  %s8052_s1 = inlined_call_operand.vmem [shape: f32[2,512], index: 1, kind: input, shape index: {}]   ;;  %s8053_s3 = inlined_call_operand.vmem [shape: bf16[16,144], index: 3, kind: input, shape index: {}]   ;;  %s8054_s4 = inlined_call_operand.vmem [shape: bf16[16,144], index: 4, kind: input, shape index: {}]   ;;  %s8055_s5 = inlined_call_operand.vmem [shape: bf16[16,144], index: 5, kind: input, shape index: {}]   ;;  %s8056_s7 = inlined_call_operand.vmem [shape: f32[3,1], index: 7, kind: input, shape index: {}]   ;;  %s8057_s6 = inlined_call_operand.vmem [shape: f32[3,16], index: 6, kind: input, shape index: {}]   ;;  %s8058_s8 = inlined_call_operand.vmem [shape: f32[1,3,512], index: 8, kind: output, shape index: {}]  }
   0x1   :  { %v5489_v0 = vld [vmem:[%s8050_s0 + $0x10] sm:$0xff]  ;;  %v5499_v2 = vld [vmem:[%s8050_s0] sm:$0xff]  ;;  %v5511_v5 = vld [vmem:[%s8050_s0 + $0x18] sm:$0xff]  ;;  %s5437_s23 = smov 127   ;;  %v8153_v59 = vmov 0  ;;  %vm8064_vm6 = vcmask 130048  }
   0x2   :  { %v5494_v1 = vld [vmem:[%s8050_s0 + $0x30] sm:$0xff]  ;;  %v5506_v4 = vld [vmem:[%s8050_s0 + $0x20] sm:$0xff]  ;;  %v5516_v6 = vld [vmem:[%s8050_s0 + $0x38] sm:$0xff]  ;;  %v5553_v14 = vand.u32 127, %v8059_v12 }
   0x3   :  { %v4710_v3 = vpack.i.bf16 %v5494_v1, %v5489_v0  ;;  %v4700_v7 = vpack.i.bf16 %v5506_v4, %v5499_v2  ;;  %v5523_v8 = vld [vmem:[%s8050_s0 + $0x8] sm:$0xff]  ;;  %v4715_v10 = vpack.i.bf16 %v5516_v6, %v5511_v5 }
   0x4   :  { %v5528_v9 = vld [vmem:[%s8050_s0 + $0x28] sm:$0xff]  ;;  %s5436_s0 = smov 1   ;;  %vm8084_vm0 = vcmp.lt.s32.totalorder %v5553_v14, 16  ;;  %v5559_v22 = vadd.s32 384, %v5553_v14  ;;  %v5562_v23 = vadd.s32 128, %v5553_v14  ;;  %v5565_v28 = vadd.s32 256, %v5553_v14 }
   0x5   :  { %4711 = vrot.lane.b32.xlu1 %v4710_v3, %s5434_s21  ;;  %4701 = vrot.lane.b32.xlu0 %v4700_v7, %s5434_s21  ;;  %v4705_v11 = vpack.i.bf16 %v5528_v9, %v5523_v8  ;;  %vm8083_vm1 = vcmp.lt.s32.totalorder %v5553_v14, 112  ;;  %v39_v41 = vand.u32 255, %v5553_v14  ;;  %vm8082_vm7 = vcmp.lt.s32.totalorder %v5553_v14, 1 }
   0x6   :  { %v60_v39 = vand.u32 255, %v5559_v22  ;;  %v46_v40 = vand.u32 255, %v5562_v23  ;;  %v53_v42 = vand.u32 255, %v5565_v28  ;;  %vm8081_vm8 = vcmp.lt.s32.totalorder %v5553_v14, 127 }
   0x7   :  { %vm5609_vm4 = vcmp.lt.s32.totalorder %v39_v41, 16 }
   0x8   :  { %vm5596_vm2 = vcmp.ge.s32.totalorder %v60_v39, 240  ;;  %vm5600_vm3 = vcmp.ge.s32.totalorder %v46_v40, 240  ;;  %v8151_v58 = vsel %vm5609_vm4, 4294967295, %v8150_v58  ;;  %vm5613_vm5 = vcmp.lt.s32.totalorder %v53_v42, 16  ;;  %v5343_v42 = vld [vmem:[%s8051_s2 + $0x4] ss:$8 sps:$4 sm:$0xff]  }
   0x9   :  { %4716 = vrot.lane.b32.xlu1 %v4715_v10, %s5434_s21  ;;  %4706 = vrot.lane.b32.xlu0 %v4705_v11, %s5434_s21  ;;  %v8145_v54 = vsel %vm5596_vm2, 4294967295, %v8144_v54  ;;  %v8148_v55 = vsel %vm5600_vm3, 4294967295, %v8147_v55  ;;  %8152 = vst [vmem:[#allocation6_spill] sm:$0xff] %v8151_v58  ;;  %v8154_v59 = vsel %vm5613_vm5, 4294967295, %v8153_v59 }
   0xa   :  { %8146 = vst [vmem:[#allocation4_spill] sm:$0xff] %v8145_v54  ;;  %8149 = vst [vmem:[#allocation5_spill] sm:$0xff] %v8148_v55  ;;  %4609 = vmatprep.mubr.msk.bf16.mxu0 %vm8064_vm6, %v5343_v42  ;;  %4610 = vmatprep.mubr.msk.bf16.mxu1 %vm8064_vm6, %v5343_v42 }
   0xb   :  { %8155 = vst [vmem:[#allocation7_spill] sm:$0xff] %v8154_v59 }
   0xd   :  { %4726 = vrot.lane.b32.xlu1 %v4705_v11, %s5435_s22  ;;  %4721 = vrot.lane.b32.xlu0 %v4700_v7, %s5435_s22 }
  0x11   :  { %4736 = vrot.lane.b32.xlu1 %v4715_v10, %s5435_s22  ;;  %4731 = vrot.lane.b32.xlu0 %v4710_v3, %s5435_s22 }
  0x15   :  { %4746 = vrot.lane.b32.xlu1 %v4705_v11, %s5436_s0  ;;  %4741 = vrot.lane.b32.xlu0 %v4700_v7, %s5436_s0 }
  0x19   :  { %4756 = vrot.lane.b32.xlu1 %v4715_v10, %s5436_s0  ;;  %4751 = vrot.lane.b32.xlu0 %v4710_v3, %s5436_s0 }
  0x1d   :  { %4766 = vrot.lane.b32.xlu1 %v4705_v11, %s5437_s23  ;;  %4761 = vrot.lane.b32.xlu0 %v4700_v7, %s5437_s23 }
  0x21   :  { %4776 = vrot.lane.b32.xlu1 %v4715_v10, %s5437_s23  ;;  %4771 = vrot.lane.b32.xlu0 %v4710_v3, %s5437_s23 }
  0x77   :  { %v5550_v13 = vpop.permute.xlu1 %4711  ;;  %v4702_v15 = vpop.permute.xlu0 %4701 }
  0x78   :  { %v4714_v16 = vunpack.i.h.bf16 %v5550_v13  ;;  %v4713_v17 = vunpack.i.l.bf16 %v5550_v13  ;;  %v4704_v24 = vunpack.i.h.bf16 %v4702_v15  ;;  %v4703_v25 = vunpack.i.l.bf16 %v4702_v15 }
  0x7b   :  { %v4717_v18 = vpop.permute.xlu1 %4716  ;;  %v4707_v21 = vpop.permute.xlu0 %4706 }
  0x7c   :  { %v4719_v19 = vunpack.i.h.bf16 %v4717_v18  ;;  %v4718_v20 = vunpack.i.l.bf16 %v4717_v18  ;;  %v4709_v26 = vunpack.i.h.bf16 %v4707_v21  ;;  %v4708_v27 = vunpack.i.l.bf16 %v4707_v21 }
  0x7e   :  { %v5569_v29 = vsel %vm8084_vm0, %v4703_v25, %v4708_v27  ;;  %v5573_v30 = vsel %vm8084_vm0, %v4704_v24, %v4709_v26  ;;  %v5577_v32 = vsel %vm8084_vm0, %v4713_v17, %v4718_v20  ;;  %v5581_v33 = vsel %vm8084_vm0, %v4714_v16, %v4719_v19 }
  0x7f   :  { %v4727_v31 = vpop.permute.xlu1 %4726  ;;  %8142 = vst [vmem:[#allocation2_spill] sm:$0xff] %v5577_v32  ;;  %8143 = vst [vmem:[#allocation3_spill] sm:$0xff] %v5581_v33  ;;  %v4722_v36 = vpop.permute.xlu0 %4721  ;;  %v179_v13 = vsel %vm8084_vm0, %v4718_v20, %v4703_v25  ;;  %v180_v15 = vsel %vm8084_vm0, %v4719_v19, %v4704_v24  ;;  %v4820_v40 = vpack.i.bf16 %v5573_v30, %v5569_v29 }
  0x80   :  { %v4729_v34 = vunpack.i.h.bf16 %v4727_v31  ;;  %v4728_v35 = vunpack.i.l.bf16 %v4727_v31  ;;  %v4724_v37 = vunpack.i.h.bf16 %v4722_v36  ;;  %v4723_v38 = vunpack.i.l.bf16 %v4722_v36 }
  0x81   :  { %v176_v31 = vsel %vm8084_vm0, %v4709_v26, %v4714_v16  ;;  %v4825_v41 = vpack.i.bf16 %v5581_v33, %v5577_v32 }
  0x82   :  { %v202_v46 = vsel %vm8083_vm1, %v4723_v38, %v4728_v35  ;;  %v203_v47 = vsel %vm8083_vm1, %v4724_v37, %v4729_v34 }
  0x83   :  { %v4737_v45 = vpop.permute.xlu1 %4736  ;;  %v4732_v50 = vpop.permute.xlu0 %4731  ;;  %v4780_v51 = vpack.i.bf16 %v203_v47, %v202_v46  ;;  %v444_v20 = vpack.c.bf16 %v203_v47, %v202_v46  ;;  %v5648_v19 = vsel %vm5609_vm4, %v202_v46, %v179_v13  ;;  %v5652_v24 = vsel %vm5609_vm4, %v203_v47, %v180_v15 }
  0x84   :  { %v4739_v48 = vunpack.i.h.bf16 %v4737_v45  ;;  %v4738_v49 = vunpack.i.l.bf16 %v4737_v45  ;;  %v4734_v52 = vunpack.i.h.bf16 %v4732_v50  ;;  %v4733_v53 = vunpack.i.l.bf16 %v4732_v50  ;;  %8156 = vst [vmem:[#allocation8_spill] sm:$0xff] %v5648_v19  ;;  %8157 = vst [vmem:[#allocation9_spill] sm:$0xff] %v5652_v24 }
  0x85   :  { %4781 = vrot.lane.b32.xlu0 %v4780_v51, %s5436_s0 }
  0x86   :  { %v204_v56 = vsel %vm8083_vm1, %v4738_v49, %v4723_v38  ;;  %v205_v57 = vsel %vm8083_vm1, %v4739_v48, %v4724_v37  ;;  %v201_v60 = vsel %vm8083_vm1, %v4729_v34, %v4734_v52  ;;  %v200_v61 = vsel %vm8083_vm1, %v4728_v35, %v4733_v53 }
  0x87   :  { %v198_v62 = vsel %vm8083_vm1, %v4733_v53, %v4738_v49  ;;  %v199_v63 = vsel %vm8083_vm1, %v4734_v52, %v4739_v48  ;;  %v217_v7 = vsel %vm5596_vm2, %v5577_v32, %v204_v56  ;;  %v221_v10 = vsel %vm5596_vm2, %v5581_v33, %v205_v57  ;;  %v4742_v45 = vpop.permute.xlu0 %4741  ;;  %v4747_v46 = vpop.permute.xlu1 %4746 }
  0x88   :  { %v4785_v3 = vpack.i.bf16 %v199_v63, %v198_v62  ;;  %v215_v11 = vsel %vm5600_vm3, %v5569_v29, %v200_v61  ;;  %v447_v18 = vpack.c.bf16 %v221_v10, %v217_v7  ;;  %v219_v21 = vsel %vm5600_vm3, %v5573_v30, %v201_v60 }
  0x89   :  { %v175_v34 = vsel %vm8084_vm0, %v4708_v27, %v4713_v17  ;;  %v4800_v35 = vpack.i.bf16 %v219_v21, %v215_v11  ;;  %v445_v36 = vpack.c.bf16 %v219_v21, %v215_v11  ;;  %v446_v25 = vpack.c.bf16 %v199_v63, %v198_v62 }
  0x8a   :  { %4786 = vrot.lane.b32.xlu0 %v4785_v3, %s5436_s0  ;;  %510 = vmatprep.subr.bf16.mxu1 %v447_v18  ;;  %v5657_v16 = vsel %vm5613_vm5, %v198_v62, %v175_v34  ;;  %v5661_v17 = vsel %vm5613_vm5, %v199_v63, %v176_v31  ;;  %v4805_v26 = vpack.i.bf16 %v221_v10, %v217_v7  ;;  %v94_v52 = vand.u32 15, %v5562_v23 }
  0x8b   :  { %4801 = vrot.lane.b32.xlu1 %v4800_v35, %s5436_s0  ;;  %467 = vmatprep.subr.bf16.mxu0 %v445_v36  ;;  %8158 = vst [vmem:[#allocation10_spill] sm:$0xff] %v5657_v16  ;;  %8159 = vst [vmem:[#allocation11_spill] sm:$0xff] %v5661_v17  ;;  %v4835_v38 = vpack.i.bf16 %v5652_v24, %v5648_v19  ;;  %v4840_v39 = vpack.i.bf16 %v5661_v17, %v5657_v16  ;;  %v4752_v47 = vpop.permute.xlu0 %4751  ;;  %v4757_v48 = vpop.permute.xlu1 %4756  ;;  %v87_v53 = vand.u32 15, %v5553_v14 }
  0x8c   :  { %468 = vmatpush1.bf16.msra.mxu0 %v444_v20  ;;  %511 = vmatpush1.bf16.msra.mxu1 %v446_v25  ;;  %v4744_v56 = vunpack.i.h.bf16 %v4742_v45  ;;  %v4743_v57 = vunpack.i.l.bf16 %v4742_v45  ;;  %v4759_v60 = vunpack.i.h.bf16 %v4757_v48  ;;  %v4758_v61 = vunpack.i.l.bf16 %v4757_v48 }
  0x8d   :  { %v4749_v11 = vunpack.i.h.bf16 %v4747_v46  ;;  %v4748_v13 = vunpack.i.l.bf16 %v4747_v46  ;;  %v108_v21 = vand.u32 15, %v5559_v22  ;;  %vm5704_vm9 = vcmp.eq.s32.totalorder %v94_v52, 15 }
  0x8e   :  { %4791 = vrot.lane.b32.xlu0 %v4780_v51, %s5437_s23  ;;  %v101_v34 = vand.u32 15, %v5565_v28  ;;  %vm5709_vm10 = vcmp.eq.s32.totalorder %v87_v53, 15  ;;  %v5717_v20 = vsel %vm8082_vm7, %v4758_v61, %v4743_v57  ;;  %v5721_v25 = vsel %vm8082_vm7, %v4759_v60, %v4744_v56 }
  0x8f   :  { %4806 = vrot.lane.b32.xlu1 %v4805_v26, %s5436_s0  ;;  %v4762_v49 = vpop.permute.xlu0 %4761  ;;  %v4767_v50 = vpop.permute.xlu1 %4766  ;;  %vm5749_vm11 = vcmp.eq.s32.totalorder %v108_v21, 15  ;;  %vm5753_vm12 = vcmp.eq.s32.totalorder %v87_v53, 0  ;;  %vm5783_vm13 = vcmp.eq.s32.totalorder %v94_v52, 0  ;;  %vm5831_vm15 = vcmp.eq.s32.totalorder %v108_v21, 0 }
  0x90   :  { %v4769_v62 = vunpack.i.h.bf16 %v4767_v50  ;;  %v4768_v63 = vunpack.i.l.bf16 %v4767_v50  ;;  %v4763_v7 = vunpack.i.l.bf16 %v4762_v49  ;;  %vm5795_vm14 = vcmp.eq.s32.totalorder %v101_v34, 15 }
  0x91   :  { %vm5835_vm6 = vcmp.eq.s32.totalorder %v101_v34, 0 }
  0x92   :  { %4796 = vrot.lane.b32.xlu0 %v4785_v3, %s5437_s23  ;;  %v4764_v3 = vunpack.i.h.bf16 %v4762_v49  ;;  %v5725_v22 = vsel %vm8081_vm8, %v4763_v7, %v4768_v63 }
  0x93   :  { %4811 = vrot.lane.b32.xlu1 %v4800_v35, %s5437_s23  ;;  %v5693_v51 = vpop.permute.xlu0 %4771  ;;  %v4777_v15 = vpop.permute.xlu1 %4776  ;;  %v344_v50 = vsel %vm5709_vm10, %v5717_v20, %v5725_v22  ;;  %v5351_v35 = vld [vmem:[%s8055_s5] ss:$8 sps:$4 sm:$0xff]  }
  0x94   :  { %v4774_v23 = vunpack.i.h.bf16 %v5693_v51  ;;  %v4773_v18 = vunpack.i.l.bf16 %v5693_v51  ;;  %v5729_v28 = vsel %vm8081_vm8, %v4764_v3, %v4769_v62  ;;  %v4778_v42 = vunpack.i.l.bf16 %v4777_v15 }
  0x95   :  { %v348_v51 = vsel %vm5709_vm10, %v5721_v25, %v5729_v28 }
  0x96   :  { %4836 = vrot.lane.b32.xlu0 %v4835_v38, %s5436_s0  ;;  %v5743_v46 = vsel %vm8081_vm8, %v4768_v63, %v4773_v18  ;;  %v5747_v48 = vsel %vm8081_vm8, %v4769_v62, %v4774_v23  ;;  %v5777_v62 = vsel %vm8081_vm8, %v4778_v42, %v4763_v7  ;;  %v5799_v12 = vpack.c.bf16 %v348_v51, %v344_v50 }
  0x97   :  { %4816 = vrot.lane.b32.xlu1 %v4805_v26, %s5437_s23  ;;  %v4754_v26 = vunpack.i.h.bf16 %v4752_v47  ;;  %v5829_v43 = vsel %vm8081_vm8, %v4773_v18, %v4778_v42 }
  0x99   :  { %v5773_v53 = vsel %vm8082_vm7, %v4754_v26, %v4759_v60  ;;  %v5807_v37 = vsel %vm8082_vm7, %v4749_v11, %v4754_v26 }
  0x9a   :  { %4841 = vrot.lane.b32.xlu0 %v4840_v39, %s5436_s0 }
  0x9b   :  { %4821 = vrot.lane.b32.xlu1 %v4820_v40, %s5436_s0 }
  0x9e   :  { %4846 = vrot.lane.b32.xlu0 %v4835_v38, %s5437_s23  ;;  %v4753_v38 = vunpack.i.l.bf16 %v4752_v47 }
  0x9f   :  { %4826 = vrot.lane.b32.xlu1 %v4825_v41, %s5436_s0 }
  0xa0   :  { %v5803_v52 = vsel %vm8082_vm7, %v4748_v13, %v4753_v38 }
  0xa2   :  { %4851 = vrot.lane.b32.xlu0 %v4840_v39, %s5437_s23  ;;  %v5733_v39 = vsel %vm8082_vm7, %v4743_v57, %v4748_v13  ;;  %v5769_v57 = vsel %vm8082_vm7, %v4753_v38, %v4758_v61 }
  0xa3   :  { %4831 = vrot.lane.b32.xlu1 %v4820_v40, %s5437_s23  ;;  %v5737_v40 = vsel %vm8082_vm7, %v4744_v56, %v4749_v11  ;;  %v345_v61 = vsel %vm5704_vm9, %v5733_v39, %v5743_v46  ;;  %v337_v21 = vsel %vm5783_vm13, %v5743_v46, %v5733_v39 }
  0xa4   :  { %v349_v60 = vsel %vm5704_vm9, %v5737_v40, %v5747_v48 }
  0xa5   :  { %v437_v51 = vpack.c.bf16 %v349_v60, %v345_v61 }
  0xa7   :  { %4856 = vrot.lane.b32.xlu1 %v4825_v41, %s5437_s23  ;;  %v4779_v41 = vunpack.i.h.bf16 %v4777_v15 }
  0xa9   :  { %v5781_v63 = vsel %vm8081_vm8, %v4779_v41, %v4764_v3  ;;  %v5843_v18 = vsel %vm8081_vm8, %v4774_v23, %v4779_v41 }
  0xf7   :  { %v5697_v10 = vpop.permute.xlu0 %4781 }
  0xf8   :  { %v4783_v61 = vunpack.i.l.bf16 %v5697_v10 }
  0xfc   :  { %v5713_v36 = vpop.permute.xlu0 %4786 }
  0xfd   :  { %v5739_v45 = vpop.permute.xlu1 %4801  ;;  %v4789_v42 = vunpack.i.h.bf16 %v5713_v36  ;;  %v4788_v34 = vunpack.i.l.bf16 %v5713_v36 }
  0xfe   :  { %v4804_v26 = vunpack.i.h.bf16 %v5739_v45  ;;  %v4803_v38 = vunpack.i.l.bf16 %v5739_v45  ;;  %v4784_v45 = vunpack.i.h.bf16 %v5697_v10 }
 0x100   :  { %v5765_v56 = vpop.permute.xlu0 %4791  ;;  %v5857_v23 = vsel %vm8082_vm7, %v4783_v61, %v4803_v38  ;;  %v5861_v41 = vsel %vm8082_vm7, %v4784_v45, %v4804_v26 }
 0x101   :  { %v4807_v3 = vpop.permute.xlu1 %4806  ;;  %v4794_v54 = vunpack.i.h.bf16 %v5765_v56  ;;  %v4793_v10 = vunpack.i.l.bf16 %v5765_v56  ;;  %8176 = vst [vmem:[#allocation12_spill] sm:$0xff] %v5857_v23  ;;  %8177 = vst [vmem:[#allocation13_spill] sm:$0xff] %v5861_v41 }
 0x102   :  { %v4809_v13 = vunpack.i.h.bf16 %v4807_v3  ;;  %v4808_v44 = vunpack.i.l.bf16 %v4807_v3 }
 0x104   :  { %v4797_v50 = vpop.permute.xlu0 %4796  ;;  %v5873_v46 = vsel %vm8082_vm7, %v4808_v44, %v4783_v61  ;;  %v5877_v56 = vsel %vm8082_vm7, %v4809_v13, %v4784_v45 }
 0x105   :  { %v4799_v59 = vunpack.i.h.bf16 %v4797_v50  ;;  %v4798_v58 = vunpack.i.l.bf16 %v4797_v50  ;;  %v4812_v60 = vpop.permute.xlu1 %4811  ;;  %8178 = vst [vmem:[#allocation14_spill] sm:$0xff] %v5873_v46  ;;  %8179 = vst [vmem:[#allocation15_spill] sm:$0xff] %v5877_v56 }
 0x106   :  { %v4814_v3 = vunpack.i.h.bf16 %v4812_v60  ;;  %v4813_v50 = vunpack.i.l.bf16 %v4812_v60 }
 0x108   :  { %v5853_v55 = vpop.permute.xlu0 %4836  ;;  %v5865_v39 = vsel %vm8081_vm8, %v4813_v50, %v4798_v58  ;;  %v5869_v36 = vsel %vm8081_vm8, %v4814_v3, %v4799_v59  ;;  %v5889_v32 = vsel %vm8081_vm8, %v4793_v10, %v4813_v50  ;;  %v5893_v61 = vsel %vm8081_vm8, %v4794_v54, %v4814_v3 }
 0x109   :  { %v4817_v60 = vpop.permute.xlu1 %4816  ;;  %v401_v16 = vsel %vm5783_vm13, %v5865_v39, %v5857_v23  ;;  %v405_v17 = vsel %vm5783_vm13, %v5869_v36, %v5861_v41  ;;  %8180 = vst [vmem:[#allocation16_spill] sm:$0xff] %v5893_v61  ;;  %v400_v24 = vsel %vm5753_vm12, %v5889_v32, %v5873_v46  ;;  %v404_v50 = vsel %vm5753_vm12, %v5893_v61, %v5877_v56 }
 0x10a   :  { %v4819_v45 = vunpack.i.h.bf16 %v4817_v60  ;;  %v4818_v33 = vunpack.i.l.bf16 %v4817_v60  ;;  %v441_v19 = vpack.c.bf16 %v405_v17, %v401_v16  ;;  %v5907_v41 = vsel %vm8082_vm7, %v4803_v38, %v4788_v34 }
 0x10b   :  { %v346_v16 = vsel %vm5795_vm14, %v5803_v52, %v5829_v43  ;;  %v350_v17 = vsel %vm5795_vm14, %v5807_v37, %v5843_v18  ;;  %v440_v3 = vpack.c.bf16 %v404_v50, %v400_v24  ;;  %v5919_v60 = vsel %vm8082_vm7, %v4788_v34, %v4808_v44 }
 0x10c   :  { %v5899_v23 = vpop.permute.xlu0 %4841  ;;  %469 = vmatprep.subr.bf16.mxu0 %v441_v19  ;;  %v5923_v38 = vsel %vm8082_vm7, %v4789_v42, %v4809_v13  ;;  %v5927_v56 = vsel %vm8081_vm8, %v4818_v33, %v4793_v10  ;;  %v5933_v46 = vsel %vm8081_vm8, %v4819_v45, %v4794_v54  ;;  %v5941_v19 = vsel %vm8081_vm8, %v4798_v58, %v4818_v33 }
 0x10d   :  { %v5929_v61 = vpop.permute.xlu1 %4821  ;;  %v403_v44 = vsel %vm5831_vm15, %v5927_v56, %v5919_v60  ;;  %v5945_v24 = vsel %vm8081_vm8, %v4799_v59, %v4819_v45  ;;  %470 = vmatpush1.bf16.msra.mxu0 %v440_v3  ;;  %v407_v54 = vsel %vm5831_vm15, %v5933_v46, %v5923_v38  ;;  %v5953_v13 = vsel %vm8082_vm7, %v4804_v26, %v4789_v42 }
 0x10e   :  { %8181 = vst [vmem:[#allocation17_spill] sm:$0xff] %v5953_v13  ;;  %v402_v33 = vsel %vm5835_vm6, %v5941_v19, %v5907_v41  ;;  %v341_v58 = vsel %vm5783_vm13, %v5747_v48, %v5737_v40  ;;  %471 = vmatprep.subr.bf16.mxu0 %v437_v51  ;;  %v443_v34 = vpack.c.bf16 %v407_v54, %v403_v44 }
 0x10f   :  { %v406_v26 = vsel %vm5835_vm6, %v5945_v24, %v5953_v13  ;;  %v8182_v42 = vsel %vm5749_vm11, %v5769_v57, %v5777_v62  ;;  %v8183_v10 = vsel %vm5749_vm11, %v5773_v53, %v5781_v63  ;;  %v433_v48 = vpack.c.bf16 %v5528_v9, %v5523_v8 }
 0x110   :  { %v5963_v59 = vpop.permute.xlu0 %4846  ;;  %v439_v40 = vpack.c.bf16 %v8183_v10, %v8182_v42  ;;  %v442_v51 = vpack.c.bf16 %v406_v26, %v402_v33  ;;  %v432_v45 = vpack.c.bf16 %v5506_v4, %v5499_v2  ;;  %v438_v50 = vpack.c.bf16 %v350_v17, %v346_v16  ;;  %512 = vmatprep.subr.bf16.mxu1 %v443_v34 }
 0x111   :  { %v435_v3 = vpack.c.bf16 %v5516_v6, %v5511_v5  ;;  %v4827_v44 = vpop.permute.xlu1 %4826  ;;  %v429_v54 = vpack.c.bf16 %v341_v58, %v337_v21  ;;  %v8184_v13 = vsel %vm5753_vm12, %v5725_v22, %v5717_v20  ;;  %v8185_v8 = vsel %vm5753_vm12, %v5729_v28, %v5721_v25  ;;  %472 = vmatpush1.bf16.msra.mxu0 %v5799_v12 }
 0x112   :  { %v428_v9 = vpack.c.bf16 %v8185_v8, %v8184_v13  ;;  %v339_v2 = vsel %vm5831_vm15, %v5777_v62, %v5769_v57  ;;  %v343_v4 = vsel %vm5831_vm15, %v5781_v63, %v5773_v53  ;;  %v4824_v5 = vunpack.i.h.bf16 %v5929_v61  ;;  %513 = vmatpush1.bf16.msra.mxu1 %v442_v51  ;;  %473 = vmatprep.subr.bf16.mxu0 %v433_v48 }
 0x113   :  { %v4823_v6 = vunpack.i.l.bf16 %v5929_v61  ;;  %v338_v20 = vsel %vm5835_vm6, %v5829_v43, %v5803_v52  ;;  %v342_v25 = vsel %vm5835_vm6, %v5843_v18, %v5807_v37  ;;  %v4843_v22 = vunpack.i.l.bf16 %v5899_v23  ;;  %514 = vmatprep.subr.bf16.mxu1 %v439_v40 }
 0x114   :  { %v4829_v28 = vunpack.i.h.bf16 %v4827_v44  ;;  %v4828_v57 = vunpack.i.l.bf16 %v4827_v44  ;;  %v4852_v53 = vpop.permute.xlu0 %4851  ;;  %v434_v12 = vpack.c.bf16 %v5494_v1, %v5489_v0  ;;  %v4839_v62 = vunpack.i.h.bf16 %v5853_v55 }
 0x115   :  { %v4838_v63 = vunpack.i.l.bf16 %v5853_v55  ;;  %v4854_v43 = vunpack.i.h.bf16 %v4852_v53  ;;  %v4853_v52 = vunpack.i.l.bf16 %v4852_v53  ;;  %v4849_v21 = vunpack.i.h.bf16 %v5963_v59  ;;  %v4832_v18 = vpop.permute.xlu1 %4831  ;;  %474 = vmatpush1.bf16.msra.mxu0 %v432_v45 }
 0x116   :  { %v4848_v37 = vunpack.i.l.bf16 %v5963_v59  ;;  %v431_v61 = vpack.c.bf16 %v343_v4, %v339_v2  ;;  %v430_v16 = vpack.c.bf16 %v342_v25, %v338_v20  ;;  %v4834_v17 = vunpack.i.h.bf16 %v4832_v18  ;;  %515 = vmatpush1.bf16.msra.mxu1 %v438_v50  ;;  %475 = vmatprep.subr.bf16.mxu0 %v429_v54 }
 0x117   :  { %v4833_v13 = vunpack.i.l.bf16 %v4832_v18  ;;  %v243_v0 = vsel %vm8082_vm7, %v4838_v63, %v4823_v6  ;;  %v244_v1 = vsel %vm8082_vm7, %v4839_v62, %v4824_v5  ;;  %v4844_v55 = vunpack.i.h.bf16 %v5899_v23  ;;  %516 = vmatprep.subr.bf16.mxu1 %v435_v3 }
 0x118   :  { %v245_v33 = vsel %vm8082_vm7, %v4828_v57, %v4838_v63  ;;  %v246_v58 = vsel %vm8082_vm7, %v4829_v28, %v4839_v62  ;;  %v6032_v59 = vsel %vm8082_vm7, %v4823_v6, %v4843_v22  ;;  %v267_v26 = vsel %vm8081_vm8, %v4834_v17, %v4854_v43 }
 0x119   :  { %v266_v34 = vsel %vm8081_vm8, %v4833_v13, %v4853_v52  ;;  %v268_v23 = vsel %vm8081_vm8, %v4848_v37, %v4833_v13  ;;  %v269_v42 = vsel %vm8081_vm8, %v4849_v21, %v4834_v17  ;;  %v4857_v10 = vpop.permute.xlu1 %4856  ;;  %v285_v48 = vsel %vm5704_vm9, %v244_v1, %v267_v26  ;;  %476 = vmatpush1.bf16.msra.mxu0 %v428_v9 }
 0x11a   :  { %v281_v40 = vsel %vm5704_vm9, %v243_v0, %v266_v34  ;;  %v280_v51 = vsel %vm5709_vm10, %v245_v33, %v268_v23  ;;  %v284_v45 = vsel %vm5709_vm10, %v246_v58, %v269_v42  ;;  %v4859_v50 = vunpack.i.h.bf16 %v4857_v10  ;;  %517 = vmatpush1.bf16.msra.mxu1 %v434_v12 }
 0x11b   :  { %v4858_v3 = vunpack.i.l.bf16 %v4857_v10  ;;  %v425_v44 = vpack.c.bf16 %v285_v48, %v281_v40  ;;  %v424_v54 = vpack.c.bf16 %v284_v45, %v280_v51  ;;  %518 = vmatprep.subr.bf16.mxu1 %v431_v61  ;;  %v239_v8 = vsel %vm8082_vm7, %v4843_v22, %v4828_v57  ;;  %v8197_v10 = vld [vmem:[#allocation15_spill] sm:$0xff] }
 0x11c   :  { %v240_v2 = vsel %vm8082_vm7, %v4844_v55, %v4829_v28  ;;  %v242_v4 = vsel %vm8082_vm7, %v4824_v5, %v4844_v55  ;;  %v273_v6 = vsel %vm5783_vm13, %v266_v34, %v243_v0  ;;  %v265_v20 = vsel %vm8081_vm8, %v4854_v43, %v4859_v50  ;;  %v8193_v55 = vld [vmem:[#allocation2_spill] sm:$0xff]  ;;  %v8198_v45 = vld [vmem:[#allocation11_spill] sm:$0xff] }
 0x11d   :  { %v271_v9 = vsel %vm8081_vm8, %v4859_v50, %v4849_v21  ;;  %v264_v25 = vsel %vm8081_vm8, %v4853_v52, %v4858_v3  ;;  %v270_v22 = vsel %vm8081_vm8, %v4858_v3, %v4848_v37  ;;  %477 = vmatprep.subr.bf16.mxu0 %v425_v44  ;;  %v286_v53 = vsel %vm5795_vm14, %v242_v4, %v265_v20  ;;  %v8187_v52 = vld [vmem:[#allocation12_spill] sm:$0xff]  ;;  %v8199_v50 = vld [vmem:[#allocation10_spill] sm:$0xff] }
 0x11e   :  { %v283_v28 = vsel %vm5749_vm11, %v239_v8, %v270_v22  ;;  %v287_v5 = vsel %vm5749_vm11, %v240_v2, %v271_v9  ;;  %v282_v57 = vsel %vm5795_vm14, %v6032_v59, %v264_v25  ;;  %478 = vmatpush1.bf16.msra.mxu0 %v424_v54  ;;  %519 = vmatpush1.bf16.msra.mxu1 %v430_v16  ;;  %v8188_v16 = vld [vmem:[#allocation13_spill] sm:$0xff]  ;;  %vm8086_vm8 = vcmask 1041408  }
 0x11f   :  { %v427_v12 = vpack.c.bf16 %v287_v5, %v283_v28  ;;  %v426_v62 = vpack.c.bf16 %v286_v53, %v282_v57  ;;  %v277_v63 = vsel %vm5783_vm13, %v267_v26, %v244_v1  ;;  %v8186_v43 = vpack.c.bf16 %v5573_v30, %v5569_v29  ;;  %v8189_v29 = vld [vmem:[#allocation9_spill] sm:$0xff]  ;;  %v8190_v30 = vld [vmem:[#allocation8_spill] sm:$0xff]  ;;  %v8192_v1 = vld [vmem:[#allocation3_spill] sm:$0xff] }
 0x120   :  { %v409_v21 = vsel %vm5704_vm9, %v8187_v52, %v5865_v39  ;;  %v417_v37 = vpack.c.bf16 %v277_v63, %v273_v6  ;;  %v272_v18 = vsel %vm5753_vm12, %v268_v23, %v245_v33  ;;  %v276_v61 = vsel %vm5753_vm12, %v269_v42, %v246_v58  ;;  %v8196_v42 = vld [vmem:[#allocation16_spill] sm:$0xff] }
 0x121   :  { %479 = vmatprep.subr.bf16.mxu0 %v8186_v43  ;;  %520 = vmatprep.subr.bf16.mxu1 %v427_v12  ;;  %v413_v17 = vsel %vm5704_vm9, %v8188_v16, %v5869_v36  ;;  %v8191_v13 = vpack.c.bf16 %v8189_v29, %v8190_v30  ;;  %v275_v39 = vsel %vm5831_vm15, %v270_v22, %v239_v8  ;;  %v8195_v36 = vld [vmem:[#allocation14_spill] sm:$0xff]  ;;  %vm8085_vm7 = vcmask 15360  }
 0x122   :  { %521 = vmatpush1.bf16.msra.mxu1 %v426_v62  ;;  %v279_v0 = vsel %vm5831_vm15, %v271_v9, %v240_v2  ;;  %v8194_v33 = vpack.c.bf16 %v8192_v1, %v8193_v55  ;;  %v416_v58 = vpack.c.bf16 %v276_v61, %v272_v18  ;;  %v449_v34 = vpack.c.bf16 %v413_v17, %v409_v21  ;;  %v5341_v2 = vld [vmem:[%s8051_s2] ss:$8 sps:$4 sm:$0xff]  }
 0x123   :  { %480 = vmatpush1.bf16.msra.mxu0 %v8191_v13  ;;  %v408_v26 = vsel %vm5709_vm10, %v8195_v36, %v5889_v32  ;;  %v419_v23 = vpack.c.bf16 %v279_v0, %v275_v39  ;;  %v412_v40 = vsel %vm5709_vm10, %v8197_v10, %v8196_v42  ;;  %v274_v48 = vsel %vm5835_vm6, %v264_v25, %v6032_v59 }
 0x124   :  { %481 = vmatprep.subr.bf16.mxu0 %v417_v37  ;;  %522 = vmatprep.subr.bf16.mxu1 %v8194_v33  ;;  %v278_v51 = vsel %vm5835_vm6, %v265_v20, %v242_v4  ;;  %v8200_v3 = vpack.c.bf16 %v8198_v45, %v8199_v50  ;;  %v411_v32 = vsel %vm5749_vm11, %v5919_v60, %v5927_v56  ;;  %v8201_v56 = vld [vmem:[#allocation17_spill] sm:$0xff]  ;;  %v8202_v9 = vlaneseq }
 0x125   :  { %v415_v44 = vsel %vm5749_vm11, %v5923_v38, %v5933_v46  ;;  %v448_v59 = vpack.c.bf16 %v412_v40, %v408_v26  ;;  %v418_v54 = vpack.c.bf16 %v278_v51, %v274_v48  ;;  %v410_v4 = vsel %vm5795_vm14, %v5907_v41, %v5941_v19  ;;  %v147_v41 = vld [vmem:[%s8052_s1] sm:$0xff] }
 0x126   :  { %523 = vmatpush1.bf16.msra.mxu1 %v8200_v3  ;;  %v451_v8 = vpack.c.bf16 %v415_v44, %v411_v32  ;;  %v414_v60 = vsel %vm5795_vm14, %v8201_v56, %v5945_v24  ;;  %v5438_v38 = vmov 1983009808   ;;  %v559_v25 = vshrl.u32 %v8202_v9, 7 }
 0x127   :  { %482 = vmatpush1.bf16.msra.mxu0 %v416_v58  ;;  %524 = vmatprep.subr.bf16.mxu1 %v419_v23  ;;  %v450_v46 = vpack.c.bf16 %v414_v60, %v410_v4  ;;  %v556_v6 = vunpack.c.l.s4 %v5438_v38  ;;  %v554_v24 = vcombine.high %v147_v41, %v147_v41  ;;  %v8091_v18 = vmov 0.0  }
 0x128   :  { %497 = vmatprep.subr.bf16.mxu0 %v449_v34 }
 0x129   :  { %v557_v20 = vunpack.c.0.s8 %v556_v6 }
 0x12a   :  { %525 = vmatpush1.bf16.msra.mxu1 %v418_v54 }
 0x12b   :  { %498 = vmatpush2.bf16.msra.mxu0 %v448_v59  ;;  %540 = vmatprep.subr.bf16.mxu1 %v451_v8  ;;  %v560_v19 = vsub.s32 %v557_v20, %v559_v25 }
 0x12d   :  { %v6141_v22 = vrot.slane %v147_v41, %v560_v19  ;;  %v6147_v5 = vrot.slane %v554_v24, %v560_v19 }
 0x12e   :  { %500 = vmatmul.mubr.bf16.vlgmr.msra.gmra.mxu0 %v5341_v2  ;;  %541 = vmatpush2.bf16.msra.mxu1 %v450_v46 }
 0x12f   :  { %8203 = vst [vmem:[#allocation12_spill] sm:$0xff] %v6141_v22  ;;  %v6145_v28 = vcombine.high %v6141_v22, %v6141_v22  ;;  %8205 = vst [vmem:[#allocation9_spill] sm:$0xff] %v6147_v5  ;;  %v6153_v57 = vcombine.high %v6147_v5, %v6147_v5 }
 0x131   :  { %543 = vmatmul.mubr.bf16.vlgmr.msra.gmra.mxu1 %v5341_v2  ;;  %8204 = vst [vmem:[#allocation13_spill] sm:$0xff] %v6145_v28  ;;  %605 = vmatprep.subr.mxu0 %v6145_v28  ;;  %8206 = vst [vmem:[#allocation8_spill] sm:$0xff] %v6153_v57 }
 0x132   :  { %606 = vmatpush1.xpose.msra.mxu0 %v6141_v22  ;;  %680 = vmatprep.subr.mxu1 %v6153_v57 }
 0x133   :  { %681 = vmatpush1.xpose.msra.mxu1 %v6147_v5  ;;  %4611 = vmatprep.subr.msk.mxu0 %vm8086_vm8, %v6145_v28 }
 0x134   :  { %4615 = vmatprep.subr.msk.mxu1 %vm8086_vm8, %v6153_v57 }
 0x136   :  { %v8500_v7 = vld [vmem:[#allocation9_spill] sm:$0xff] }
 0x1ee   :  { %v501_v53 = vpop.f32.mrf.mxu0 }
 0x1f0   :  { %v503_v12 = vpop.f32.mrf.mxu0 }
 0x1f1   :  { %639 = vmatprep.mubr.f32.mxu0 %v503_v12  ;;  %v544_v63 = vpop.f32.mrf.mxu1 }
 0x1f2   :  { %v505_v62 = vpop.f32.mrf.mxu0  ;;  %640 = vmatmul.mubr.f32.vlgmr.msra.gmra.mxu0 %v501_v53 }
 0x1f3   :  { %v546_v52 = vpop.f32.mrf.mxu1  ;;  %4612 = vmatpush1.msk.msra.mxu0 %vm8086_vm8, %v6141_v22 }
 0x1f4   :  { %v507_v43 = vpop.f32.mrf.mxu0  ;;  %714 = vmatprep.mubr.f32.mxu1 %v546_v52  ;;  %943 = vmatprep.subr.mxu0 %v6145_v28 }
 0x1f5   :  { %644 = vmatprep.mubr.f32.mxu0 %v507_v43  ;;  %v548_v21 = vpop.f32.mrf.mxu1  ;;  %715 = vmatmul.mubr.f32.vlgmr.msra.gmra.mxu1 %v544_v63 }
 0x1f6   :  { %645 = vmatmul.mubr.f32.gmra.mxu0 %v505_v62  ;;  %4616 = vmatpush1.msk.msra.mxu1 %vm8086_vm8, %v6147_v5 }
 0x1f7   :  { %v550_v37 = vpop.f32.mrf.mxu1  ;;  %1018 = vmatprep.subr.mxu1 %v6153_v57  ;;  %807 = vmatprep.mubr.f32.mxu0 %v8091_v18 }
 0x1f8   :  { %719 = vmatprep.mubr.f32.mxu1 %v550_v37 }
 0x1f9   :  { %720 = vmatmul.mubr.f32.gmra.mxu1 %v548_v21 }
 0x1fa   :  { %884 = vmatprep.mubr.f32.mxu1 %v8091_v18 }
 0x2b2   :  { %v641_v61 = vpop.f32.mrf.mxu0 }
 0x2b4   :  { %v643_v16 = vpop.f32.mrf.mxu0 }
 0x2b5   :  { %v716_v29 = vpop.f32.mrf.mxu1 }
 0x2b6   :  { %v646_v17 = vpop.f32.mrf.mxu0  ;;  %v717_v30 = vadd.f32 %v716_v29, %v641_v61 }
 0x2b7   :  { %v718_v39 = vpop.f32.mrf.mxu1 }
 0x2b8   :  { %v648_v13 = vpop.f32.mrf.mxu0  ;;  %v725_v0 = vmul.f32 0.00390625, %v717_v30 }
 0x2b9   :  { %v721_v1 = vpop.f32.mrf.mxu1 }
 0x2ba   :  { %v722_v55 = vadd.f32 %v721_v1, %v646_v17  ;;  %4613 = vmatmul.mubr.msk.f32.vlgmr.msra.gmra.mxu0 %vm8085_vm7, %v725_v0  ;;  %4617 = vmatmul.mubr.msk.f32.vlgmr.msra.gmra.mxu1 %vm8085_vm7, %v725_v0 }
 0x2bb   :  { %v723_v33 = vpop.f32.mrf.mxu1  ;;  %813 = vmatprep.mubr.f32.mxu0 %v8091_v18  ;;  %890 = vmatprep.mubr.f32.mxu1 %v8091_v18 }
 0x2bc   :  { %v726_v58 = vmul.f32 0.00390625, %v722_v55  ;;  %944 = vmatpush1.xpose.msra.mxu0 %v6141_v22  ;;  %1019 = vmatpush1.xpose.msra.mxu1 %v6147_v5 }
 0x2bd   :  { %4619 = vmatprep.subr.msk.mxu0 %vm8086_vm8, %v6145_v28  ;;  %4623 = vmatprep.subr.msk.mxu1 %vm8086_vm8, %v6153_v57 }
 0x2be   :  { %4614 = vmatmul.mubr.msk.f32.gmra.mxu0 %vm8085_vm7, %v726_v58  ;;  %4618 = vmatmul.mubr.msk.f32.gmra.mxu1 %vm8085_vm7, %v726_v58 }
 0x37a   :  { %v809_v34 = vpop.f32.mrf.mxu0  ;;  %v886_v36 = vpop.f32.mrf.mxu1 }
 0x37b   :  { %v6181_v26 = vsub.f32 %v501_v53, %v809_v34  ;;  %v6183_v10 = vsub.f32 %v544_v63, %v886_v36 }
 0x37c   :  { %v811_v23 = vpop.f32.mrf.mxu0  ;;  %v888_v42 = vpop.f32.mrf.mxu1 }
 0x37d   :  { %v6185_v40 = vsub.f32 %v503_v12, %v811_v23  ;;  %v6187_v48 = vsub.f32 %v546_v52, %v888_v42  ;;  %v905_v32 = vmul.f32 %v6181_v26, %v6181_v26  ;;  %v907_v8 = vmul.f32 %v6183_v10, %v6183_v10 }
 0x37e   :  { %v815_v51 = vpop.f32.mrf.mxu0  ;;  %v892_v45 = vpop.f32.mrf.mxu1 }
 0x37f   :  { %v906_v50 = vmul.f32 %v6185_v40, %v6185_v40  ;;  %v908_v3 = vmul.f32 %v6187_v48, %v6187_v48  ;;  %v6195_v44 = vsub.f32 %v505_v62, %v815_v51  ;;  %v6199_v2 = vsub.f32 %v548_v21, %v892_v45 }
 0x380   :  { %v817_v59 = vpop.f32.mrf.mxu0  ;;  %v894_v54 = vpop.f32.mrf.mxu1 }
 0x381   :  { %v6201_v4 = vsub.f32 %v507_v43, %v817_v59  ;;  %v6203_v56 = vsub.f32 %v550_v37, %v894_v54  ;;  %977 = vmatprep.mubr.f32.mxu0 %v906_v50  ;;  %1052 = vmatprep.mubr.f32.mxu1 %v908_v3  ;;  %v909_v38 = vmul.f32 %v6195_v44, %v6195_v44 }
 0x382   :  { %978 = vmatmul.mubr.f32.vlgmr.msra.gmra.mxu0 %v905_v32  ;;  %1053 = vmatmul.mubr.f32.vlgmr.msra.gmra.mxu1 %v907_v8  ;;  %v911_v6 = vmul.f32 %v6199_v2, %v6199_v2 }
 0x383   :  { %v910_v60 = vmul.f32 %v6201_v4, %v6201_v4  ;;  %v912_v46 = vmul.f32 %v6203_v56, %v6203_v56  ;;  %4620 = vmatpush1.msk.msra.mxu0 %vm8086_vm8, %v6141_v22  ;;  %4624 = vmatpush1.msk.msra.mxu1 %vm8086_vm8, %v6147_v5 }
 0x385   :  { %982 = vmatprep.mubr.f32.mxu0 %v910_v60  ;;  %1057 = vmatprep.mubr.f32.mxu1 %v912_v46 }
 0x386   :  { %983 = vmatmul.mubr.f32.gmra.mxu0 %v909_v38  ;;  %1058 = vmatmul.mubr.f32.gmra.mxu1 %v911_v6 }
 0x387   :  { %1135 = vmatprep.mubr.f32.mxu0 %v8091_v18  ;;  %1212 = vmatprep.mubr.f32.mxu1 %v8091_v18 }
 0x442   :  { %v979_v20 = vpop.f32.mrf.mxu0  ;;  %v1054_v9 = vpop.f32.mrf.mxu1 }
 0x443   :  { %v1055_v25 = vadd.f32 %v1054_v9, %v979_v20 }
 0x444   :  { %v981_v41 = vpop.f32.mrf.mxu0  ;;  %v1056_v19 = vpop.f32.mrf.mxu1 }
 0x445   :  { %v1063_v24 = vmul.f32 0.00390625, %v1055_v25 }
 0x446   :  { %v984_v53 = vpop.f32.mrf.mxu0  ;;  %v1059_v12 = vpop.f32.mrf.mxu1 }
 0x447   :  { %v1060_v62 = vadd.f32 %v1059_v12, %v984_v53  ;;  %4621 = vmatmul.mubr.msk.f32.vlgmr.msra.gmra.mxu0 %vm8085_vm7, %v1063_v24  ;;  %4625 = vmatmul.mubr.msk.f32.vlgmr.msra.gmra.mxu1 %vm8085_vm7, %v1063_v24 }
 0x448   :  { %v986_v63 = vpop.f32.mrf.mxu0  ;;  %v1061_v43 = vpop.f32.mrf.mxu1  ;;  %1141 = vmatprep.mubr.f32.mxu0 %v8091_v18  ;;  %1218 = vmatprep.mubr.f32.mxu1 %v8091_v18 }
 0x449   :  { %v1064_v52 = vmul.f32 0.00390625, %v1060_v62 }
 0x44b   :  { %4622 = vmatmul.mubr.msk.f32.gmra.mxu0 %vm8085_vm7, %v1064_v52  ;;  %4626 = vmatmul.mubr.msk.f32.gmra.mxu1 %vm8085_vm7, %v1064_v52 }
 0x507   :  { %v1137_v21 = vpop.f32.mrf.mxu0  ;;  %v1214_v37 = vpop.f32.mrf.mxu1 }
 0x508   :  { %v1138_v61 = vadd.f32 1e-05, %v1137_v21  ;;  %v1215_v16 = vadd.f32 1e-05, %v1214_v37 }
 0x509   :  { %v1139_v17 = vpop.f32.mrf.mxu0  ;;  %v1216_v29 = vpop.f32.mrf.mxu1 }
 0x50a   :  { %5354 = vrsqrt.f32 %v1138_v61  ;;  %v1140_v30 = vadd.f32 1e-05, %v1139_v17  ;;  %v1217_v13 = vadd.f32 1e-05, %v1216_v29 }
 0x50b   :  { %5356 = vrsqrt.f32 %v1215_v16  ;;  %v1143_v39 = vpop.f32.mrf.mxu0  ;;  %v1220_v0 = vpop.f32.mrf.mxu1 }
 0x50c   :  { %5358 = vrsqrt.f32 %v1140_v30  ;;  %v1144_v1 = vadd.f32 1e-05, %v1143_v39  ;;  %v1221_v55 = vadd.f32 1e-05, %v1220_v0 }
 0x50d   :  { %5360 = vrsqrt.f32 %v1217_v13  ;;  %v1145_v33 = vpop.f32.mrf.mxu0  ;;  %v1222_v58 = vpop.f32.mrf.mxu1 }
 0x50e   :  { %5362 = vrsqrt.f32 %v1144_v1  ;;  %v1146_v34 = vadd.f32 1e-05, %v1145_v33  ;;  %v1223_v36 = vadd.f32 1e-05, %v1222_v58 }
 0x50f   :  { %5364 = vrsqrt.f32 %v1221_v55 }
 0x510   :  { %5366 = vrsqrt.f32 %v1146_v34 }
 0x511   :  { %5368 = vrsqrt.f32 %v1223_v36 }
 0x517   :  { %v5355_v23 = vpop.eup %5354 }
 0x518   :  { %v5357_v42 = vpop.eup %5356  ;;  %v1233_v50 = vmul.f32 %v5355_v23, %v6181_v26 }
 0x519   :  { %v5359_v51 = vpop.eup %5358  ;;  %v1235_v6 = vmul.f32 %v5357_v42, %v6183_v10 }
 0x51a   :  { %v5361_v45 = vpop.eup %5360  ;;  %v1234_v59 = vmul.f32 %v5359_v51, %v6185_v40  ;;  %v1241_v38 = vmax.f32 %v1233_v50, 0.0 }
 0x51b   :  { %v5363_v3 = vpop.eup %5362  ;;  %v1236_v25 = vmul.f32 %v5361_v45, %v6187_v48 }
 0x51c   :  { %v5365_v32 = vpop.eup %5364  ;;  %v1237_v54 = vmul.f32 %v5363_v3, %v6195_v44  ;;  %v1242_v41 = vmax.f32 %v1234_v59, 0.0  ;;  %v1243_v44 = vmax.f32 %v1235_v6, 0.0 }
 0x51d   :  { %v5367_v8 = vpop.eup %5366  ;;  %v1239_v60 = vmul.f32 %v5365_v32, %v6199_v2  ;;  %v1244_v12 = vmax.f32 %v1236_v25, 0.0 }
 0x51e   :  { %v5369_v46 = vpop.eup %5368  ;;  %v1245_v20 = vmax.f32 %v1237_v54, 0.0  ;;  %v1238_v9 = vmul.f32 %v5367_v8, %v6201_v4 }
 0x51f   :  { %v1240_v26 = vmul.f32 %v5369_v46, %v6203_v56  ;;  %v1247_v19 = vmax.f32 %v1239_v60, 0.0 }
 0x520   :  { %v1246_v24 = vmax.f32 %v1238_v9, 0.0  ;;  %v4860_v40 = vpack.i.bf16 %v1245_v20, %v1241_v38  ;;  %v6237_v4 = vpack.c.bf16 %v1245_v20, %v1241_v38 }
 0x521   :  { %v1248_v53 = vmax.f32 %v1240_v26, 0.0  ;;  %v4865_v10 = vpack.i.bf16 %v1247_v19, %v1243_v44  ;;  %v6241_v56 = vpack.c.bf16 %v1247_v19, %v1243_v44 }
 0x522   :  { %4861 = vrot.lane.b32.xlu0 %v4860_v40, %s5434_s21  ;;  %v4880_v2 = vpack.i.bf16 %v1246_v24, %v1242_v41  ;;  %v6235_v62 = vpack.c.bf16 %v1246_v24, %v1242_v41 }
 0x523   :  { %v6239_v48 = vpack.c.bf16 %v1248_v53, %v1244_v12  ;;  %v4885_v63 = vpack.i.bf16 %v1248_v53, %v1244_v12 }
 0x524   :  { %4881 = vrot.lane.b32.xlu1 %v4880_v2, %s5434_s21 }
 0x526   :  { %4866 = vrot.lane.b32.xlu0 %v4865_v10, %s5434_s21 }
 0x528   :  { %4886 = vrot.lane.b32.xlu1 %v4885_v63, %s5434_s21 }
 0x52a   :  { %4871 = vrot.lane.b32.xlu0 %v4860_v40, %s5435_s22 }
 0x52c   :  { %4891 = vrot.lane.b32.xlu1 %v4880_v2, %s5435_s22 }
 0x52e   :  { %4876 = vrot.lane.b32.xlu0 %v4865_v10, %s5435_s22 }
 0x530   :  { %4896 = vrot.lane.b32.xlu1 %v4885_v63, %s5435_s22 }
 0x532   :  { %4901 = vrot.lane.b32.xlu0 %v4860_v40, %s5436_s0 }
 0x534   :  { %4921 = vrot.lane.b32.xlu1 %v4880_v2, %s5436_s0 }
 0x536   :  { %4906 = vrot.lane.b32.xlu0 %v4865_v10, %s5436_s0 }
 0x538   :  { %4926 = vrot.lane.b32.xlu1 %v4885_v63, %s5436_s0 }
 0x53a   :  { %4911 = vrot.lane.b32.xlu0 %v4860_v40, %s5437_s23 }
 0x53c   :  { %4931 = vrot.lane.b32.xlu1 %v4880_v2, %s5437_s23 }
 0x53e   :  { %4916 = vrot.lane.b32.xlu0 %v4865_v10, %s5437_s23 }
 0x540   :  { %4936 = vrot.lane.b32.xlu1 %v4885_v63, %s5437_s23 }
 0x594   :  { %v4862_v43 = vpop.permute.xlu0 %4861 }
 0x595   :  { %v4864_v21 = vunpack.i.h.bf16 %v4862_v43  ;;  %v4863_v37 = vunpack.i.l.bf16 %v4862_v43 }
 0x596   :  { %v4882_v52 = vpop.permute.xlu1 %4881 }
 0x597   :  { %v4884_v61 = vunpack.i.h.bf16 %v4882_v52  ;;  %v4883_v16 = vunpack.i.l.bf16 %v4882_v52 }
 0x598   :  { %v4867_v17 = vpop.permute.xlu0 %4866 }
 0x599   :  { %v6259_v29 = vsel %vm8084_vm0, %v4863_v37, %v4883_v16  ;;  %v6263_v30 = vsel %vm8084_vm0, %v4864_v21, %v4884_v61  ;;  %v4869_v0 = vunpack.i.h.bf16 %v4867_v17  ;;  %v4868_v1 = vunpack.i.l.bf16 %v4867_v17 }
 0x59a   :  { %v4887_v13 = vpop.permute.xlu1 %4886 }
 0x59b   :  { %v4889_v55 = vunpack.i.h.bf16 %v4887_v13  ;;  %v4888_v33 = vunpack.i.l.bf16 %v4887_v13  ;;  %v1268_v13 = vsel %vm8084_vm0, %v4884_v61, %v4869_v0 }
 0x59c   :  { %v4872_v58 = vpop.permute.xlu0 %4871 }
 0x59d   :  { %v6269_v34 = vsel %vm8084_vm0, %v4868_v1, %v4888_v33  ;;  %v6273_v36 = vsel %vm8084_vm0, %v4869_v0, %v4889_v55  ;;  %v4874_v23 = vunpack.i.h.bf16 %v4872_v58  ;;  %v4873_v51 = vunpack.i.l.bf16 %v4872_v58 }
 0x59e   :  { %v4892_v42 = vpop.permute.xlu1 %4891 }
 0x59f   :  { %v4894_v45 = vunpack.i.h.bf16 %v4892_v42  ;;  %v4893_v50 = vunpack.i.l.bf16 %v4892_v42  ;;  %v1267_v42 = vsel %vm8084_vm0, %v4883_v16, %v4868_v1 }
 0x5a0   :  { %v4877_v32 = vpop.permute.xlu0 %4876 }
 0x5a1   :  { %v1293_v59 = vsel %vm8083_vm1, %v4873_v51, %v4893_v50  ;;  %v1294_v54 = vsel %vm8083_vm1, %v4874_v23, %v4894_v45  ;;  %v4879_v8 = vunpack.i.h.bf16 %v4877_v32  ;;  %v4878_v60 = vunpack.i.l.bf16 %v4877_v32 }
 0x5a2   :  { %v4897_v46 = vpop.permute.xlu1 %4896  ;;  %v4940_v38 = vpack.i.bf16 %v1294_v54, %v1293_v59  ;;  %v1533_v63 = vpack.c.bf16 %v1294_v54, %v1293_v59 }
 0x5a3   :  { %v1292_v6 = vsel %vm8083_vm1, %v4894_v45, %v4879_v8  ;;  %v1291_v20 = vsel %vm8083_vm1, %v4893_v50, %v4878_v60  ;;  %v4899_v9 = vunpack.i.h.bf16 %v4897_v46  ;;  %v4898_v25 = vunpack.i.l.bf16 %v4897_v46 }
 0x5a4   :  { %4941 = vrot.lane.b32.xlu0 %v4940_v38, %s5436_s0  ;;  %v1306_v41 = vsel %vm5600_vm3, %v6259_v29, %v1291_v20  ;;  %v1310_v19 = vsel %vm5600_vm3, %v6263_v30, %v1292_v6  ;;  %v1272_v45 = vsel %vm8084_vm0, %v4889_v55, %v4864_v21  ;;  %v4902_v46 = vpop.permute.xlu0 %4901 }
 0x5a5   :  { %v1289_v24 = vsel %vm8083_vm1, %v4878_v60, %v4898_v25  ;;  %v1290_v40 = vsel %vm8083_vm1, %v4879_v8, %v4899_v9  ;;  %v1295_v53 = vsel %vm8083_vm1, %v4898_v25, %v4873_v51  ;;  %v1296_v44 = vsel %vm8083_vm1, %v4899_v9, %v4874_v23  ;;  %v5347_v60 = vld [vmem:[%s8053_s3 + $0x4] ss:$8 sps:$4 sm:$0xff]  }
 0x5a6   :  { %v4960_v2 = vpack.i.bf16 %v1310_v19, %v1306_v41  ;;  %v1534_v12 = vpack.c.bf16 %v1310_v19, %v1306_v41  ;;  %v4945_v10 = vpack.i.bf16 %v1290_v40, %v1289_v24  ;;  %v1308_v52 = vsel %vm5596_vm2, %v6269_v34, %v1295_v53 }
 0x5a7   :  { %v1312_v17 = vsel %vm5596_vm2, %v6273_v36, %v1296_v44  ;;  %v1271_v51 = vsel %vm8084_vm0, %v4888_v33, %v4863_v37  ;;  %v1535_v50 = vpack.c.bf16 %v1290_v40, %v1289_v24  ;;  %v6323_v61 = vsel %vm5609_vm4, %v1294_v54, %v1272_v45 }
 0x5a8   :  { %4961 = vrot.lane.b32.xlu1 %v4960_v2, %s5436_s0  ;;  %1555 = vmatprep.subr.bf16.mxu0 %v1534_v12  ;;  %v1536_v58 = vpack.c.bf16 %v1312_v17, %v1308_v52  ;;  %v4965_v23 = vpack.i.bf16 %v1312_v17, %v1308_v52  ;;  %v6319_v8 = vsel %vm5609_vm4, %v1293_v59, %v1271_v51  ;;  %vm8213_vm1 = vcmask 130048   ;;  %v4907_v6 = vpop.permute.xlu0 %4906 }
 0x5a9   :  { %4946 = vrot.lane.b32.xlu0 %v4945_v10, %s5436_s0  ;;  %1556 = vmatpush1.bf16.msra.mxu0 %v1533_v63  ;;  %v6327_v0 = vsel %vm5613_vm5, %v1289_v24, %v1267_v42  ;;  %v6331_v21 = vsel %vm5613_vm5, %v1290_v40, %v1268_v13  ;;  %v4995_v55 = vpack.i.bf16 %v6323_v61, %v6319_v8  ;;  %vm8214_vm0 = vmmov %vm8213_vm1  ;;  %v4909_v12 = vunpack.i.h.bf16 %v4907_v6 }
 0x5aa   :  { %1598 = vmatprep.subr.bf16.mxu1 %v1536_v58  ;;  %8211 = vst [vmem:[#allocation3_spill] sm:$0xff] %v6327_v0  ;;  %8212 = vst [vmem:[#allocation2_spill] sm:$0xff] %v6331_v21  ;;  %v4980_v33 = vpack.i.bf16 %v6263_v30, %v6259_v29  ;;  %v5000_v59 = vpack.i.bf16 %v6331_v21, %v6327_v0  ;;  %v4985_v54 = vpack.i.bf16 %v6273_v36, %v6269_v34 }
 0x5ab   :  { %1599 = vmatpush1.bf16.msra.mxu1 %v1535_v50  ;;  %4629 = vmatprep.mubr.msk.bf16.mxu0 %vm8213_vm1, %v5347_v60  ;;  %v4904_v52 = vunpack.i.h.bf16 %v4902_v46  ;;  %v4903_v17 = vunpack.i.l.bf16 %v4902_v46  ;;  %v4908_v13 = vunpack.i.l.bf16 %v4907_v6  ;;  %vm8216_vm1 = vcmp.lt.s32.totalorder %v5553_v14, 127 }
 0x5ac   :  { %4966 = vrot.lane.b32.xlu1 %v4965_v23, %s5436_s0  ;;  %4630 = vmatprep.mubr.msk.bf16.mxu1 %vm8214_vm0, %v5347_v60  ;;  %v4912_v9 = vpop.permute.xlu0 %4911  ;;  %vm8215_vm0 = vcmp.lt.s32.totalorder %v5553_v14, 1  ;;  %vm8217_vm7 = vmmov %vm8216_vm1 }
 0x5ad   :  { %4951 = vrot.lane.b32.xlu0 %v4940_v38, %s5437_s23  ;;  %v4922_v38 = vpop.permute.xlu1 %4921  ;;  %v4914_v42 = vunpack.i.h.bf16 %v4912_v9  ;;  %v4913_v51 = vunpack.i.l.bf16 %v4912_v9  ;;  %vm8218_vm8 = vmmov %vm8215_vm0 }
 0x5ae   :  { %v4923_v40 = vunpack.i.l.bf16 %v4922_v38  ;;  %vm8219_vm5 = vmmov %vm8215_vm0 }
 0x5af   :  { %vm8223_vm4 = vmmov %vm8219_vm5 }
 0x5b0   :  { %4971 = vrot.lane.b32.xlu1 %v4960_v2, %s5437_s23  ;;  %v4917_v41 = vpop.permute.xlu0 %4916  ;;  %v4924_v2 = vunpack.i.h.bf16 %v4922_v38 }
 0x5b1   :  { %4956 = vrot.lane.b32.xlu0 %v4945_v10, %s5437_s23  ;;  %v4927_v20 = vpop.permute.xlu1 %4926  ;;  %v4919_v53 = vunpack.i.h.bf16 %v4917_v41  ;;  %v4918_v44 = vunpack.i.l.bf16 %v4917_v41 }
 0x5b2   :  { %v4928_v58 = vunpack.i.l.bf16 %v4927_v20  ;;  %v6382_v60 = vsel %vm8218_vm8, %v4904_v52, %v4924_v2  ;;  %v6386_v46 = vsel %vm8219_vm5, %v4924_v2, %v4909_v12  ;;  %vm8224_vm8 = vmmov %vm8223_vm4 }
 0x5b4   :  { %4976 = vrot.lane.b32.xlu1 %v4965_v23, %s5437_s23  ;;  %v4929_v23 = vunpack.i.h.bf16 %v4927_v20  ;;  %v6402_v9 = vsel %vm8223_vm4, %v4908_v13, %v4928_v58 }
 0x5b5   :  { %4996 = vrot.lane.b32.xlu0 %v4995_v55, %s5436_s0  ;;  %v4932_v25 = vpop.permute.xlu1 %4931 }
 0x5b6   :  { %v4934_v10 = vunpack.i.h.bf16 %v4932_v25  ;;  %v4933_v63 = vunpack.i.l.bf16 %v4932_v25  ;;  %v6406_v25 = vsel %vm8224_vm8, %v4928_v58, %v4903_v17 }
 0x5b8   :  { %4981 = vrot.lane.b32.xlu1 %v4980_v33, %s5436_s0 }
 0x5b9   :  { %5001 = vrot.lane.b32.xlu0 %v5000_v59, %s5436_s0  ;;  %v4937_v19 = vpop.permute.xlu1 %4936 }
 0x5ba   :  { %v4938_v45 = vunpack.i.l.bf16 %v4937_v19  ;;  %v4939_v41 = vunpack.i.h.bf16 %v4937_v19  ;;  %v6426_v19 = vsel %vm8223_vm4, %v4909_v12, %v4929_v23 }
 0x5bc   :  { %4986 = vrot.lane.b32.xlu1 %v4985_v54, %s5436_s0 }
 0x5bd   :  { %5006 = vrot.lane.b32.xlu0 %v4995_v55, %s5437_s23  ;;  %v6368_v55 = vsel %vm8215_vm0, %v4903_v17, %v4923_v40  ;;  %vm8220_vm0 = vmmov %vm8216_vm1 }
 0x5be   :  { %v6390_v38 = vsel %vm8220_vm0, %v4913_v51, %v4933_v63  ;;  %vm8228_vm8 = vmmov %vm8220_vm0 }
 0x5c0   :  { %4991 = vrot.lane.b32.xlu1 %v4980_v33, %s5437_s23  ;;  %v6372_v33 = vsel %vm8216_vm1, %v4934_v10, %v4919_v53  ;;  %vm8221_vm1 = vmmov %vm8220_vm0 }
 0x5c1   :  { %5011 = vrot.lane.b32.xlu0 %v5000_v59, %s5437_s23  ;;  %v6376_v59 = vsel %vm8217_vm7, %v4933_v63, %v4918_v44  ;;  %v6394_v6 = vsel %vm8221_vm1, %v4914_v42, %v4934_v10  ;;  %vm8222_vm7 = vmmov %vm8219_vm5  ;;  %v6414_v10 = vsel %vm8220_vm0, %v4938_v45, %v4913_v51  ;;  %v1438_v17 = vsel %vm5704_vm9, %v6382_v60, %v6372_v33 }
 0x5c2   :  { %v6398_v20 = vsel %vm8222_vm7, %v4923_v40, %v4908_v13  ;;  %vm8225_vm5 = vmmov %vm8223_vm4  ;;  %v1434_v40 = vsel %vm5704_vm9, %v6368_v55, %v6376_v59 }
 0x5c3   :  { %v6410_v2 = vsel %vm8225_vm5, %v4929_v23, %v4904_v52  ;;  %vm8226_vm1 = vmmov %vm8220_vm0 }
 0x5c4   :  { %5016 = vrot.lane.b32.xlu1 %v4985_v54, %s5437_s23  ;;  %v6442_v51 = vsel %vm8226_vm1, %v4918_v44, %v4938_v45  ;;  %vm8227_vm7 = vmmov %vm8220_vm0  ;;  %v6459_v44 = vsel %vm8228_vm8, %v4939_v41, %v4914_v42  ;;  %v1526_v45 = vpack.c.bf16 %v1438_v17, %v1434_v40 }
 0x5c5   :  { %v6455_v3 = vsel %vm8227_vm7, %v4919_v53, %v4939_v41  ;;  %vm8229_vm5 = vmmov %vm8223_vm4 }
 0x5c6   :  { %vm8231_vm4 = vmmov %vm8220_vm0 }
 0x5c7   :  { %vm8233_vm1 = vmmov %vm8229_vm5 }
 0x5c8   :  { %vm8234_vm7 = vmmov %vm8233_vm1 }
 0x5c9   :  { %vm8236_vm8 = vmmov %vm8233_vm1 }
 0x616   :  { %v6362_v24 = vpop.permute.xlu0 %4941 }
 0x617   :  { %v4944_v39 = vunpack.i.h.bf16 %v6362_v24  ;;  %v4943_v42 = vunpack.i.l.bf16 %v6362_v24 }
 0x61a   :  { %v6364_v50 = vpop.permute.xlu1 %4961 }
 0x61b   :  { %v6378_v54 = vpop.permute.xlu0 %4946  ;;  %v4964_v12 = vunpack.i.h.bf16 %v6364_v50  ;;  %v4963_v18 = vunpack.i.l.bf16 %v6364_v50 }
 0x61c   :  { %v4949_v40 = vunpack.i.h.bf16 %v6378_v54  ;;  %v4948_v17 = vunpack.i.l.bf16 %v6378_v54 }
 0x61d   :  { %v6470_v41 = vsel %vm8229_vm5, %v4944_v39, %v4964_v12  ;;  %v6484_v24 = vsel %vm8233_vm1, %v4943_v42, %v4963_v18  ;;  %vm8237_vm5 = vmmov %vm8233_vm1 }
 0x61e   :  { %v4967_v63 = vpop.permute.xlu1 %4966  ;;  %vm8240_vm1 = vmmov %vm8220_vm0 }
 0x61f   :  { %v4952_v23 = vpop.permute.xlu0 %4951  ;;  %v4969_v58 = vunpack.i.h.bf16 %v4967_v63  ;;  %v4968_v1 = vunpack.i.l.bf16 %v4967_v63 }
 0x620   :  { %v4954_v52 = vunpack.i.h.bf16 %v4952_v23  ;;  %v4953_v53 = vunpack.i.l.bf16 %v4952_v23 }
 0x621   :  { %v6488_v43 = vsel %vm8234_vm7, %v4969_v58, %v4944_v39  ;;  %v6492_v54 = vsel %vm8236_vm8, %v4948_v17, %v4968_v1  ;;  %v6496_v26 = vsel %vm8237_vm5, %v4968_v1, %v4943_v42  ;;  %vm8241_vm7 = vmmov %vm8220_vm0 }
 0x622   :  { %v4972_v13 = vpop.permute.xlu1 %4971  ;;  %8235 = vst [vmem:[#allocation15_spill] sm:$0xff] %v6488_v43  ;;  %8238 = vst [vmem:[#allocation11_spill] sm:$0xff] %v6496_v26 }
 0x623   :  { %v4974_v16 = vunpack.i.h.bf16 %v4972_v13  ;;  %v4973_v32 = vunpack.i.l.bf16 %v4972_v13  ;;  %v4957_v37 = vpop.permute.xlu0 %4956  ;;  %vm8242_vm8 = vmmov %vm8220_vm0 }
 0x624   :  { %v4959_v13 = vunpack.i.h.bf16 %v4957_v37  ;;  %v4958_v23 = vunpack.i.l.bf16 %v4957_v37  ;;  %vm8243_vm5 = vmmov %vm8220_vm0 }
 0x625   :  { %v6476_v50 = vsel %vm8220_vm0, %v4954_v52, %v4974_v16  ;;  %v6480_v63 = vsel %vm8231_vm4, %v4953_v53, %v4973_v32  ;;  %vm8239_vm4 = vmmov %vm8220_vm0 }
 0x626   :  { %8230 = vst [vmem:[#allocation14_spill] sm:$0xff] %v6476_v50  ;;  %8232 = vst [vmem:[#allocation16_spill] sm:$0xff] %v6480_v63  ;;  %v4977_v5 = vpop.permute.xlu1 %4976  ;;  %v6500_v37 = vsel %vm8220_vm0, %v4973_v32, %v4958_v23  ;;  %v6504_v57 = vsel %vm8239_vm4, %v4974_v16, %v4959_v13  ;;  %v1489_v32 = vsel %vm5753_vm12, %v6480_v63, %v6496_v26  ;;  %vm8244_vm0 = vcmp.lt.s32.totalorder %v5553_v14, 1 }
 0x627   :  { %v4979_v22 = vunpack.i.h.bf16 %v4977_v5  ;;  %v4978_v39 = vunpack.i.l.bf16 %v4977_v5  ;;  %v6506_v28 = vpop.permute.xlu0 %4996  ;;  %v1490_v0 = vsel %vm5783_vm13, %v6500_v37, %v6484_v24  ;;  %v1494_v1 = vsel %vm5783_vm13, %v6504_v57, %v6470_v41  ;;  %vm8245_vm4 = vmmov %vm8244_vm0 }
 0x628   :  { %v1493_v5 = vsel %vm5753_vm12, %v6476_v50, %v6488_v43  ;;  %v6542_v63 = vsel %vm8244_vm0, %v4963_v18, %v4948_v17  ;;  %v1530_v50 = vpack.c.bf16 %v1494_v1, %v1490_v0  ;;  %v1428_v1 = vsel %vm5831_vm15, %v6414_v10, %v6402_v9 }
 0x629   :  { %v6526_v16 = vsel %vm8240_vm1, %v4959_v13, %v4979_v22  ;;  %v6530_v42 = vsel %vm8241_vm7, %v4979_v22, %v4954_v52  ;;  %v6534_v21 = vsel %vm8242_vm8, %v4958_v23, %v4978_v39  ;;  %v6538_v26 = vsel %vm8243_vm5, %v4978_v39, %v4953_v53  ;;  %vm8246_vm1 = vmmov %vm8244_vm0 }
 0x62a   :  { %v6546_v13 = vsel %vm8245_vm4, %v4949_v40, %v4969_v58  ;;  %v4982_v43 = vpop.permute.xlu1 %4981  ;;  %v1492_v22 = vsel %vm5831_vm15, %v6538_v26, %v6492_v54  ;;  %v6554_v52 = vsel %vm8246_vm1, %v4964_v12, %v4949_v40  ;;  %v1529_v53 = vpack.c.bf16 %v1493_v5, %v1489_v32  ;;  %1557 = vmatprep.subr.bf16.mxu0 %v1530_v50  ;;  %vm8253_vm7 = vmmov %vm8244_vm0 }
 0x62b   :  { %v1496_v18 = vsel %vm5831_vm15, %v6530_v42, %v6546_v13  ;;  %v1491_v0 = vsel %vm5835_vm6, %v6534_v21, %v6542_v63  ;;  %v5002_v58 = vpop.permute.xlu0 %5001  ;;  %v1495_v12 = vsel %vm5835_vm6, %v6526_v16, %v6554_v52  ;;  %v1440_v40 = vsel %vm5749_vm11, %v6426_v19, %v6459_v44  ;;  %vm8254_vm8 = vmmov %vm8244_vm0 }
 0x62c   :  { %v1532_v17 = vpack.c.bf16 %v1496_v18, %v1492_v22  ;;  %v1435_v23 = vsel %vm5795_vm14, %v6398_v20, %v6442_v51  ;;  %1558 = vmatpush1.bf16.msra.mxu0 %v1529_v53  ;;  %v1439_v50 = vsel %vm5795_vm14, %v6386_v46, %v6455_v3  ;;  %v1430_v39 = vsel %vm5783_vm13, %v6372_v33, %v6382_v60  ;;  %vm8255_vm5 = vmmov %vm8244_vm0 }
 0x62d   :  { %v1432_v32 = vsel %vm5831_vm15, %v6459_v44, %v6426_v19  ;;  %1559 = vmatprep.subr.bf16.mxu0 %v1526_v45  ;;  %v1531_v22 = vpack.c.bf16 %v1495_v12, %v1491_v0  ;;  %v1427_v53 = vsel %vm5835_vm6, %v6442_v51, %v6398_v20  ;;  %v1431_v33 = vsel %vm5835_vm6, %v6455_v3, %v6386_v46 }
 0x62e   :  { %1600 = vmatprep.subr.bf16.mxu1 %v1532_v17  ;;  %v4987_v5 = vpop.permute.xlu1 %4986  ;;  %v8247_v60 = vsel %vm5709_vm10, %v6406_v25, %v6390_v38  ;;  %v8248_v19 = vsel %vm5709_vm10, %v6410_v2, %v6394_v6  ;;  %v8249_v20 = vsel %vm5749_vm11, %v6402_v9, %v6414_v10  ;;  %v8250_v3 = vsel %vm5753_vm12, %v6390_v38, %v6406_v25 }
 0x62f   :  { %v1525_v44 = vpack.c.bf16 %v8248_v19, %v8247_v60  ;;  %v1528_v51 = vpack.c.bf16 %v1440_v40, %v8249_v20  ;;  %v8251_v46 = vsel %vm5753_vm12, %v6394_v6, %v6410_v2  ;;  %v4984_v18 = vunpack.i.h.bf16 %v4982_v43  ;;  %1601 = vmatpush1.bf16.msra.mxu1 %v1531_v22  ;;  %v5007_v60 = vpop.permute.xlu0 %5006 }
 0x630   :  { %v1517_v45 = vpack.c.bf16 %v8251_v46, %v8250_v3  ;;  %v4983_v0 = vunpack.i.l.bf16 %v4982_v43  ;;  %v5004_v17 = vunpack.i.h.bf16 %v5002_v58  ;;  %v5003_v12 = vunpack.i.l.bf16 %v5002_v58 }
 0x631   :  { %1560 = vmatpush1.bf16.msra.mxu0 %v1525_v44  ;;  %v1527_v9 = vpack.c.bf16 %v1439_v50, %v1435_v23  ;;  %v8252_v10 = vsel %vm5783_vm13, %v6376_v59, %v6368_v55  ;;  %v1520_v25 = vpack.c.bf16 %v1432_v32, %v1428_v1  ;;  %v1519_v40 = vpack.c.bf16 %v1431_v33, %v1427_v53 }
 0x632   :  { %v1518_v38 = vpack.c.bf16 %v1430_v39, %v8252_v10  ;;  %v4999_v19 = vunpack.i.h.bf16 %v6506_v28  ;;  %v4998_v6 = vunpack.i.l.bf16 %v6506_v28  ;;  %v4989_v2 = vunpack.i.h.bf16 %v4987_v5  ;;  %1602 = vmatprep.subr.bf16.mxu1 %v1528_v51  ;;  %1561 = vmatprep.subr.bf16.mxu0 %v6235_v62  ;;  %v4992_v58 = vpop.permute.xlu1 %4991 }
 0x633   :  { %v4988_v43 = vunpack.i.l.bf16 %v4987_v5  ;;  %v5009_v22 = vunpack.i.h.bf16 %v5007_v60  ;;  %v5008_v23 = vunpack.i.l.bf16 %v5007_v60  ;;  %v4994_v50 = vunpack.i.h.bf16 %v4992_v58  ;;  %1603 = vmatpush1.bf16.msra.mxu1 %v1527_v9  ;;  %v5012_v62 = vpop.permute.xlu0 %5011 }
 0x634   :  { %v4993_v44 = vunpack.i.l.bf16 %v4992_v58  ;;  %v1334_v55 = vsel %vm8253_vm7, %v4999_v19, %v4984_v18  ;;  %v1333_v59 = vsel %vm8254_vm8, %v4998_v6, %v4983_v0  ;;  %v6639_v39 = vsel %vm8255_vm5, %v4983_v0, %v5003_v12  ;;  %1604 = vmatprep.subr.bf16.mxu1 %v6239_v48  ;;  %vm8258_vm7 = vmmov %vm8244_vm0 }
 0x635   :  { %v6643_v28 = vsel %vm8244_vm0, %v4984_v18, %v5004_v17  ;;  %vm8256_vm4 = vcmp.lt.s32.totalorder %v5553_v14, 127  ;;  %v5014_v5 = vunpack.i.h.bf16 %v5012_v62  ;;  %v5013_v53 = vunpack.i.l.bf16 %v5012_v62  ;;  %1562 = vmatpush1.bf16.msra.mxu0 %v6237_v4  ;;  %vm8259_vm8 = vmmov %vm8244_vm0 }
 0x636   :  { %v1358_v1 = vsel %vm8256_vm4, %v5009_v22, %v4994_v50  ;;  %vm8257_vm1 = vmmov %vm8256_vm4  ;;  %v1330_v33 = vsel %vm8258_vm7, %v5004_v17, %v4989_v2  ;;  %v1336_v20 = vsel %vm8259_vm8, %v4989_v2, %v4999_v19  ;;  %v1335_v3 = vsel %vm8244_vm0, %v4988_v43, %v4998_v6  ;;  %1563 = vmatprep.subr.bf16.mxu0 %v1518_v38  ;;  %v5017_v46 = vpop.permute.xlu1 %5016 }
 0x637   :  { %v1357_v32 = vsel %vm8257_vm1, %v5008_v23, %v4993_v44  ;;  %vm8260_vm5 = vmmov %vm8244_vm0  ;;  %v1356_v4 = vsel %vm8257_vm1, %v4994_v50, %v5014_v5  ;;  %v5019_v48 = vunpack.i.h.bf16 %v5017_v46  ;;  %v5018_v0 = vunpack.i.l.bf16 %v5017_v46  ;;  %1605 = vmatpush1.bf16.msra.mxu1 %v6241_v56 }
 0x638   :  { %v1329_v51 = vsel %vm8260_vm5, %v5003_v12, %v4988_v43  ;;  %vm8261_vm4 = vmmov %vm8257_vm1  ;;  %v1374_v12 = vsel %vm5704_vm9, %v1334_v55, %v1356_v4  ;;  %v1369_v60 = vsel %vm5709_vm10, %v1335_v3, %v1357_v32  ;;  %v1373_v9 = vsel %vm5709_vm10, %v1336_v20, %v1358_v1  ;;  %1606 = vmatprep.subr.bf16.mxu1 %v1520_v25 }
 0x639   :  { %v1355_v18 = vsel %vm8261_vm4, %v4993_v44, %v5013_v53  ;;  %vm8262_vm7 = vmmov %vm8257_vm1  ;;  %1564 = vmatpush1.bf16.msra.mxu0 %v1517_v45  ;;  %v8266_v62 = vpack.c.bf16 %v6263_v30, %v6259_v29  ;;  %v8268_v29 = vpack.c.bf16 %v6273_v36, %v6269_v34  ;;  %v1498_v30 = vsel %vm5704_vm9, %v6484_v24, %v6500_v37  ;;  %v8271_v24 = vld [vmem:[#allocation2_spill] sm:$0xff]  ;;  %v8272_v37 = vld [vmem:[#allocation3_spill] sm:$0xff] }
 0x63a   :  { %v1370_v17 = vsel %vm5704_vm9, %v1333_v59, %v1355_v18  ;;  %v1354_v10 = vsel %vm8262_vm7, %v5014_v5, %v5019_v48  ;;  %vm8263_vm8 = vmmov %vm8257_vm1  ;;  %v1362_v25 = vsel %vm5783_vm13, %v1355_v18, %v1333_v59  ;;  %v1361_v5 = vsel %vm5753_vm12, %v1357_v32, %v1335_v3  ;;  %v8269_v32 = vld [vmem:[#allocation16_spill] sm:$0xff]  ;;  %v8275_v3 = vld [vmem:[#allocation15_spill] sm:$0xff] }
 0x63b   :  { %v1360_v38 = vsel %vm8263_vm8, %v5019_v48, %v5009_v22  ;;  %vm8264_vm5 = vmmov %vm8257_vm1  ;;  %v1514_v6 = vpack.c.bf16 %v1374_v12, %v1370_v17  ;;  %v1513_v22 = vpack.c.bf16 %v1373_v9, %v1369_v60  ;;  %v1375_v44 = vsel %vm5795_vm14, %v6643_v28, %v1354_v10  ;;  %1607 = vmatpush1.bf16.msra.mxu1 %v1519_v40  ;;  %v8277_v12 = vld [vmem:[#allocation12_spill] sm:$0xff] }
 0x63c   :  { %v1353_v56 = vsel %vm8264_vm5, %v5013_v53, %v5018_v0  ;;  %vm8265_vm0 = vmmov %vm8257_vm1  ;;  %v1376_v43 = vsel %vm5749_vm11, %v1330_v33, %v1360_v38  ;;  %v1365_v40 = vsel %vm5753_vm12, %v1358_v1, %v1336_v20  ;;  %v1368_v59 = vsel %vm5831_vm15, %v1360_v38, %v1330_v33  ;;  %v8270_v33 = vld [vmem:[#allocation11_spill] sm:$0xff] }
 0x63d   :  { %v1359_v19 = vsel %vm8265_vm0, %v5018_v0, %v5008_v23  ;;  %v1371_v58 = vsel %vm5795_vm14, %v6639_v39, %v1353_v56  ;;  %1565 = vmatprep.subr.bf16.mxu0 %v1514_v6  ;;  %v1366_v23 = vsel %vm5783_vm13, %v1356_v4, %v1334_v55  ;;  %v8267_v55 = vpack.c.bf16 %v6323_v61, %v6319_v8 }
 0x63e   :  { %v1372_v2 = vsel %vm5749_vm11, %v1329_v51, %v1359_v19  ;;  %v1515_v45 = vpack.c.bf16 %v1375_v44, %v1371_v58  ;;  %1566 = vmatpush1.bf16.msra.mxu0 %v1513_v22  ;;  %v1506_v53 = vpack.c.bf16 %v1366_v23, %v1362_v25  ;;  %v1364_v46 = vsel %vm5831_vm15, %v1359_v19, %v1329_v51 }
 0x63f   :  { %v1516_v50 = vpack.c.bf16 %v1376_v43, %v1372_v2  ;;  %1567 = vmatprep.subr.bf16.mxu0 %v8266_v62  ;;  %v1502_v1 = vsel %vm5704_vm9, %v6470_v41, %v6504_v57  ;;  %v1497_v8 = vsel %vm5709_vm10, %v8270_v33, %v8269_v32  ;;  %v1505_v61 = vpack.c.bf16 %v1365_v40, %v1361_v5  ;;  %v8274_v41 = vld [vmem:[#allocation14_spill] sm:$0xff] }
 0x640   :  { %v1508_v20 = vpack.c.bf16 %v1368_v59, %v1364_v46  ;;  %v1363_v34 = vsel %vm5835_vm6, %v1353_v56, %v6639_v39  ;;  %v1367_v36 = vsel %vm5835_vm6, %v1354_v10, %v6643_v28  ;;  %v8273_v51 = vpack.c.bf16 %v8271_v24, %v8272_v37 }
 0x641   :  { %1608 = vmatprep.subr.bf16.mxu1 %v1516_v50  ;;  %v1538_v57 = vpack.c.bf16 %v1502_v1, %v1498_v30  ;;  %v1501_v18 = vsel %vm5709_vm10, %v8275_v3, %v8274_v41  ;;  %v1500_v4 = vsel %vm5749_vm11, %v6492_v54, %v6538_v26  ;;  %v1504_v39 = vsel %vm5749_vm11, %v6546_v13, %v6530_v42  ;;  %v5345_v54 = vld [vmem:[%s8053_s3] ss:$8 sps:$4 sm:$0xff]   ;;  %v8276_v13 = vld [vmem:[#allocation13_spill] sm:$0xff] }
 0x642   :  { %1609 = vmatpush1.bf16.msra.mxu1 %v1515_v45  ;;  %1568 = vmatpush1.bf16.msra.mxu0 %v8267_v55  ;;  %v1507_v28 = vpack.c.bf16 %v1367_v36, %v1363_v34  ;;  %v1537_v48 = vpack.c.bf16 %v1501_v18, %v1497_v8  ;;  %v1540_v0 = vpack.c.bf16 %v1504_v39, %v1500_v4  ;;  %vm8279_vm4 = vcmask 1041408  }
 0x643   :  { %1610 = vmatprep.subr.bf16.mxu1 %v8268_v29  ;;  %1569 = vmatprep.subr.bf16.mxu0 %v1506_v53  ;;  %v1499_v17 = vsel %vm5795_vm14, %v6542_v63, %v6534_v21  ;;  %v1503_v26 = vsel %vm5795_vm14, %v6554_v52, %v6526_v16  ;;  %v8278_v21 = vld [vmem:[#allocation8_spill] sm:$0xff]  ;;  %v8280_v63 = vld [vmem:[#allocation9_spill] sm:$0xff]  ;;  %vm8281_vm1 = vmmov %vm8279_vm4  ;;  %v8284_v6 = vmov 0.0   ;;  %vm8285_vm5 = vcmask 15360  }
 0x644   :  { %v1539_v42 = vpack.c.bf16 %v1503_v26, %v1499_v17  ;;  %vm8282_vm7 = vmmov %vm8281_vm1 }
 0x645   :  { %vm8283_vm8 = vmmov %vm8281_vm1 }
 0x646   :  { %1611 = vmatpush1.bf16.msra.mxu1 %v8273_v51  ;;  %1570 = vmatpush1.bf16.msra.mxu0 %v1505_v61  ;;  %vm8286_vm0 = vmmov %vm8285_vm5 }
 0x647   :  { %1612 = vmatprep.subr.bf16.mxu1 %v1508_v20  ;;  %1585 = vmatprep.subr.bf16.mxu0 %v1538_v57 }
 0x64a   :  { %1613 = vmatpush1.bf16.msra.mxu1 %v1507_v28  ;;  %1586 = vmatpush2.bf16.msra.mxu0 %v1537_v48 }
 0x64b   :  { %1628 = vmatprep.subr.bf16.mxu1 %v1540_v0  ;;  %1671 = vmatprep.subr.mxu0 %v8276_v13 }
 0x64d   :  { %1588 = vmatmul.mubr.bf16.vlgmr.msra.gmra.mxu0 %v5345_v54 }
 0x64e   :  { %1629 = vmatpush2.bf16.msra.mxu1 %v1539_v42  ;;  %1672 = vmatpush1.xpose.msra.mxu0 %v8277_v12 }
 0x64f   :  { %1746 = vmatprep.subr.mxu1 %v8278_v21  ;;  %4631 = vmatprep.subr.msk.mxu0 %vm8279_vm4, %v8276_v13  ;;  %vm8287_vm4 = vmmov %vm8281_vm1 }
 0x651   :  { %1631 = vmatmul.mubr.bf16.vlgmr.msra.gmra.mxu1 %v5345_v54 }
 0x652   :  { %1747 = vmatpush1.xpose.msra.mxu1 %v8280_v63 }
 0x653   :  { %4635 = vmatprep.subr.msk.mxu1 %vm8281_vm1, %v8278_v21 }
 0x70d   :  { %v1589_v16 = vpop.f32.mrf.mxu0 }
 0x70f   :  { %v1591_v52 = vpop.f32.mrf.mxu0 }
 0x710   :  { %1705 = vmatprep.mubr.f32.mxu0 %v1591_v52 }
 0x711   :  { %v1632_v60 = vpop.f32.mrf.mxu1  ;;  %v1593_v9 = vpop.f32.mrf.mxu0  ;;  %1706 = vmatmul.mubr.f32.vlgmr.msra.gmra.mxu0 %v1589_v16 }
 0x712   :  { %4632 = vmatpush1.msk.msra.mxu0 %vm8282_vm7, %v8277_v12  ;;  %vm8288_vm7 = vmmov %vm8286_vm0 }
 0x713   :  { %v1634_v10 = vpop.f32.mrf.mxu1  ;;  %v1595_v38 = vpop.f32.mrf.mxu0  ;;  %1999 = vmatprep.subr.mxu0 %v8276_v13 }
 0x714   :  { %1780 = vmatprep.mubr.f32.mxu1 %v1634_v10  ;;  %1710 = vmatprep.mubr.f32.mxu0 %v1595_v38 }
 0x715   :  { %v1636_v56 = vpop.f32.mrf.mxu1  ;;  %1781 = vmatmul.mubr.f32.vlgmr.msra.gmra.mxu1 %v1632_v60  ;;  %1711 = vmatmul.mubr.f32.gmra.mxu0 %v1593_v9 }
 0x716   :  { %4636 = vmatpush1.msk.msra.mxu1 %vm8283_vm8, %v8280_v63  ;;  %1863 = vmatprep.mubr.f32.mxu0 %v8284_v6  ;;  %vm8289_vm8 = vmmov %vm8286_vm0 }
 0x717   :  { %v1638_v19 = vpop.f32.mrf.mxu1  ;;  %2074 = vmatprep.subr.mxu1 %v8278_v21 }
 0x718   :  { %1785 = vmatprep.mubr.f32.mxu1 %v1638_v19 }
 0x719   :  { %1786 = vmatmul.mubr.f32.gmra.mxu1 %v1636_v56 }
 0x71a   :  { %1940 = vmatprep.mubr.f32.mxu1 %v8284_v6 }
 0x7d1   :  { %v1707_v2 = vpop.f32.mrf.mxu0 }
 0x7d3   :  { %v1709_v43 = vpop.f32.mrf.mxu0 }
 0x7d5   :  { %v1782_v58 = vpop.f32.mrf.mxu1  ;;  %v1712_v50 = vpop.f32.mrf.mxu0 }
 0x7d6   :  { %v1783_v22 = vadd.f32 %v1782_v58, %v1707_v2 }
 0x7d7   :  { %v1784_v44 = vpop.f32.mrf.mxu1  ;;  %v1714_v25 = vpop.f32.mrf.mxu0 }
 0x7d8   :  { %v1791_v45 = vmul.f32 0.00390625, %v1783_v22 }
 0x7d9   :  { %v1787_v23 = vpop.f32.mrf.mxu1 }
 0x7da   :  { %v1788_v62 = vadd.f32 %v1787_v23, %v1712_v50  ;;  %4633 = vmatmul.mubr.msk.f32.vlgmr.msra.gmra.mxu0 %vm8285_vm5, %v1791_v45  ;;  %4637 = vmatmul.mubr.msk.f32.vlgmr.msra.gmra.mxu1 %vm8286_vm0, %v1791_v45  ;;  %vm8290_vm5 = vmmov %vm8281_vm1 }
 0x7db   :  { %v1789_v5 = vpop.f32.mrf.mxu1  ;;  %1869 = vmatprep.mubr.f32.mxu0 %v8284_v6  ;;  %1946 = vmatprep.mubr.f32.mxu1 %v8284_v6  ;;  %vm8291_vm0 = vmmov %vm8281_vm1 }
 0x7dc   :  { %v1792_v53 = vmul.f32 0.00390625, %v1788_v62  ;;  %2000 = vmatpush1.xpose.msra.mxu0 %v8277_v12  ;;  %2075 = vmatpush1.xpose.msra.mxu1 %v8280_v63 }
 0x7dd   :  { %4639 = vmatprep.subr.msk.mxu0 %vm8287_vm4, %v8276_v13  ;;  %4643 = vmatprep.subr.msk.mxu1 %vm8281_vm1, %v8278_v21  ;;  %vm8292_vm4 = vmmov %vm8288_vm7 }
 0x7de   :  { %4634 = vmatmul.mubr.msk.f32.gmra.mxu0 %vm8288_vm7, %v1792_v53  ;;  %4638 = vmatmul.mubr.msk.f32.gmra.mxu1 %vm8289_vm8, %v1792_v53  ;;  %vm8293_vm1 = vmmov %vm8292_vm4 }
 0x7df   :  { %vm8294_vm7 = vmmov %vm8293_vm1 }
 0x7e0   :  { %vm8295_vm8 = vmmov %vm8293_vm1 }
 0x89a   :  { %v1865_v40 = vpop.f32.mrf.mxu0  ;;  %v1942_v46 = vpop.f32.mrf.mxu1 }
 0x89b   :  { %v6783_v59 = vsub.f32 %v1589_v16, %v1865_v40  ;;  %v6785_v30 = vsub.f32 %v1632_v60, %v1942_v46 }
 0x89c   :  { %v1867_v55 = vpop.f32.mrf.mxu0  ;;  %v1944_v29 = vpop.f32.mrf.mxu1 }
 0x89d   :  { %v6787_v1 = vsub.f32 %v1591_v52, %v1867_v55  ;;  %v6789_v32 = vsub.f32 %v1634_v10, %v1944_v29  ;;  %v1961_v34 = vmul.f32 %v6783_v59, %v6783_v59  ;;  %v1963_v51 = vmul.f32 %v6785_v30, %v6785_v30 }
 0x89e   :  { %v1871_v33 = vpop.f32.mrf.mxu0  ;;  %v1948_v8 = vpop.f32.mrf.mxu1 }
 0x89f   :  { %v1962_v61 = vmul.f32 %v6787_v1, %v6787_v1  ;;  %v1964_v20 = vmul.f32 %v6789_v32, %v6789_v32  ;;  %v6797_v36 = vsub.f32 %v1593_v9, %v1871_v33  ;;  %v6801_v57 = vsub.f32 %v1636_v56, %v1948_v8 }
 0x8a0   :  { %v1873_v24 = vpop.f32.mrf.mxu0  ;;  %v1950_v37 = vpop.f32.mrf.mxu1 }
 0x8a1   :  { %v6803_v41 = vsub.f32 %v1595_v38, %v1873_v24  ;;  %v6805_v3 = vsub.f32 %v1638_v19, %v1950_v37  ;;  %2033 = vmatprep.mubr.f32.mxu0 %v1962_v61  ;;  %2108 = vmatprep.mubr.f32.mxu1 %v1964_v20  ;;  %v1965_v39 = vmul.f32 %v6797_v36, %v6797_v36 }
 0x8a2   :  { %2034 = vmatmul.mubr.f32.vlgmr.msra.gmra.mxu0 %v1961_v34  ;;  %2109 = vmatmul.mubr.f32.vlgmr.msra.gmra.mxu1 %v1963_v51  ;;  %v1967_v28 = vmul.f32 %v6801_v57, %v6801_v57 }
 0x8a3   :  { %v1966_v18 = vmul.f32 %v6803_v41, %v6803_v41  ;;  %v1968_v4 = vmul.f32 %v6805_v3, %v6805_v3  ;;  %4640 = vmatpush1.msk.msra.mxu0 %vm8290_vm5, %v8277_v12  ;;  %4644 = vmatpush1.msk.msra.mxu1 %vm8291_vm0, %v8280_v63  ;;  %vm8296_vm5 = vcmp.lt.s32.totalorder %v5553_v14, 16 }
 0x8a4   :  { %vm8297_vm0 = vmmov %vm8296_vm5 }
 0x8a5   :  { %2038 = vmatprep.mubr.f32.mxu0 %v1966_v18  ;;  %2113 = vmatprep.mubr.f32.mxu1 %v1968_v4 }
 0x8a6   :  { %2039 = vmatmul.mubr.f32.gmra.mxu0 %v1965_v39  ;;  %2114 = vmatmul.mubr.f32.gmra.mxu1 %v1967_v28 }
 0x8a7   :  { %2191 = vmatprep.mubr.f32.mxu0 %v8284_v6  ;;  %2268 = vmatprep.mubr.f32.mxu1 %v8284_v6 }
 0x962   :  { %v2035_v48 = vpop.f32.mrf.mxu0  ;;  %v2110_v0 = vpop.f32.mrf.mxu1 }
 0x963   :  { %v2111_v17 = vadd.f32 %v2110_v0, %v2035_v48 }
 0x964   :  { %v2037_v26 = vpop.f32.mrf.mxu0  ;;  %v2112_v54 = vpop.f32.mrf.mxu1 }
 0x965   :  { %v2119_v42 = vmul.f32 0.00390625, %v2111_v17 }
 0x966   :  { %v2040_v16 = vpop.f32.mrf.mxu0  ;;  %v2115_v52 = vpop.f32.mrf.mxu1 }
 0x967   :  { %v2116_v60 = vadd.f32 %v2115_v52, %v2040_v16  ;;  %4641 = vmatmul.mubr.msk.f32.vlgmr.msra.gmra.mxu0 %vm8292_vm4, %v2119_v42  ;;  %4645 = vmatmul.mubr.msk.f32.vlgmr.msra.gmra.mxu1 %vm8293_vm1, %v2119_v42  ;;  %vm8298_vm4 = vmmov %vm8297_vm0 }
 0x968   :  { %v2042_v9 = vpop.f32.mrf.mxu0  ;;  %v2117_v10 = vpop.f32.mrf.mxu1  ;;  %2197 = vmatprep.mubr.f32.mxu0 %v8284_v6  ;;  %2274 = vmatprep.mubr.f32.mxu1 %v8284_v6  ;;  %vm8299_vm1 = vmmov %vm8297_vm0 }
 0x969   :  { %v2120_v38 = vmul.f32 0.00390625, %v2116_v60 }
 0x96b   :  { %4642 = vmatmul.mubr.msk.f32.gmra.mxu0 %vm8294_vm7, %v2120_v38  ;;  %4646 = vmatmul.mubr.msk.f32.gmra.mxu1 %vm8295_vm8, %v2120_v38  ;;  %vm8300_vm7 = vcmp.lt.s32.totalorder %v5553_v14, 112 }
 0x96c   :  { %vm8301_vm8 = vmmov %vm8300_vm7 }
 0xa27   :  { %v2193_v56 = vpop.f32.mrf.mxu0  ;;  %v2270_v19 = vpop.f32.mrf.mxu1 }
 0xa28   :  { %v2194_v2 = vadd.f32 1e-05, %v2193_v56  ;;  %v2271_v43 = vadd.f32 1e-05, %v2270_v19 }
 0xa29   :  { %v2195_v58 = vpop.f32.mrf.mxu0  ;;  %v2272_v22 = vpop.f32.mrf.mxu1 }
 0xa2a   :  { %5370 = vrsqrt.f32 %v2194_v2  ;;  %v2196_v50 = vadd.f32 1e-05, %v2195_v58  ;;  %v2273_v44 = vadd.f32 1e-05, %v2272_v22 }
 0xa2b   :  { %5372 = vrsqrt.f32 %v2271_v43  ;;  %v2199_v45 = vpop.f32.mrf.mxu0  ;;  %v2276_v25 = vpop.f32.mrf.mxu1 }
 0xa2c   :  { %5374 = vrsqrt.f32 %v2196_v50  ;;  %v2200_v23 = vadd.f32 1e-05, %v2199_v45  ;;  %v2277_v62 = vadd.f32 1e-05, %v2276_v25 }
 0xa2d   :  { %5376 = vrsqrt.f32 %v2273_v44  ;;  %v2201_v5 = vpop.f32.mrf.mxu0  ;;  %v2278_v53 = vpop.f32.mrf.mxu1 }
 0xa2e   :  { %5378 = vrsqrt.f32 %v2200_v23  ;;  %v2202_v40 = vadd.f32 1e-05, %v2201_v5  ;;  %v2279_v46 = vadd.f32 1e-05, %v2278_v53 }
 0xa2f   :  { %5380 = vrsqrt.f32 %v2277_v62 }
 0xa30   :  { %5382 = vrsqrt.f32 %v2202_v40 }
 0xa31   :  { %5384 = vrsqrt.f32 %v2279_v46 }
 0xa37   :  { %v5371_v55 = vpop.eup %5370 }
 0xa38   :  { %v5373_v29 = vpop.eup %5372  ;;  %v2289_v61 = vmul.f32 %v5371_v55, %v6783_v59 }
 0xa39   :  { %v5375_v33 = vpop.eup %5374  ;;  %v2291_v28 = vmul.f32 %v5373_v29, %v6785_v30 }
 0xa3a   :  { %v5377_v8 = vpop.eup %5376  ;;  %v2290_v24 = vmul.f32 %v5375_v33, %v6787_v1  ;;  %v2297_v39 = vmax.f32 %v2289_v61, 0.0 }
 0xa3b   :  { %v5379_v20 = vpop.eup %5378  ;;  %v2292_v17 = vmul.f32 %v5377_v8, %v6789_v32 }
 0xa3c   :  { %v5381_v34 = vpop.eup %5380  ;;  %v2293_v37 = vmul.f32 %v5379_v20, %v6797_v36  ;;  %v2298_v26 = vmax.f32 %v2290_v24, 0.0  ;;  %v2299_v36 = vmax.f32 %v2291_v28, 0.0 }
 0xa3d   :  { %v5383_v51 = vpop.eup %5382  ;;  %v2295_v18 = vmul.f32 %v5381_v34, %v6801_v57  ;;  %v2300_v52 = vmax.f32 %v2292_v17, 0.0 }
 0xa3e   :  { %v5385_v4 = vpop.eup %5384  ;;  %v2301_v48 = vmax.f32 %v2293_v37, 0.0  ;;  %v2294_v0 = vmul.f32 %v5383_v51, %v6803_v41 }
 0xa3f   :  { %v2296_v59 = vmul.f32 %v5385_v4, %v6805_v3  ;;  %v2303_v54 = vmax.f32 %v2295_v18, 0.0 }
 0xa40   :  { %v2302_v42 = vmax.f32 %v2294_v0, 0.0  ;;  %v5020_v1 = vpack.i.bf16 %v2301_v48, %v2297_v39  ;;  %v6839_v41 = vpack.c.bf16 %v2301_v48, %v2297_v39 }
 0xa41   :  { %v2304_v16 = vmax.f32 %v2296_v59, 0.0  ;;  %v5025_v30 = vpack.i.bf16 %v2303_v54, %v2299_v36  ;;  %v6843_v3 = vpack.c.bf16 %v2303_v54, %v2299_v36 }
 0xa42   :  { %5021 = vrot.lane.b32.xlu0 %v5020_v1, %s5434_s21  ;;  %v5040_v57 = vpack.i.bf16 %v2302_v42, %v2298_v26  ;;  %v6837_v60 = vpack.c.bf16 %v2302_v42, %v2298_v26 }
 0xa43   :  { %v6841_v32 = vpack.c.bf16 %v2304_v16, %v2300_v52  ;;  %v5045_v9 = vpack.i.bf16 %v2304_v16, %v2300_v52 }
 0xa44   :  { %5041 = vrot.lane.b32.xlu1 %v5040_v57, %s5434_s21 }
 0xa46   :  { %5026 = vrot.lane.b32.xlu0 %v5025_v30, %s5434_s21 }
 0xa48   :  { %5046 = vrot.lane.b32.xlu1 %v5045_v9, %s5434_s21 }
 0xa4a   :  { %5031 = vrot.lane.b32.xlu0 %v5020_v1, %s5435_s22 }
 0xa4c   :  { %5051 = vrot.lane.b32.xlu1 %v5040_v57, %s5435_s22 }
 0xa4e   :  { %5036 = vrot.lane.b32.xlu0 %v5025_v30, %s5435_s22 }
 0xa50   :  { %5056 = vrot.lane.b32.xlu1 %v5045_v9, %s5435_s22 }
 0xa52   :  { %5061 = vrot.lane.b32.xlu0 %v5020_v1, %s5436_s0 }
 0xa54   :  { %5081 = vrot.lane.b32.xlu1 %v5040_v57, %s5436_s0 }
 0xa56   :  { %5066 = vrot.lane.b32.xlu0 %v5025_v30, %s5436_s0 }
 0xa58   :  { %5086 = vrot.lane.b32.xlu1 %v5045_v9, %s5436_s0 }
 0xa5a   :  { %5071 = vrot.lane.b32.xlu0 %v5020_v1, %s5437_s23 }
 0xa5c   :  { %5091 = vrot.lane.b32.xlu1 %v5040_v57, %s5437_s23 }
 0xa5e   :  { %5076 = vrot.lane.b32.xlu0 %v5025_v30, %s5437_s23 }
 0xa60   :  { %5096 = vrot.lane.b32.xlu1 %v5045_v9, %s5437_s23 }
 0xab4   :  { %v5022_v10 = vpop.permute.xlu0 %5021 }
 0xab5   :  { %v5024_v56 = vunpack.i.h.bf16 %v5022_v10  ;;  %v5023_v19 = vunpack.i.l.bf16 %v5022_v10 }
 0xab6   :  { %v5042_v38 = vpop.permute.xlu1 %5041 }
 0xab7   :  { %v5044_v2 = vunpack.i.h.bf16 %v5042_v38  ;;  %v5043_v43 = vunpack.i.l.bf16 %v5042_v38 }
 0xab8   :  { %v5027_v58 = vpop.permute.xlu0 %5026 }
 0xab9   :  { %v6861_v22 = vsel %vm8296_vm5, %v5023_v19, %v5043_v43  ;;  %v6865_v50 = vsel %vm8297_vm0, %v5024_v56, %v5044_v2  ;;  %v5029_v25 = vunpack.i.h.bf16 %v5027_v58  ;;  %v5028_v23 = vunpack.i.l.bf16 %v5027_v58  ;;  %vm8302_vm5 = vmmov %vm8300_vm7 }
 0xaba   :  { %v5047_v44 = vpop.permute.xlu1 %5046  ;;  %vm8303_vm0 = vmmov %vm8302_vm5 }
 0xabb   :  { %v5049_v62 = vunpack.i.h.bf16 %v5047_v44  ;;  %v5048_v5 = vunpack.i.l.bf16 %v5047_v44 }
 0xabc   :  { %v5032_v53 = vpop.permute.xlu0 %5031 }
 0xabd   :  { %v6871_v40 = vsel %vm8298_vm4, %v5028_v23, %v5048_v5  ;;  %v6875_v46 = vsel %vm8299_vm1, %v5029_v25, %v5049_v62  ;;  %v5034_v55 = vunpack.i.h.bf16 %v5032_v53  ;;  %v5033_v33 = vunpack.i.l.bf16 %v5032_v53  ;;  %vm8305_vm4 = vmmov %vm8303_vm0 }
 0xabe   :  { %v5052_v29 = vpop.permute.xlu1 %5051  ;;  %vm8306_vm1 = vmmov %vm8303_vm0 }
 0xabf   :  { %v5054_v8 = vunpack.i.h.bf16 %v5052_v29  ;;  %v5053_v61 = vunpack.i.l.bf16 %v5052_v29 }
 0xac0   :  { %v5037_v34 = vpop.permute.xlu0 %5036 }
 0xac1   :  { %v2349_v24 = vsel %vm8300_vm7, %v5033_v33, %v5053_v61  ;;  %v2350_v37 = vsel %vm8301_vm8, %v5034_v55, %v5054_v8  ;;  %v5039_v51 = vunpack.i.h.bf16 %v5037_v34  ;;  %v5038_v18 = vunpack.i.l.bf16 %v5037_v34  ;;  %vm8307_vm7 = vmmov %vm8303_vm0  ;;  %v8314_v34 = vld [vmem:[#allocation6_spill] sm:$0xff] }
 0xac2   :  { %v5057_v4 = vpop.permute.xlu1 %5056  ;;  %v5100_v39 = vpack.i.bf16 %v2350_v37, %v2349_v24  ;;  %vm8308_vm8 = vmmov %vm8303_vm0  ;;  %v2589_v9 = vpack.c.bf16 %v2350_v37, %v2349_v24 }
 0xac3   :  { %v2348_v28 = vsel %vm8302_vm5, %v5054_v8, %v5039_v51  ;;  %v2347_v48 = vsel %vm8303_vm0, %v5053_v61, %v5038_v18  ;;  %v5059_v0 = vunpack.i.h.bf16 %v5057_v4  ;;  %v5058_v17 = vunpack.i.l.bf16 %v5057_v4 }
 0xac4   :  { %5101 = vrot.lane.b32.xlu0 %v5100_v39, %s5436_s0  ;;  %v2362_v26 = vsel %vm5600_vm3, %v6861_v22, %v2347_v48  ;;  %v2366_v54 = vsel %vm5600_vm3, %v6865_v50, %v2348_v28  ;;  %vm8310_vm5 = vcmp.lt.s32.totalorder %v5553_v14, 16  ;;  %v5062_v4 = vpop.permute.xlu0 %5061 }
 0xac5   :  { %v2345_v42 = vsel %vm8305_vm4, %v5038_v18, %v5058_v17  ;;  %v2346_v1 = vsel %vm8306_vm1, %v5039_v51, %v5059_v0  ;;  %v2351_v16 = vsel %vm8307_vm7, %v5058_v17, %v5033_v33  ;;  %v2352_v36 = vsel %vm8308_vm8, %v5059_v0, %v5034_v55  ;;  %vm8311_vm0 = vmmov %vm8310_vm5  ;;  %v5350_v18 = vld [vmem:[%s8054_s4 + $0x4] ss:$8 sps:$4 sm:$0xff]  }
 0xac6   :  { %v5120_v57 = vpack.i.bf16 %v2366_v54, %v2362_v26  ;;  %v2590_v52 = vpack.c.bf16 %v2366_v54, %v2362_v26  ;;  %v5105_v30 = vpack.i.bf16 %v2346_v1, %v2345_v42  ;;  %v2364_v38 = vsel %vm5596_vm2, %v6871_v40, %v2351_v16  ;;  %vm8312_vm4 = vmmov %vm8311_vm0 }
 0xac7   :  { %v2368_v58 = vsel %vm5596_vm2, %v6875_v46, %v2352_v36  ;;  %v2324_v44 = vsel %vm8310_vm5, %v5044_v2, %v5029_v25  ;;  %v2323_v29 = vsel %vm8311_vm0, %v5043_v43, %v5028_v23  ;;  %v2327_v33 = vsel %vm8312_vm4, %v5048_v5, %v5023_v19  ;;  %vm8313_vm1 = vmmov %vm8311_vm0  ;;  %v8316_v43 = vld [vmem:[#allocation7_spill] sm:$0xff] }
 0xac8   :  { %5121 = vrot.lane.b32.xlu1 %v5120_v57, %s5436_s0  ;;  %2611 = vmatprep.subr.bf16.mxu0 %v2590_v52  ;;  %v2592_v53 = vpack.c.bf16 %v2368_v58, %v2364_v38  ;;  %v5125_v55 = vpack.i.bf16 %v2368_v58, %v2364_v38  ;;  %v2328_v8 = vsel %vm8313_vm1, %v5049_v62, %v5024_v56  ;;  %vm8320_vm5 = vcmask 130048   ;;  %v5067_v28 = vpop.permute.xlu0 %5066 }
 0xac9   :  { %5106 = vrot.lane.b32.xlu0 %v5105_v30, %s5436_s0  ;;  %2612 = vmatpush1.bf16.msra.mxu0 %v2589_v9  ;;  %v2591_v61 = vpack.c.bf16 %v2346_v1, %v2345_v42  ;;  %vm8315_vm7 = vnez %v8314_v34  ;;  %vm8317_vm8 = vnez %v8316_v43  ;;  %v5140_v5 = vpack.i.bf16 %v6865_v50, %v6861_v22  ;;  %vm8321_vm0 = vmmov %vm8320_vm5 }
 0xaca   :  { %2654 = vmatprep.subr.bf16.mxu1 %v2592_v53  ;;  %v6921_v51 = vsel %vm8315_vm7, %v2349_v24, %v2327_v33  ;;  %v6925_v2 = vsel %vm8315_vm7, %v2350_v37, %v2328_v8  ;;  %v6929_v25 = vsel %vm8317_vm8, %v2345_v42, %v2323_v29  ;;  %v6933_v56 = vsel %vm8317_vm8, %v2346_v1, %v2324_v44 }
 0xacb   :  { %2655 = vmatpush1.bf16.msra.mxu1 %v2591_v61  ;;  %8318 = vst [vmem:[#allocation10_spill] sm:$0xff] %v6929_v25  ;;  %8319 = vst [vmem:[#allocation17_spill] sm:$0xff] %v6933_v56  ;;  %v5155_v62 = vpack.i.bf16 %v6925_v2, %v6921_v51  ;;  %v5160_v24 = vpack.i.bf16 %v6933_v56, %v6929_v25  ;;  %v5145_v37 = vpack.i.bf16 %v6875_v46, %v6871_v40 }
 0xacc   :  { %5126 = vrot.lane.b32.xlu1 %v5125_v55, %s5436_s0  ;;  %4649 = vmatprep.mubr.msk.bf16.mxu0 %vm8320_vm5, %v5350_v18  ;;  %v5072_v0 = vpop.permute.xlu0 %5071  ;;  %v5069_v52 = vunpack.i.h.bf16 %v5067_v28  ;;  %v5064_v38 = vunpack.i.h.bf16 %v5062_v4  ;;  %v5063_v58 = vunpack.i.l.bf16 %v5062_v4  ;;  %v5068_v44 = vunpack.i.l.bf16 %v5067_v28 }
 0xacd   :  { %5111 = vrot.lane.b32.xlu0 %v5100_v39, %s5437_s23  ;;  %4650 = vmatprep.mubr.msk.bf16.mxu1 %vm8321_vm0, %v5350_v18  ;;  %v5082_v39 = vpop.permute.xlu1 %5081  ;;  %v5074_v29 = vunpack.i.h.bf16 %v5072_v0  ;;  %v5073_v33 = vunpack.i.l.bf16 %v5072_v0  ;;  %vm8322_vm4 = vcmp.lt.s32.totalorder %v5553_v14, 1  ;;  %vm8323_vm1 = vcmp.lt.s32.totalorder %v5553_v14, 127 }
 0xace   :  { %v5083_v1 = vunpack.i.l.bf16 %v5082_v39  ;;  %vm8324_vm5 = vmmov %vm8323_vm1 }
 0xacf   :  { %vm8325_vm0 = vmmov %vm8322_vm4 }
 0xad0   :  { %5131 = vrot.lane.b32.xlu1 %v5120_v57, %s5437_s23  ;;  %v5077_v26 = vpop.permute.xlu0 %5076  ;;  %v5084_v57 = vunpack.i.h.bf16 %v5082_v39  ;;  %vm8326_vm8 = vmmov %vm8325_vm0 }
 0xad1   :  { %5116 = vrot.lane.b32.xlu0 %v5105_v30, %s5437_s23  ;;  %v5087_v48 = vpop.permute.xlu1 %5086  ;;  %v5079_v16 = vunpack.i.h.bf16 %v5077_v26  ;;  %v5078_v36 = vunpack.i.l.bf16 %v5077_v26  ;;  %vm8329_vm7 = vmmov %vm8325_vm0 }
 0xad2   :  { %v5088_v53 = vunpack.i.l.bf16 %v5087_v48  ;;  %v6984_v18 = vsel %vm8325_vm0, %v5064_v38, %v5084_v57  ;;  %v6988_v4 = vsel %vm8326_vm8, %v5084_v57, %v5069_v52  ;;  %vm8330_vm8 = vmmov %vm8325_vm0 }
 0xad4   :  { %5136 = vrot.lane.b32.xlu1 %v5125_v55, %s5437_s23  ;;  %v5089_v55 = vunpack.i.h.bf16 %v5087_v48  ;;  %v7004_v0 = vsel %vm8329_vm7, %v5068_v44, %v5088_v53  ;;  %vm8332_vm7 = vmmov %vm8325_vm0 }
 0xad5   :  { %5156 = vrot.lane.b32.xlu0 %v5155_v62, %s5436_s0  ;;  %v5092_v17 = vpop.permute.xlu1 %5091 }
 0xad6   :  { %v5094_v30 = vunpack.i.h.bf16 %v5092_v17  ;;  %v5093_v9 = vunpack.i.l.bf16 %v5092_v17  ;;  %v7008_v17 = vsel %vm8325_vm0, %v5088_v53, %v5063_v58  ;;  %v7012_v57 = vsel %vm8330_vm8, %v5089_v55, %v5064_v38  ;;  %vm8335_vm8 = vmmov %vm8332_vm7 }
 0xad8   :  { %5141 = vrot.lane.b32.xlu1 %v5140_v5, %s5436_s0  ;;  %v6996_v28 = vsel %vm8323_vm1, %v5074_v29, %v5094_v30 }
 0xad9   :  { %5161 = vrot.lane.b32.xlu0 %v5160_v24, %s5436_s0  ;;  %v5097_v54 = vpop.permute.xlu1 %5096 }
 0xada   :  { %v5098_v8 = vunpack.i.l.bf16 %v5097_v54  ;;  %v5099_v26 = vunpack.i.h.bf16 %v5097_v54  ;;  %v7028_v54 = vsel %vm8332_vm7, %v5069_v52, %v5089_v55 }
 0xadc   :  { %5146 = vrot.lane.b32.xlu1 %v5145_v37, %s5436_s0 }
 0xadd   :  { %5166 = vrot.lane.b32.xlu0 %v5155_v62, %s5437_s23  ;;  %v6970_v62 = vsel %vm8322_vm4, %v5063_v58, %v5083_v1  ;;  %vm8327_vm4 = vmmov %vm8323_vm1 }
 0xade   :  { %v6992_v39 = vsel %vm8327_vm4, %v5073_v33, %v5093_v9  ;;  %vm8331_vm4 = vmmov %vm8323_vm1 }
 0xae0   :  { %5151 = vrot.lane.b32.xlu1 %v5140_v5, %s5437_s23  ;;  %v6974_v5 = vsel %vm8323_vm1, %v5094_v30, %v5079_v16  ;;  %v7016_v30 = vsel %vm8331_vm4, %v5098_v8, %v5073_v33  ;;  %v7044_v33 = vsel %vm8323_vm1, %v5078_v36, %v5098_v8 }
 0xae1   :  { %5171 = vrot.lane.b32.xlu0 %v5160_v24, %s5437_s23  ;;  %v6978_v24 = vsel %vm8324_vm5, %v5093_v9, %v5078_v36  ;;  %vm8328_vm5 = vmmov %vm8325_vm0  ;;  %v2494_v58 = vsel %vm5704_vm9, %v6984_v18, %v6974_v5 }
 0xae2   :  { %v7000_v48 = vsel %vm8328_vm5, %v5083_v1, %v5068_v44  ;;  %v2490_v1 = vsel %vm5704_vm9, %v6970_v62, %v6978_v24  ;;  %vm8333_vm5 = vmmov %vm8323_vm1 }
 0xae3   :  { %v7057_v19 = vsel %vm8333_vm5, %v5079_v16, %v5099_v26  ;;  %vm8334_vm0 = vmmov %vm8323_vm1  ;;  %v2582_v8 = vpack.c.bf16 %v2494_v58, %v2490_v1 }
 0xae4   :  { %5176 = vrot.lane.b32.xlu1 %v5145_v37, %s5437_s23  ;;  %v7061_v36 = vsel %vm8334_vm0, %v5099_v26, %v5074_v29  ;;  %vm8336_vm4 = vmmov %vm8334_vm0 }
 0xae5   :  { %vm8338_vm7 = vmmov %vm8334_vm0 }
 0xae6   :  { %vm8340_vm1 = vmmov %vm8335_vm8 }
 0xae7   :  { %vm8341_vm5 = vmmov %vm8340_vm1 }
 0xae8   :  { %vm8343_vm0 = vmmov %vm8340_vm1 }
 0xb36   :  { %v6964_v42 = vpop.permute.xlu0 %5101 }
 0xb37   :  { %v5104_v23 = vunpack.i.h.bf16 %v6964_v42  ;;  %v5103_v29 = vunpack.i.l.bf16 %v6964_v42 }
 0xb3a   :  { %v6966_v61 = vpop.permute.xlu1 %5121 }
 0xb3b   :  { %v6980_v37 = vpop.permute.xlu0 %5106  ;;  %v5124_v52 = vunpack.i.h.bf16 %v6966_v61  ;;  %v5123_v53 = vunpack.i.l.bf16 %v6966_v61 }
 0xb3c   :  { %v5109_v1 = vunpack.i.h.bf16 %v6980_v37  ;;  %v5108_v58 = vunpack.i.l.bf16 %v6980_v37 }
 0xb3d   :  { %v7072_v26 = vsel %vm8335_vm8, %v5104_v23, %v5124_v52  ;;  %v7086_v42 = vsel %vm8340_vm1, %v5103_v29, %v5123_v53  ;;  %vm8344_vm8 = vmmov %vm8343_vm0 }
 0xb3e   :  { %v5127_v9 = vpop.permute.xlu1 %5126  ;;  %vm8347_vm1 = vmmov %vm8336_vm4 }
 0xb3f   :  { %v5112_v55 = vpop.permute.xlu0 %5111  ;;  %v5129_v44 = vunpack.i.h.bf16 %v5127_v9  ;;  %v5128_v20 = vunpack.i.l.bf16 %v5127_v9 }
 0xb40   :  { %v5114_v43 = vunpack.i.h.bf16 %v5112_v55  ;;  %v5113_v16 = vunpack.i.l.bf16 %v5112_v55 }
 0xb41   :  { %v7090_v59 = vsel %vm8341_vm5, %v5129_v44, %v5104_v23  ;;  %v7094_v37 = vsel %vm8343_vm0, %v5108_v58, %v5128_v20  ;;  %v7098_v6 = vsel %vm8344_vm8, %v5128_v20, %v5103_v29  ;;  %vm8348_vm5 = vmmov %vm8347_vm1 }
 0xb42   :  { %v5132_v38 = vpop.permute.xlu1 %5131  ;;  %8342 = vst [vmem:[#allocation2_spill] sm:$0xff] %v7090_v59  ;;  %8345 = vst [vmem:[#allocation3_spill] sm:$0xff] %v7098_v6 }
 0xb43   :  { %v5134_v34 = vunpack.i.h.bf16 %v5132_v38  ;;  %v5133_v10 = vunpack.i.l.bf16 %v5132_v38  ;;  %v5117_v45 = vpop.permute.xlu0 %5116  ;;  %vm8349_vm0 = vmmov %vm8347_vm1 }
 0xb44   :  { %v5119_v38 = vunpack.i.h.bf16 %v5117_v45  ;;  %v5118_v55 = vunpack.i.l.bf16 %v5117_v45  ;;  %vm8350_vm8 = vmmov %vm8349_vm0 }
 0xb45   :  { %v7078_v61 = vsel %vm8336_vm4, %v5114_v43, %v5134_v34  ;;  %v7082_v9 = vsel %vm8338_vm7, %v5113_v16, %v5133_v10  ;;  %vm8346_vm7 = vmmov %vm8336_vm4 }
 0xb46   :  { %8337 = vst [vmem:[#allocation16_spill] sm:$0xff] %v7078_v61  ;;  %8339 = vst [vmem:[#allocation11_spill] sm:$0xff] %v7082_v9  ;;  %v5137_v63 = vpop.permute.xlu1 %5136  ;;  %v7102_v45 = vsel %vm8336_vm4, %v5133_v10, %v5118_v55  ;;  %v7106_v21 = vsel %vm8346_vm7, %v5134_v34, %v5119_v38  ;;  %v2545_v10 = vsel %vm5753_vm12, %v7082_v9, %v7098_v6  ;;  %vm8351_vm4 = vcmp.lt.s32.totalorder %v5553_v14, 1 }
 0xb47   :  { %v5139_v12 = vunpack.i.h.bf16 %v5137_v63  ;;  %v5138_v23 = vunpack.i.l.bf16 %v5137_v63  ;;  %v7108_v13 = vpop.permute.xlu0 %5156  ;;  %v2546_v25 = vsel %vm5783_vm13, %v7102_v45, %v7086_v42  ;;  %v2550_v20 = vsel %vm5783_vm13, %v7106_v21, %v7072_v26  ;;  %vm8352_vm7 = vmmov %vm8351_vm4 }
 0xb48   :  { %v2549_v63 = vsel %vm5753_vm12, %v7078_v61, %v7090_v59  ;;  %v7144_v9 = vsel %vm8351_vm4, %v5123_v53, %v5108_v58  ;;  %v2586_v61 = vpack.c.bf16 %v2550_v20, %v2546_v25  ;;  %v2484_v20 = vsel %vm5831_vm15, %v7016_v30, %v7004_v0 }
 0xb49   :  { %v7128_v34 = vsel %vm8347_vm1, %v5119_v38, %v5139_v12  ;;  %v7132_v29 = vsel %vm8348_vm5, %v5139_v12, %v5114_v43  ;;  %v7136_v56 = vsel %vm8349_vm0, %v5118_v55, %v5138_v23  ;;  %v7140_v6 = vsel %vm8350_vm8, %v5138_v23, %v5113_v16  ;;  %vm8353_vm1 = vmmov %vm8351_vm4 }
 0xb4a   :  { %v7148_v38 = vsel %vm8352_vm7, %v5109_v1, %v5129_v44  ;;  %v5142_v59 = vpop.permute.xlu1 %5141  ;;  %v2548_v12 = vsel %vm5831_vm15, %v7140_v6, %v7094_v37  ;;  %v7156_v43 = vsel %vm8353_vm1, %v5124_v52, %v5109_v1  ;;  %v2585_v16 = vpack.c.bf16 %v2549_v63, %v2545_v10  ;;  %2613 = vmatprep.subr.bf16.mxu0 %v2586_v61  ;;  %vm8360_vm5 = vmmov %vm8353_vm1 }
 0xb4b   :  { %v2552_v53 = vsel %vm5831_vm15, %v7132_v29, %v7148_v38  ;;  %v2547_v25 = vsel %vm5835_vm6, %v7136_v56, %v7144_v9  ;;  %v5162_v44 = vpop.permute.xlu0 %5161  ;;  %v2551_v52 = vsel %vm5835_vm6, %v7128_v34, %v7156_v43  ;;  %v2496_v1 = vsel %vm5749_vm11, %v7028_v54, %v7061_v36  ;;  %vm8361_vm0 = vmmov %vm8353_vm1 }
 0xb4c   :  { %v2588_v58 = vpack.c.bf16 %v2552_v53, %v2548_v12  ;;  %v2491_v55 = vsel %vm5795_vm14, %v7000_v48, %v7044_v33  ;;  %2614 = vmatpush1.bf16.msra.mxu0 %v2585_v16  ;;  %v2495_v61 = vsel %vm5795_vm14, %v6988_v4, %v7057_v19  ;;  %v2486_v23 = vsel %vm5783_vm13, %v6974_v5, %v6984_v18  ;;  %vm8362_vm8 = vmmov %vm8361_vm0 }
 0xb4d   :  { %v2488_v10 = vsel %vm5831_vm15, %v7061_v36, %v7028_v54  ;;  %2615 = vmatprep.subr.bf16.mxu0 %v2582_v8  ;;  %v2587_v12 = vpack.c.bf16 %v2551_v52, %v2547_v25  ;;  %v2483_v16 = vsel %vm5835_vm6, %v7044_v33, %v7000_v48  ;;  %v2487_v5 = vsel %vm5835_vm6, %v7057_v19, %v6988_v4  ;;  %vm8363_vm4 = vmmov %vm8361_vm0 }
 0xb4e   :  { %2656 = vmatprep.subr.bf16.mxu1 %v2588_v58  ;;  %v5147_v63 = vpop.permute.xlu1 %5146  ;;  %v8354_v18 = vsel %vm5709_vm10, %v7008_v17, %v6992_v39  ;;  %v8355_v54 = vsel %vm5709_vm10, %v7012_v57, %v6996_v28  ;;  %v8356_v48 = vsel %vm5749_vm11, %v7004_v0, %v7016_v30  ;;  %v8357_v19 = vsel %vm5753_vm12, %v6992_v39, %v7008_v17 }
 0xb4f   :  { %v2581_v36 = vpack.c.bf16 %v8355_v54, %v8354_v18  ;;  %v2584_v33 = vpack.c.bf16 %v2496_v1, %v8356_v48  ;;  %v8358_v4 = vsel %vm5753_vm12, %v6996_v28, %v7012_v57  ;;  %v5144_v53 = vunpack.i.h.bf16 %v5142_v59  ;;  %2657 = vmatpush1.bf16.msra.mxu1 %v2587_v12  ;;  %v5167_v18 = vpop.permute.xlu0 %5166 }
 0xb50   :  { %v2573_v8 = vpack.c.bf16 %v8358_v4, %v8357_v19  ;;  %v5143_v25 = vunpack.i.l.bf16 %v5142_v59  ;;  %v5164_v58 = vunpack.i.h.bf16 %v5162_v44  ;;  %v5163_v52 = vunpack.i.l.bf16 %v5162_v44 }
 0xb51   :  { %2616 = vmatpush1.bf16.msra.mxu0 %v2581_v36  ;;  %v2583_v0 = vpack.c.bf16 %v2495_v61, %v2491_v55  ;;  %v8359_v30 = vsel %vm5783_vm13, %v6978_v24, %v6970_v62  ;;  %v2576_v17 = vpack.c.bf16 %v2488_v10, %v2484_v20  ;;  %v2575_v1 = vpack.c.bf16 %v2487_v5, %v2483_v16 }
 0xb52   :  { %v2574_v39 = vpack.c.bf16 %v2486_v23, %v8359_v30  ;;  %v5159_v54 = vunpack.i.h.bf16 %v7108_v13  ;;  %v5158_v28 = vunpack.i.l.bf16 %v7108_v13  ;;  %v5149_v57 = vunpack.i.h.bf16 %v5147_v63  ;;  %2658 = vmatprep.subr.bf16.mxu1 %v2584_v33  ;;  %2617 = vmatprep.subr.bf16.mxu0 %v6837_v60  ;;  %v5152_v44 = vpop.permute.xlu1 %5151 }
 0xb53   :  { %v5148_v59 = vunpack.i.l.bf16 %v5147_v63  ;;  %v5169_v12 = vunpack.i.h.bf16 %v5167_v18  ;;  %v5168_v55 = vunpack.i.l.bf16 %v5167_v18  ;;  %v5154_v61 = vunpack.i.h.bf16 %v5152_v44  ;;  %2659 = vmatpush1.bf16.msra.mxu1 %v2583_v0  ;;  %v5172_v60 = vpop.permute.xlu0 %5171 }
 0xb54   :  { %v5153_v36 = vunpack.i.l.bf16 %v5152_v44  ;;  %v2390_v62 = vsel %vm8360_vm5, %v5159_v54, %v5144_v53  ;;  %v2389_v24 = vsel %vm8361_vm0, %v5158_v28, %v5143_v25  ;;  %v7241_v23 = vsel %vm8362_vm8, %v5143_v25, %v5163_v52  ;;  %2660 = vmatprep.subr.bf16.mxu1 %v6841_v32  ;;  %vm8366_vm5 = vmmov %vm8361_vm0 }
 0xb55   :  { %v7245_v13 = vsel %vm8363_vm4, %v5144_v53, %v5164_v58  ;;  %vm8364_vm7 = vcmp.lt.s32.totalorder %v5553_v14, 127  ;;  %v5174_v63 = vunpack.i.h.bf16 %v5172_v60  ;;  %v5173_v16 = vunpack.i.l.bf16 %v5172_v60  ;;  %2618 = vmatpush1.bf16.msra.mxu0 %v6839_v41  ;;  %vm8367_vm8 = vmmov %vm8361_vm0 }
 0xb56   :  { %v2414_v20 = vsel %vm8364_vm7, %v5169_v12, %v5154_v61  ;;  %vm8365_vm1 = vmmov %vm8364_vm7  ;;  %v2386_v5 = vsel %vm8366_vm5, %v5164_v58, %v5149_v57  ;;  %v2392_v48 = vsel %vm8361_vm0, %v5149_v57, %v5159_v54  ;;  %v2385_v33 = vsel %vm8367_vm8, %v5163_v52, %v5148_v59  ;;  %2619 = vmatprep.subr.bf16.mxu0 %v2574_v39  ;;  %v5177_v4 = vpop.permute.xlu1 %5176 }
 0xb57   :  { %v2413_v10 = vsel %vm8365_vm1, %v5168_v55, %v5153_v36  ;;  %vm8368_vm4 = vmmov %vm8361_vm0  ;;  %v2412_v41 = vsel %vm8365_vm1, %v5154_v61, %v5174_v63  ;;  %v5179_v32 = vunpack.i.h.bf16 %v5177_v4  ;;  %v5178_v25 = vunpack.i.l.bf16 %v5177_v4  ;;  %2661 = vmatpush1.bf16.msra.mxu1 %v6843_v3 }
 0xb58   :  { %v2391_v19 = vsel %vm8368_vm4, %v5148_v59, %v5158_v28  ;;  %vm8369_vm7 = vmmov %vm8365_vm1  ;;  %v2430_v52 = vsel %vm5704_vm9, %v2390_v62, %v2412_v41  ;;  %v2429_v0 = vsel %vm5709_vm10, %v2392_v48, %v2414_v20  ;;  %2662 = vmatprep.subr.bf16.mxu1 %v2576_v17  ;;  %v8374_v60 = vpack.c.bf16 %v6865_v50, %v6861_v22 }
 0xb59   :  { %v2411_v53 = vsel %vm8369_vm7, %v5153_v36, %v5173_v16  ;;  %v2425_v18 = vsel %vm5709_vm10, %v2391_v19, %v2413_v10  ;;  %vm8370_vm5 = vmmov %vm8365_vm1  ;;  %2620 = vmatpush1.bf16.msra.mxu0 %v2573_v8  ;;  %v8376_v22 = vpack.c.bf16 %v6875_v46, %v6871_v40  ;;  %v2554_v50 = vsel %vm5704_vm9, %v7086_v42, %v7102_v45  ;;  %v8379_v42 = vld [vmem:[#allocation17_spill] sm:$0xff]  ;;  %v8380_v45 = vld [vmem:[#allocation10_spill] sm:$0xff] }
 0xb5a   :  { %v2426_v58 = vsel %vm5704_vm9, %v2389_v24, %v2411_v53  ;;  %v2410_v30 = vsel %vm8370_vm5, %v5174_v63, %v5179_v32  ;;  %vm8371_vm0 = vmmov %vm8365_vm1  ;;  %v2418_v17 = vsel %vm5783_vm13, %v2411_v53, %v2389_v24  ;;  %v2417_v63 = vsel %vm5753_vm12, %v2413_v10, %v2391_v19  ;;  %v8377_v10 = vld [vmem:[#allocation11_spill] sm:$0xff]  ;;  %v8383_v19 = vld [vmem:[#allocation2_spill] sm:$0xff] }
 0xb5b   :  { %v2416_v39 = vsel %vm8371_vm0, %v5179_v32, %v5169_v12  ;;  %vm8372_vm8 = vmmov %vm8371_vm0  ;;  %v2570_v28 = vpack.c.bf16 %v2430_v52, %v2426_v58  ;;  %v2569_v12 = vpack.c.bf16 %v2429_v0, %v2425_v18  ;;  %v2431_v36 = vsel %vm5795_vm14, %v7245_v13, %v2410_v30  ;;  %2663 = vmatpush1.bf16.msra.mxu1 %v2575_v1  ;;  %v8385_v52 = vld [vmem:[#allocation12_spill] sm:$0xff] }
 0xb5c   :  { %v2409_v3 = vsel %vm8372_vm8, %v5173_v16, %v5178_v25  ;;  %vm8373_vm4 = vmmov %vm8371_vm0  ;;  %v2432_v59 = vsel %vm5749_vm11, %v2386_v5, %v2416_v39  ;;  %v2421_v1 = vsel %vm5753_vm12, %v2414_v20, %v2392_v48  ;;  %v2424_v24 = vsel %vm5831_vm15, %v2416_v39, %v2386_v5  ;;  %v8378_v5 = vld [vmem:[#allocation3_spill] sm:$0xff] }
 0xb5d   :  { %v2415_v54 = vsel %vm8373_vm4, %v5178_v25, %v5168_v55  ;;  %v2427_v44 = vsel %vm5795_vm14, %v7241_v23, %v2409_v3  ;;  %2621 = vmatprep.subr.bf16.mxu0 %v2570_v28  ;;  %v2422_v55 = vsel %vm5783_vm13, %v2412_v41, %v2390_v62  ;;  %v8375_v62 = vpack.c.bf16 %v6925_v2, %v6921_v51 }
 0xb5e   :  { %v2428_v57 = vsel %vm5749_vm11, %v2385_v33, %v2415_v54  ;;  %v2571_v8 = vpack.c.bf16 %v2431_v36, %v2427_v44  ;;  %2622 = vmatpush1.bf16.msra.mxu0 %v2569_v12  ;;  %v2562_v16 = vpack.c.bf16 %v2422_v55, %v2418_v17  ;;  %v2420_v4 = vsel %vm5831_vm15, %v2415_v54, %v2385_v33 }
 0xb5f   :  { %v2572_v61 = vpack.c.bf16 %v2432_v59, %v2428_v57  ;;  %2623 = vmatprep.subr.bf16.mxu0 %v8374_v60  ;;  %v2558_v20 = vsel %vm5704_vm9, %v7072_v26, %v7106_v21  ;;  %v2553_v51 = vsel %vm5709_vm10, %v8378_v5, %v8377_v10  ;;  %v2561_v2 = vpack.c.bf16 %v2421_v1, %v2417_v63  ;;  %v8382_v26 = vld [vmem:[#allocation16_spill] sm:$0xff] }
 0xb60   :  { %v2564_v48 = vpack.c.bf16 %v2424_v24, %v2420_v4  ;;  %v2419_v40 = vsel %vm5835_vm6, %v2409_v3, %v7241_v23  ;;  %v2423_v46 = vsel %vm5835_vm6, %v2410_v30, %v7245_v13  ;;  %v8381_v33 = vpack.c.bf16 %v8379_v42, %v8380_v45 }
 0xb61   :  { %2664 = vmatprep.subr.bf16.mxu1 %v2572_v61  ;;  %v2594_v21 = vpack.c.bf16 %v2558_v20, %v2554_v50  ;;  %v2557_v53 = vsel %vm5709_vm10, %v8383_v19, %v8382_v26  ;;  %v2556_v41 = vsel %vm5749_vm11, %v7094_v37, %v7140_v6  ;;  %v2560_v23 = vsel %vm5749_vm11, %v7148_v38, %v7132_v29  ;;  %v5348_v37 = vld [vmem:[%s8054_s4] ss:$8 sps:$4 sm:$0xff]   ;;  %v8384_v38 = vld [vmem:[#allocation13_spill] sm:$0xff] }
 0xb62   :  { %2665 = vmatpush1.bf16.msra.mxu1 %v2571_v8  ;;  %2624 = vmatpush1.bf16.msra.mxu0 %v8375_v62  ;;  %v2563_v13 = vpack.c.bf16 %v2423_v46, %v2419_v40  ;;  %v2593_v32 = vpack.c.bf16 %v2557_v53, %v2553_v51  ;;  %v2596_v25 = vpack.c.bf16 %v2560_v23, %v2556_v41  ;;  %vm8387_vm7 = vcmask 1041408  }
 0xb63   :  { %2666 = vmatprep.subr.bf16.mxu1 %v8376_v22  ;;  %2625 = vmatprep.subr.bf16.mxu0 %v2562_v16  ;;  %v2555_v58 = vsel %vm5795_vm14, %v7144_v9, %v7136_v56  ;;  %v2559_v6 = vsel %vm5795_vm14, %v7156_v43, %v7128_v34  ;;  %v8386_v56 = vld [vmem:[#allocation8_spill] sm:$0xff]  ;;  %v8388_v9 = vld [vmem:[#allocation9_spill] sm:$0xff]  ;;  %vm8389_vm1 = vmmov %vm8387_vm7  ;;  %v8392_v28 = vmov 0.0   ;;  %vm8393_vm8 = vcmask 15360  }
 0xb64   :  { %v2595_v29 = vpack.c.bf16 %v2559_v6, %v2555_v58  ;;  %vm8390_vm5 = vmmov %vm8389_vm1 }
 0xb65   :  { %vm8391_vm0 = vmmov %vm8389_vm1 }
 0xb66   :  { %2667 = vmatpush1.bf16.msra.mxu1 %v8381_v33  ;;  %2626 = vmatpush1.bf16.msra.mxu0 %v2561_v2  ;;  %vm8394_vm4 = vmmov %vm8393_vm8 }
 0xb67   :  { %2668 = vmatprep.subr.bf16.mxu1 %v2564_v48  ;;  %2641 = vmatprep.subr.bf16.mxu0 %v2594_v21 }
 0xb6a   :  { %2669 = vmatpush1.bf16.msra.mxu1 %v2563_v13  ;;  %2642 = vmatpush2.bf16.msra.mxu0 %v2593_v32 }
 0xb6b   :  { %2684 = vmatprep.subr.bf16.mxu1 %v2596_v25  ;;  %2727 = vmatprep.subr.mxu0 %v8384_v38 }
 0xb6d   :  { %2644 = vmatmul.mubr.bf16.vlgmr.msra.gmra.mxu0 %v5348_v37 }
 0xb6e   :  { %2685 = vmatpush2.bf16.msra.mxu1 %v2595_v29  ;;  %2728 = vmatpush1.xpose.msra.mxu0 %v8385_v52 }
 0xb6f   :  { %2802 = vmatprep.subr.mxu1 %v8386_v56  ;;  %4651 = vmatprep.subr.msk.mxu0 %vm8387_vm7, %v8384_v38  ;;  %vm8395_vm7 = vmmov %vm8391_vm0 }
 0xb71   :  { %2687 = vmatmul.mubr.bf16.vlgmr.msra.gmra.mxu1 %v5348_v37 }
 0xb72   :  { %2803 = vmatpush1.xpose.msra.mxu1 %v8388_v9 }
 0xb73   :  { %4655 = vmatprep.subr.msk.mxu1 %vm8389_vm1, %v8386_v56  ;;  %vm8396_vm1 = vmmov %vm8391_vm0 }
 0xc2d   :  { %v2645_v34 = vpop.f32.mrf.mxu0 }
 0xc2f   :  { %v2647_v43 = vpop.f32.mrf.mxu0 }
 0xc30   :  { %2761 = vmatprep.mubr.f32.mxu0 %v2647_v43 }
 0xc31   :  { %v2688_v18 = vpop.f32.mrf.mxu1  ;;  %v2649_v0 = vpop.f32.mrf.mxu0  ;;  %2762 = vmatmul.mubr.f32.vlgmr.msra.gmra.mxu0 %v2645_v34 }
 0xc32   :  { %4652 = vmatpush1.msk.msra.mxu0 %vm8390_vm5, %v8385_v52  ;;  %vm8397_vm5 = vmmov %vm8394_vm4 }
 0xc33   :  { %v2690_v30 = vpop.f32.mrf.mxu1  ;;  %v2651_v39 = vpop.f32.mrf.mxu0  ;;  %3055 = vmatprep.subr.mxu0 %v8384_v38 }
 0xc34   :  { %2836 = vmatprep.mubr.f32.mxu1 %v2690_v30  ;;  %2766 = vmatprep.mubr.f32.mxu0 %v2651_v39 }
 0xc35   :  { %v2692_v3 = vpop.f32.mrf.mxu1  ;;  %2837 = vmatmul.mubr.f32.vlgmr.msra.gmra.mxu1 %v2688_v18  ;;  %2767 = vmatmul.mubr.f32.gmra.mxu0 %v2649_v0 }
 0xc36   :  { %4656 = vmatpush1.msk.msra.mxu1 %vm8391_vm0, %v8388_v9  ;;  %2919 = vmatprep.mubr.f32.mxu0 %v8392_v28  ;;  %vm8398_vm0 = vmmov %vm8394_vm4 }
 0xc37   :  { %v2694_v54 = vpop.f32.mrf.mxu1  ;;  %3130 = vmatprep.subr.mxu1 %v8386_v56 }
 0xc38   :  { %2841 = vmatprep.mubr.f32.mxu1 %v2694_v54 }
 0xc39   :  { %2842 = vmatmul.mubr.f32.gmra.mxu1 %v2692_v3 }
 0xc3a   :  { %2996 = vmatprep.mubr.f32.mxu1 %v8392_v28 }
 0xcf1   :  { %v2763_v57 = vpop.f32.mrf.mxu0 }
 0xcf3   :  { %v2765_v59 = vpop.f32.mrf.mxu0 }
 0xcf5   :  { %v2838_v44 = vpop.f32.mrf.mxu1  ;;  %v2768_v61 = vpop.f32.mrf.mxu0 }
 0xcf6   :  { %v2839_v12 = vadd.f32 %v2838_v44, %v2763_v57 }
 0xcf7   :  { %v2840_v36 = vpop.f32.mrf.mxu1  ;;  %v2770_v17 = vpop.f32.mrf.mxu0 }
 0xcf8   :  { %v2847_v8 = vmul.f32 0.00390625, %v2839_v12 }
 0xcf9   :  { %v2843_v55 = vpop.f32.mrf.mxu1 }
 0xcfa   :  { %v2844_v60 = vadd.f32 %v2843_v55, %v2768_v61  ;;  %4653 = vmatmul.mubr.msk.f32.vlgmr.msra.gmra.mxu0 %vm8393_vm8, %v2847_v8  ;;  %4657 = vmatmul.mubr.msk.f32.vlgmr.msra.gmra.mxu1 %vm8394_vm4, %v2847_v8  ;;  %vm8399_vm8 = vmmov %vm8396_vm1 }
 0xcfb   :  { %v2845_v63 = vpop.f32.mrf.mxu1  ;;  %2925 = vmatprep.mubr.f32.mxu0 %v8392_v28  ;;  %3002 = vmatprep.mubr.f32.mxu1 %v8392_v28  ;;  %vm8400_vm4 = vmmov %vm8396_vm1 }
 0xcfc   :  { %v2848_v16 = vmul.f32 0.00390625, %v2844_v60  ;;  %3056 = vmatpush1.xpose.msra.mxu0 %v8385_v52  ;;  %3131 = vmatpush1.xpose.msra.mxu1 %v8388_v9 }
 0xcfd   :  { %4659 = vmatprep.subr.msk.mxu0 %vm8395_vm7, %v8384_v38  ;;  %4663 = vmatprep.subr.msk.mxu1 %vm8396_vm1, %v8386_v56  ;;  %vm8401_vm7 = vmmov %vm8398_vm0 }
 0xcfe   :  { %4654 = vmatmul.mubr.msk.f32.gmra.mxu0 %vm8397_vm5, %v2848_v16  ;;  %4658 = vmatmul.mubr.msk.f32.gmra.mxu1 %vm8398_vm0, %v2848_v16  ;;  %vm8402_vm1 = vmmov %vm8398_vm0 }
 0xcff   :  { %vm8403_vm5 = vmmov %vm8398_vm0 }
 0xdba   :  { %v2921_v1 = vpop.f32.mrf.mxu0  ;;  %v2998_v4 = vpop.f32.mrf.mxu1 }
 0xdbb   :  { %v7385_v24 = vsub.f32 %v2645_v34, %v2921_v1  ;;  %v7387_v50 = vsub.f32 %v2688_v18, %v2998_v4 }
 0xdbc   :  { %v2923_v62 = vpop.f32.mrf.mxu0  ;;  %v3000_v22 = vpop.f32.mrf.mxu1 }
 0xdbd   :  { %v7389_v20 = vsub.f32 %v2647_v43, %v2923_v62  ;;  %v7391_v10 = vsub.f32 %v2690_v30, %v3000_v22  ;;  %v3017_v40 = vmul.f32 %v7385_v24, %v7385_v24  ;;  %v3019_v33 = vmul.f32 %v7387_v50, %v7387_v50 }
 0xdbe   :  { %v2927_v5 = vpop.f32.mrf.mxu0  ;;  %v3004_v51 = vpop.f32.mrf.mxu1 }
 0xdbf   :  { %v3018_v2 = vmul.f32 %v7389_v20, %v7389_v20  ;;  %v3020_v48 = vmul.f32 %v7391_v10, %v7391_v10  ;;  %v7399_v46 = vsub.f32 %v2649_v0, %v2927_v5  ;;  %v7403_v21 = vsub.f32 %v2692_v3, %v3004_v51 }
 0xdc0   :  { %v2929_v42 = vpop.f32.mrf.mxu0  ;;  %v3006_v45 = vpop.f32.mrf.mxu1 }
 0xdc1   :  { %v7405_v26 = vsub.f32 %v2651_v39, %v2929_v42  ;;  %v7407_v19 = vsub.f32 %v2694_v54, %v3006_v45  ;;  %3089 = vmatprep.mubr.f32.mxu0 %v3018_v2  ;;  %3164 = vmatprep.mubr.f32.mxu1 %v3020_v48  ;;  %v3021_v23 = vmul.f32 %v7399_v46, %v7399_v46 }
 0xdc2   :  { %3090 = vmatmul.mubr.f32.vlgmr.msra.gmra.mxu0 %v3017_v40  ;;  %3165 = vmatmul.mubr.f32.vlgmr.msra.gmra.mxu1 %v3019_v33  ;;  %v3023_v13 = vmul.f32 %v7403_v21, %v7403_v21 }
 0xdc3   :  { %v3022_v53 = vmul.f32 %v7405_v26, %v7405_v26  ;;  %v3024_v41 = vmul.f32 %v7407_v19, %v7407_v19  ;;  %4660 = vmatpush1.msk.msra.mxu0 %vm8399_vm8, %v8385_v52  ;;  %4664 = vmatpush1.msk.msra.mxu1 %vm8400_vm4, %v8388_v9  ;;  %vm8404_vm8 = vcmp.lt.s32.totalorder %v5553_v14, 16 }
 0xdc4   :  { %vm8405_vm4 = vmmov %vm8404_vm8 }
 0xdc5   :  { %3094 = vmatprep.mubr.f32.mxu0 %v3022_v53  ;;  %3169 = vmatprep.mubr.f32.mxu1 %v3024_v41 }
 0xdc6   :  { %3095 = vmatmul.mubr.f32.gmra.mxu0 %v3021_v23  ;;  %3170 = vmatmul.mubr.f32.gmra.mxu1 %v3023_v13 }
 0xdc7   :  { %3247 = vmatprep.mubr.f32.mxu0 %v8392_v28  ;;  %3324 = vmatprep.mubr.f32.mxu1 %v8392_v28 }
 0xe82   :  { %v3091_v32 = vpop.f32.mrf.mxu0  ;;  %v3166_v25 = vpop.f32.mrf.mxu1 }
 0xe83   :  { %v3167_v58 = vadd.f32 %v3166_v25, %v3091_v32 }
 0xe84   :  { %v3093_v6 = vpop.f32.mrf.mxu0  ;;  %v3168_v37 = vpop.f32.mrf.mxu1 }
 0xe85   :  { %v3175_v29 = vmul.f32 0.00390625, %v3167_v58 }
 0xe86   :  { %v3096_v34 = vpop.f32.mrf.mxu0  ;;  %v3171_v43 = vpop.f32.mrf.mxu1 }
 0xe87   :  { %v3172_v18 = vadd.f32 %v3171_v43, %v3096_v34  ;;  %4661 = vmatmul.mubr.msk.f32.vlgmr.msra.gmra.mxu0 %vm8401_vm7, %v3175_v29  ;;  %4665 = vmatmul.mubr.msk.f32.vlgmr.msra.gmra.mxu1 %vm8402_vm1, %v3175_v29  ;;  %vm8406_vm7 = vmmov %vm8405_vm4 }
 0xe88   :  { %v3098_v0 = vpop.f32.mrf.mxu0  ;;  %v3173_v30 = vpop.f32.mrf.mxu1  ;;  %3253 = vmatprep.mubr.f32.mxu0 %v8392_v28  ;;  %3330 = vmatprep.mubr.f32.mxu1 %v8392_v28  ;;  %vm8407_vm1 = vmmov %vm8405_vm4 }
 0xe89   :  { %v3176_v39 = vmul.f32 0.00390625, %v3172_v18 }
 0xe8b   :  { %4662 = vmatmul.mubr.msk.f32.gmra.mxu0 %vm8403_vm5, %v3176_v39  ;;  %4666 = vmatmul.mubr.msk.f32.gmra.mxu1 %vm8398_vm0, %v3176_v39  ;;  %vm8408_vm5 = vcmp.lt.s32.totalorder %v5553_v14, 112 }
 0xe8c   :  { %vm8409_vm0 = vmmov %vm8408_vm5 }
 0xf47   :  { %v3249_v3 = vpop.f32.mrf.mxu0  ;;  %v3326_v54 = vpop.f32.mrf.mxu1 }
 0xf48   :  { %v3250_v57 = vadd.f32 1e-05, %v3249_v3  ;;  %v3327_v59 = vadd.f32 1e-05, %v3326_v54 }
 0xf49   :  { %v3251_v44 = vpop.f32.mrf.mxu0  ;;  %v3328_v12 = vpop.f32.mrf.mxu1 }
 0xf4a   :  { %5386 = vrsqrt.f32 %v3250_v57  ;;  %v3252_v61 = vadd.f32 1e-05, %v3251_v44  ;;  %v3329_v36 = vadd.f32 1e-05, %v3328_v12 }
 0xf4b   :  { %5388 = vrsqrt.f32 %v3327_v59  ;;  %v3255_v8 = vpop.f32.mrf.mxu0  ;;  %v3332_v17 = vpop.f32.mrf.mxu1 }
 0xf4c   :  { %5390 = vrsqrt.f32 %v3252_v61  ;;  %v3256_v55 = vadd.f32 1e-05, %v3255_v8  ;;  %v3333_v60 = vadd.f32 1e-05, %v3332_v17 }
 0xf4d   :  { %5392 = vrsqrt.f32 %v3329_v36  ;;  %v3257_v63 = vpop.f32.mrf.mxu0  ;;  %v3334_v16 = vpop.f32.mrf.mxu1 }
 0xf4e   :  { %5394 = vrsqrt.f32 %v3256_v55  ;;  %v3258_v1 = vadd.f32 1e-05, %v3257_v63  ;;  %v3335_v4 = vadd.f32 1e-05, %v3334_v16 }
 0xf4f   :  { %5396 = vrsqrt.f32 %v3333_v60 }
 0xf50   :  { %5398 = vrsqrt.f32 %v3258_v1 }
 0xf51   :  { %5400 = vrsqrt.f32 %v3335_v4 }
 0xf57   :  { %v5387_v62 = vpop.eup %5386 }
 0xf58   :  { %v5389_v22 = vpop.eup %5388  ;;  %v3345_v2 = vmul.f32 %v5387_v62, %v7385_v24 }
 0xf59   :  { %v5391_v5 = vpop.eup %5390  ;;  %v3347_v13 = vmul.f32 %v5389_v22, %v7387_v50 }
 0xf5a   :  { %v5393_v51 = vpop.eup %5392  ;;  %v3346_v42 = vmul.f32 %v5391_v5, %v7389_v20  ;;  %v3353_v23 = vmax.f32 %v3345_v2, 0.0 }
 0xf5b   :  { %v5395_v48 = vpop.eup %5394  ;;  %v3348_v58 = vmul.f32 %v5393_v51, %v7391_v10 }
 0xf5c   :  { %v5397_v40 = vpop.eup %5396  ;;  %v3349_v45 = vmul.f32 %v5395_v48, %v7399_v46  ;;  %v3354_v6 = vmax.f32 %v3346_v42, 0.0  ;;  %v3355_v46 = vmax.f32 %v3347_v13, 0.0 }
 0xf5d   :  { %v5399_v33 = vpop.eup %5398  ;;  %v3351_v53 = vmul.f32 %v5397_v40, %v7403_v21  ;;  %v3356_v43 = vmax.f32 %v3348_v58, 0.0 }
 0xf5e   :  { %v5401_v41 = vpop.eup %5400  ;;  %v3357_v32 = vmax.f32 %v3349_v45, 0.0  ;;  %v3350_v25 = vmul.f32 %v5399_v33, %v7405_v26 }
 0xf5f   :  { %v3352_v24 = vmul.f32 %v5401_v41, %v7407_v19  ;;  %v3359_v37 = vmax.f32 %v3351_v53, 0.0 }
 0xf60   :  { %v3358_v29 = vmax.f32 %v3350_v25, 0.0  ;;  %v5180_v20 = vpack.i.bf16 %v3357_v32, %v3353_v23  ;;  %v7441_v26 = vpack.c.bf16 %v3357_v32, %v3353_v23 }
 0xf61   :  { %v3360_v34 = vmax.f32 %v3352_v24, 0.0  ;;  %v5185_v50 = vpack.i.bf16 %v3359_v37, %v3355_v46  ;;  %v7445_v19 = vpack.c.bf16 %v3359_v37, %v3355_v46 }
 0xf62   :  { %5181 = vrot.lane.b32.xlu0 %v5180_v20, %s5434_s21  ;;  %v5200_v21 = vpack.i.bf16 %v3358_v29, %v3354_v6  ;;  %v7439_v18 = vpack.c.bf16 %v3358_v29, %v3354_v6 }
 0xf63   :  { %v7443_v10 = vpack.c.bf16 %v3360_v34, %v3356_v43  ;;  %v5205_v0 = vpack.i.bf16 %v3360_v34, %v3356_v43 }
 0xf64   :  { %5201 = vrot.lane.b32.xlu1 %v5200_v21, %s5434_s21 }
 0xf66   :  { %5186 = vrot.lane.b32.xlu0 %v5185_v50, %s5434_s21 }
 0xf68   :  { %5206 = vrot.lane.b32.xlu1 %v5205_v0, %s5434_s21 }
 0xf6a   :  { %5191 = vrot.lane.b32.xlu0 %v5180_v20, %s5435_s22 }
 0xf6c   :  { %5211 = vrot.lane.b32.xlu1 %v5200_v21, %s5435_s22 }
 0xf6e   :  { %5196 = vrot.lane.b32.xlu0 %v5185_v50, %s5435_s22 }
 0xf70   :  { %5216 = vrot.lane.b32.xlu1 %v5205_v0, %s5435_s22 }
 0xf72   :  { %5221 = vrot.lane.b32.xlu0 %v5180_v20, %s5436_s0 }
 0xf74   :  { %5241 = vrot.lane.b32.xlu1 %v5200_v21, %s5436_s0 }
 0xf76   :  { %5226 = vrot.lane.b32.xlu0 %v5185_v50, %s5436_s0 }
 0xf78   :  { %5246 = vrot.lane.b32.xlu1 %v5205_v0, %s5436_s0 }
 0xf7a   :  { %5231 = vrot.lane.b32.xlu0 %v5180_v20, %s5437_s23 }
 0xf7c   :  { %5251 = vrot.lane.b32.xlu1 %v5200_v21, %s5437_s23 }
 0xf7e   :  { %5236 = vrot.lane.b32.xlu0 %v5185_v50, %s5437_s23 }
 0xf80   :  { %5256 = vrot.lane.b32.xlu1 %v5205_v0, %s5437_s23 }
 0xfd4   :  { %v5182_v30 = vpop.permute.xlu0 %5181 }
 0xfd5   :  { %v5184_v3 = vunpack.i.h.bf16 %v5182_v30  ;;  %v5183_v54 = vunpack.i.l.bf16 %v5182_v30 }
 0xfd6   :  { %v5202_v39 = vpop.permute.xlu1 %5201 }
 0xfd7   :  { %v5204_v57 = vunpack.i.h.bf16 %v5202_v39  ;;  %v5203_v59 = vunpack.i.l.bf16 %v5202_v39 }
 0xfd8   :  { %v5187_v44 = vpop.permute.xlu0 %5186 }
 0xfd9   :  { %v7463_v12 = vsel %vm8404_vm8, %v5183_v54, %v5203_v59  ;;  %v7467_v61 = vsel %vm8405_vm4, %v5184_v3, %v5204_v57  ;;  %v5189_v17 = vunpack.i.h.bf16 %v5187_v44  ;;  %v5188_v55 = vunpack.i.l.bf16 %v5187_v44  ;;  %vm8410_vm8 = vmmov %vm8409_vm0 }
 0xfda   :  { %v5207_v36 = vpop.permute.xlu1 %5206  ;;  %vm8411_vm4 = vmmov %vm8409_vm0 }
 0xfdb   :  { %v5209_v60 = vunpack.i.h.bf16 %v5207_v36  ;;  %v5208_v63 = vunpack.i.l.bf16 %v5207_v36 }
 0xfdc   :  { %v5192_v16 = vpop.permute.xlu0 %5191 }
 0xfdd   :  { %v7473_v1 = vsel %vm8406_vm7, %v5188_v55, %v5208_v63  ;;  %v7477_v4 = vsel %vm8407_vm1, %v5189_v17, %v5209_v60  ;;  %v5194_v62 = vunpack.i.h.bf16 %v5192_v16  ;;  %v5193_v5 = vunpack.i.l.bf16 %v5192_v16  ;;  %vm8413_vm7 = vmmov %vm8409_vm0 }
 0xfde   :  { %v5212_v22 = vpop.permute.xlu1 %5211  ;;  %vm8414_vm1 = vmmov %vm8409_vm0 }
 0xfdf   :  { %v5214_v51 = vunpack.i.h.bf16 %v5212_v22  ;;  %v5213_v2 = vunpack.i.l.bf16 %v5212_v22 }
 0xfe0   :  { %v5197_v40 = vpop.permute.xlu0 %5196 }
 0xfe1   :  { %v3405_v42 = vsel %vm8408_vm5, %v5193_v5, %v5213_v2  ;;  %v3406_v45 = vsel %vm8409_vm0, %v5194_v62, %v5214_v51  ;;  %v5199_v33 = vunpack.i.h.bf16 %v5197_v40  ;;  %v5198_v53 = vunpack.i.l.bf16 %v5197_v40  ;;  %vm8415_vm5 = vmmov %vm8409_vm0  ;;  %v8421_v40 = vld [vmem:[#allocation6_spill] sm:$0xff] }
 0xfe2   :  { %v5217_v41 = vpop.permute.xlu1 %5216  ;;  %v5260_v23 = vpack.i.bf16 %v3406_v45, %v3405_v42  ;;  %v3645_v0 = vpack.c.bf16 %v3406_v45, %v3405_v42 }
 0xfe3   :  { %v3404_v13 = vsel %vm8410_vm8, %v5214_v51, %v5199_v33  ;;  %v3403_v32 = vsel %vm8411_vm4, %v5213_v2, %v5198_v53  ;;  %v5219_v25 = vunpack.i.h.bf16 %v5217_v41  ;;  %v5218_v58 = vunpack.i.l.bf16 %v5217_v41 }
 0xfe4   :  { %v3418_v6 = vsel %vm5600_vm3, %v7463_v12, %v3403_v32  ;;  %v3422_v37 = vsel %vm5600_vm3, %v7467_v61, %v3404_v13  ;;  %5261 = vrot.lane.b32.xlu0 %v5260_v23, %s5436_s0  ;;  %vm8417_vm3 = vcmp.lt.s32.totalorder %v5553_v14, 16  ;;  %v5222_v41 = vpop.permute.xlu0 %5221 }
 0xfe5   :  { %v3401_v29 = vsel %vm8413_vm7, %v5198_v53, %v5218_v58  ;;  %v3402_v20 = vsel %vm8414_vm1, %v5199_v33, %v5219_v25  ;;  %v3407_v34 = vsel %vm8415_vm5, %v5218_v58, %v5193_v5  ;;  %v3408_v46 = vsel %vm8409_vm0, %v5219_v25, %v5194_v62  ;;  %vm8418_vm8 = vmmov %vm8417_vm3  ;;  %v5353_v53 = vld [vmem:[%s8055_s5 + $0x4] ss:$8 sps:$4 sm:$0xff]  }
 0xfe6   :  { %v5280_v21 = vpack.i.bf16 %v3422_v37, %v3418_v6  ;;  %v3646_v43 = vpack.c.bf16 %v3422_v37, %v3418_v6  ;;  %v5265_v50 = vpack.i.bf16 %v3402_v20, %v3401_v29  ;;  %v3420_v39 = vsel %vm5596_vm2, %v7473_v1, %v3407_v34  ;;  %vm8419_vm4 = vmmov %vm8417_vm3 }
 0xfe7   :  { %v3424_v44 = vsel %vm5596_vm2, %v7477_v4, %v3408_v46  ;;  %v3380_v36 = vsel %vm8417_vm3, %v5204_v57, %v5189_v17  ;;  %v3379_v22 = vsel %vm8418_vm8, %v5203_v59, %v5188_v55  ;;  %v3383_v5 = vsel %vm8419_vm4, %v5208_v63, %v5183_v54  ;;  %vm8420_vm7 = vmmov %vm8417_vm3  ;;  %v8425_v59 = vld [vmem:[#allocation7_spill] sm:$0xff] }
 0xfe8   :  { %5281 = vrot.lane.b32.xlu1 %v5280_v21, %s5436_s0  ;;  %3667 = vmatprep.subr.bf16.mxu0 %v3646_v43  ;;  %v3648_v16 = vpack.c.bf16 %v3424_v44, %v3420_v39  ;;  %v5285_v62 = vpack.i.bf16 %v3424_v44, %v3420_v39  ;;  %v3384_v51 = vsel %vm8420_vm7, %v5209_v60, %v5184_v3  ;;  %vm8429_vm5 = vcmask 130048   ;;  %v5227_v13 = vpop.permute.xlu0 %5226 }
 0xfe9   :  { %5266 = vrot.lane.b32.xlu0 %v5265_v50, %s5436_s0  ;;  %3668 = vmatpush1.bf16.msra.mxu0 %v3645_v0  ;;  %v3647_v2 = vpack.c.bf16 %v3402_v20, %v3401_v29  ;;  %vm8422_vm2 = vnez %v8421_v40  ;;  %vm8426_vm1 = vnez %v8425_v59  ;;  %v5300_v63 = vpack.i.bf16 %v7467_v61, %v7463_v12  ;;  %vm8430_vm0 = vmmov %vm8429_vm5 }
 0xfea   :  { %3710 = vmatprep.subr.bf16.mxu1 %v3648_v16  ;;  %v7523_v33 = vsel %vm8422_vm2, %v3405_v42, %v3383_v5  ;;  %v7527_v57 = vsel %vm8422_vm2, %v3406_v45, %v3384_v51  ;;  %v7531_v17 = vsel %vm8426_vm1, %v3401_v29, %v3379_v22  ;;  %v7535_v3 = vsel %vm8426_vm1, %v3402_v20, %v3380_v36 }
 0xfeb   :  { %8423 = vst [vmem:[#allocation14_spill] sm:$0xff] %v7523_v33  ;;  %8424 = vst [vmem:[#allocation15_spill] sm:$0xff] %v7527_v57  ;;  %3711 = vmatpush1.bf16.msra.mxu1 %v3647_v2  ;;  %v5315_v60 = vpack.i.bf16 %v7527_v57, %v7523_v33  ;;  %v5320_v42 = vpack.i.bf16 %v7535_v3, %v7531_v17  ;;  %v5305_v45 = vpack.i.bf16 %v7477_v4, %v7473_v1 }
 0xfec   :  { %5286 = vrot.lane.b32.xlu1 %v5285_v62, %s5436_s0  ;;  %8427 = vst [vmem:[#allocation11_spill] sm:$0xff] %v7531_v17  ;;  %8428 = vst [vmem:[#allocation3_spill] sm:$0xff] %v7535_v3  ;;  %4669 = vmatprep.mubr.msk.bf16.mxu0 %vm8429_vm5, %v5353_v53  ;;  %v5232_v25 = vpop.permute.xlu0 %5231  ;;  %v5224_v20 = vunpack.i.h.bf16 %v5222_v41  ;;  %v5229_v43 = vunpack.i.h.bf16 %v5227_v13  ;;  %v5223_v39 = vunpack.i.l.bf16 %v5222_v41  ;;  %vm8431_vm3 = vcmp.lt.s32.totalorder %v5553_v14, 127 }
 0xfed   :  { %5271 = vrot.lane.b32.xlu0 %v5260_v23, %s5437_s23  ;;  %4670 = vmatprep.mubr.msk.bf16.mxu1 %vm8430_vm0, %v5353_v53  ;;  %v5242_v23 = vpop.permute.xlu1 %5241  ;;  %v5234_v16 = vunpack.i.h.bf16 %v5232_v25  ;;  %vm8432_vm8 = vcmp.lt.s32.totalorder %v5553_v14, 1  ;;  %vm8434_vm7 = vmmov %vm8431_vm3 }
 0xfee   :  { %v5244_v34 = vunpack.i.h.bf16 %v5242_v23  ;;  %v5243_v46 = vunpack.i.l.bf16 %v5242_v23  ;;  %vm8433_vm4 = vmmov %vm8432_vm8 }
 0xfef   :  { %vm8435_vm2 = vmmov %vm8433_vm4 }
 0xff0   :  { %5291 = vrot.lane.b32.xlu1 %v5280_v21, %s5437_s23  ;;  %v5237_v24 = vpop.permute.xlu0 %5236  ;;  %v7576_v40 = vsel %vm8432_vm8, %v5223_v39, %v5243_v46  ;;  %v7580_v59 = vsel %vm8433_vm4, %v5224_v20, %v5244_v34  ;;  %vm8436_vm1 = vmmov %vm8435_vm2 }
 0xff1   :  { %5276 = vrot.lane.b32.xlu0 %v5265_v50, %s5437_s23  ;;  %v5247_v32 = vpop.permute.xlu1 %5246  ;;  %v5238_v6 = vunpack.i.l.bf16 %v5237_v24  ;;  %v5239_v21 = vunpack.i.h.bf16 %v5237_v24  ;;  %v5228_v50 = vunpack.i.l.bf16 %v5227_v13  ;;  %vm8437_vm5 = vmmov %vm8431_vm3 }
 0xff2   :  { %v5249_v44 = vunpack.i.h.bf16 %v5247_v32  ;;  %v5248_v36 = vunpack.i.l.bf16 %v5247_v32  ;;  %vm8438_vm0 = vmmov %vm8431_vm3 }
 0xff3   :  { %vm8440_vm8 = vmmov %vm8436_vm1 }
 0xff4   :  { %5296 = vrot.lane.b32.xlu1 %v5285_v62, %s5437_s23  ;;  %v5233_v62 = vunpack.i.l.bf16 %v5232_v25  ;;  %v7610_v13 = vsel %vm8440_vm8, %v5248_v36, %v5223_v39  ;;  %vm8441_vm4 = vmmov %vm8436_vm1 }
 0xff5   :  { %5316 = vrot.lane.b32.xlu0 %v5315_v60, %s5436_s0  ;;  %v5252_v58 = vpop.permute.xlu1 %5251  ;;  %v7614_v32 = vsel %vm8441_vm4, %v5249_v44, %v5224_v20  ;;  %vm8447_vm8 = vmmov %vm8438_vm0 }
 0xff6   :  { %v5254_v0 = vunpack.i.h.bf16 %v5252_v58  ;;  %v5253_v30 = vunpack.i.l.bf16 %v5252_v58  ;;  %vm8449_vm4 = vmmov %vm8438_vm0 }
 0xff8   :  { %5301 = vrot.lane.b32.xlu1 %v5300_v63, %s5436_s0  ;;  %v7570_v22 = vsel %vm8431_vm3, %v5253_v30, %v5238_v6  ;;  %v7598_v53 = vsel %vm8437_vm5, %v5233_v62, %v5253_v30  ;;  %v7602_v41 = vsel %vm8438_vm0, %v5234_v16, %v5254_v0  ;;  %vm8439_vm3 = vmmov %vm8436_vm1 }
 0xff9   :  { %5321 = vrot.lane.b32.xlu0 %v5320_v42, %s5436_s0  ;;  %v5257_v37 = vpop.permute.xlu1 %5256  ;;  %v7606_v23 = vsel %vm8439_vm3, %v5228_v50, %v5248_v36  ;;  %v3546_v25 = vsel %vm5704_vm9, %v7576_v40, %v7570_v22  ;;  %vm8445_vm5 = vmmov %vm8439_vm3 }
 0xffa   :  { %v5259_v5 = vunpack.i.h.bf16 %v5257_v37  ;;  %v5258_v51 = vunpack.i.l.bf16 %v5257_v37 }
 0xffc   :  { %5306 = vrot.lane.b32.xlu1 %v5305_v45, %s5436_s0  ;;  %v7654_v30 = vsel %vm8438_vm0, %v5239_v21, %v5259_v5 }
 0xffd   :  { %5326 = vrot.lane.b32.xlu0 %v5315_v60, %s5437_s23  ;;  %v7584_v60 = vsel %vm8434_vm7, %v5254_v0, %v5239_v21  ;;  %vm8442_vm7 = vmmov %vm8438_vm0 }
 0xffe   :  { %v7622_v58 = vsel %vm8442_vm7, %v5238_v6, %v5258_v51  ;;  %v3550_v20 = vsel %vm5704_vm9, %v7580_v59, %v7584_v60  ;;  %vm8451_vm7 = vmmov %vm8439_vm3 }
0x1000   :  { %5311 = vrot.lane.b32.xlu1 %v5300_v63, %s5437_s23 }
0x1001   :  { %5331 = vrot.lane.b32.xlu0 %v5320_v42, %s5437_s23  ;;  %v7590_v42 = vsel %vm8435_vm2, %v5244_v34, %v5229_v43  ;;  %vm8443_vm2 = vmmov %vm8438_vm0 }
0x1002   :  { %v7626_v24 = vsel %vm8443_vm2, %v5258_v51, %v5233_v62  ;;  %vm8452_vm2 = vmmov %vm8439_vm3 }
0x1003   :  { %v3548_v21 = vsel %vm5749_vm11, %v7606_v23, %v7626_v24 }
0x1004   :  { %5336 = vrot.lane.b32.xlu1 %v5305_v45, %s5437_s23  ;;  %v7594_v45 = vsel %vm8436_vm1, %v5243_v46, %v5228_v50  ;;  %vm8444_vm1 = vmmov %vm8438_vm0  ;;  %v7638_v46 = vsel %vm8445_vm5, %v5229_v43, %v5249_v44 }
0x1005   :  { %v7630_v37 = vsel %vm8444_vm1, %v5259_v5, %v5234_v16  ;;  %v3638_v16 = vpack.c.bf16 %v3550_v20, %v3546_v25  ;;  %v3547_v5 = vsel %vm5795_vm14, %v7594_v45, %v7622_v58  ;;  %vm8454_vm1 = vmmov %vm8452_vm2 }
0x1006   :  { %v3552_v62 = vsel %vm5749_vm11, %v7638_v46, %v7630_v37  ;;  %vm8455_vm5 = vmmov %vm8454_vm1 }
0x1056   :  { %v7566_v29 = vpop.permute.xlu0 %5261 }
0x1057   :  { %v5264_v51 = vunpack.i.h.bf16 %v7566_v29  ;;  %v5263_v44 = vunpack.i.l.bf16 %v7566_v29 }
0x105a   :  { %v7572_v2 = vpop.permute.xlu1 %5281 }
0x105b   :  { %v7586_v63 = vpop.permute.xlu0 %5266  ;;  %v5284_v43 = vunpack.i.h.bf16 %v7572_v2  ;;  %v5283_v55 = vunpack.i.l.bf16 %v7572_v2 }
0x105c   :  { %v5269_v6 = vunpack.i.h.bf16 %v7586_v63  ;;  %v5268_v28 = vunpack.i.l.bf16 %v7586_v63 }
0x105d   :  { %v7682_v50 = vsel %vm8439_vm3, %v5264_v51, %v5284_v43  ;;  %v7696_v29 = vsel %vm8451_vm7, %v5263_v44, %v5283_v55  ;;  %vm8457_vm3 = vmmov %vm8438_vm0 }
0x105e   :  { %v5287_v34 = vpop.permute.xlu1 %5286  ;;  %8446 = vst [vmem:[#allocation17_spill] sm:$0xff] %v7682_v50  ;;  %vm8460_vm7 = vmmov %vm8438_vm0 }
0x105f   :  { %v5272_v39 = vpop.permute.xlu0 %5271  ;;  %v5289_v25 = vunpack.i.h.bf16 %v5287_v34  ;;  %v5288_v20 = vunpack.i.l.bf16 %v5287_v34 }
0x1060   :  { %v5274_v48 = vunpack.i.h.bf16 %v5272_v39  ;;  %v5273_v8 = vunpack.i.l.bf16 %v5272_v39 }
0x1061   :  { %v7700_v52 = vsel %vm8452_vm2, %v5289_v25, %v5264_v51  ;;  %v7704_v63 = vsel %vm8454_vm1, %v5268_v28, %v5288_v20  ;;  %v7708_v56 = vsel %vm8455_vm5, %v5288_v20, %v5263_v44  ;;  %vm8461_vm2 = vmmov %vm8438_vm0 }
0x1062   :  { %v5292_v54 = vpop.permute.xlu1 %5291  ;;  %8453 = vst [vmem:[#allocation2_spill] sm:$0xff] %v7700_v52  ;;  %8456 = vst [vmem:[#allocation5_spill] sm:$0xff] %v7708_v56 }
0x1063   :  { %v5294_v36 = vunpack.i.h.bf16 %v5292_v54  ;;  %v5293_v0 = vunpack.i.l.bf16 %v5292_v54  ;;  %v5277_v9 = vpop.permute.xlu0 %5276  ;;  %vm8462_vm5 = vmmov %vm8454_vm1 }
0x1064   :  { %v5279_v54 = vunpack.i.h.bf16 %v5277_v9  ;;  %v5278_v39 = vunpack.i.l.bf16 %v5277_v9 }
0x1065   :  { %v7688_v2 = vsel %vm8447_vm8, %v5274_v48, %v5294_v36  ;;  %v7692_v34 = vsel %vm8449_vm4, %v5273_v8, %v5293_v0  ;;  %vm8458_vm8 = vmmov %vm8438_vm0 }
0x1066   :  { %8448 = vst [vmem:[#allocation10_spill] sm:$0xff] %v7688_v2  ;;  %8450 = vst [vmem:[#allocation16_spill] sm:$0xff] %v7692_v34  ;;  %v5297_v38 = vpop.permute.xlu1 %5296  ;;  %v7712_v9 = vsel %vm8438_vm0, %v5293_v0, %v5278_v39  ;;  %v7716_v17 = vsel %vm8457_vm3, %v5294_v36, %v5279_v54  ;;  %v3601_v0 = vsel %vm5753_vm12, %v7692_v34, %v7708_v56 }
0x1067   :  { %v5299_v3 = vunpack.i.h.bf16 %v5297_v38  ;;  %v5298_v51 = vunpack.i.l.bf16 %v5297_v38  ;;  %v7718_v33 = vpop.permute.xlu0 %5316  ;;  %v3602_v57 = vsel %vm5783_vm13, %v7712_v9, %v7696_v29  ;;  %v3606_v44 = vsel %vm5783_vm13, %v7716_v17, %v7682_v50  ;;  %vm8459_vm4 = vmmov %vm8438_vm0 }
0x1068   :  { %v3605_v38 = vsel %vm5753_vm12, %v7688_v2, %v7700_v52  ;;  %v7754_v34 = vsel %vm8454_vm1, %v5283_v55, %v5268_v28  ;;  %v3642_v2 = vpack.c.bf16 %v3606_v44, %v3602_v57  ;;  %vm8463_vm0 = vmmov %vm8454_vm1  ;;  %v8464_v44 = vsel %vm5709_vm10, %v7610_v13, %v7598_v53 }
0x1069   :  { %v7738_v36 = vsel %vm8458_vm8, %v5279_v54, %v5299_v3  ;;  %v7742_v20 = vsel %vm8459_vm4, %v5299_v3, %v5274_v48  ;;  %v7746_v50 = vsel %vm8460_vm7, %v5278_v39, %v5298_v51  ;;  %v7750_v56 = vsel %vm8461_vm2, %v5298_v51, %v5273_v8  ;;  %vm8469_vm3 = vmmov %vm8463_vm0 }
0x106a   :  { %v7758_v54 = vsel %vm8462_vm5, %v5269_v6, %v5289_v25  ;;  %v5302_v52 = vpop.permute.xlu1 %5301  ;;  %v3604_v48 = vsel %vm5831_vm15, %v7750_v56, %v7704_v63  ;;  %v7766_v3 = vsel %vm8463_vm0, %v5284_v43, %v5269_v6  ;;  %v3641_v8 = vpack.c.bf16 %v3605_v38, %v3601_v0  ;;  %3669 = vmatprep.subr.bf16.mxu0 %v3642_v2  ;;  %vm8470_vm8 = vmmov %vm8463_vm0 }
0x106b   :  { %v3608_v28 = vsel %vm5831_vm15, %v7742_v20, %v7758_v54  ;;  %v3603_v57 = vsel %vm5835_vm6, %v7746_v50, %v7754_v34  ;;  %v7776_v55 = vpop.permute.xlu0 %5321  ;;  %v3607_v6 = vsel %vm5835_vm6, %v7738_v36, %v7766_v3  ;;  %v3551_v43 = vsel %vm5795_vm14, %v7590_v42, %v7654_v30  ;;  %vm8471_vm4 = vmmov %vm8461_vm2 }
0x106c   :  { %v3644_v25 = vpack.c.bf16 %v3608_v28, %v3604_v48  ;;  %v3542_v39 = vsel %vm5783_vm13, %v7584_v60, %v7580_v59  ;;  %3670 = vmatpush1.bf16.msra.mxu0 %v3641_v8  ;;  %v3643_v51 = vpack.c.bf16 %v3607_v6, %v3603_v57  ;;  %v8465_v0 = vsel %vm5709_vm10, %v7614_v32, %v7602_v41  ;;  %vm8472_vm7 = vmmov %vm8461_vm2 }
0x106d   :  { %3671 = vmatprep.subr.bf16.mxu0 %v3638_v16  ;;  %v3637_v38 = vpack.c.bf16 %v8465_v0, %v8464_v44  ;;  %v3640_v48 = vpack.c.bf16 %v3552_v62, %v3548_v21  ;;  %v3639_v28 = vpack.c.bf16 %v3551_v43, %v3547_v5  ;;  %v8466_v59 = vsel %vm5783_vm13, %v7570_v22, %v7576_v40  ;;  %vm8473_vm2 = vmmov %vm8463_vm0 }
0x106e   :  { %3712 = vmatprep.subr.bf16.mxu1 %v3644_v25  ;;  %v7790_v2 = vpop.permute.xlu1 %5306  ;;  %v3630_v60 = vpack.c.bf16 %v3542_v39, %v8466_v59  ;;  %v8467_v16 = vsel %vm5753_vm12, %v7598_v53, %v7610_v13  ;;  %v8468_v8 = vsel %vm5753_vm12, %v7602_v41, %v7614_v32  ;;  %v5304_v25 = vunpack.i.h.bf16 %v5302_v52  ;;  %vm8474_vm1 = vmmov %vm8463_vm0 }
0x106f   :  { %v3629_v57 = vpack.c.bf16 %v8468_v8, %v8467_v16  ;;  %v5303_v21 = vunpack.i.l.bf16 %v5302_v52  ;;  %3713 = vmatpush1.bf16.msra.mxu1 %v3643_v51  ;;  %v5327_v62 = vpop.permute.xlu0 %5326  ;;  %v3540_v22 = vsel %vm5831_vm15, %v7626_v24, %v7606_v23  ;;  %v3544_v40 = vsel %vm5831_vm15, %v7630_v37, %v7638_v46  ;;  %vm8475_vm5 = vmmov %vm8463_vm0 }
0x1070   :  { %v5319_v53 = vunpack.i.h.bf16 %v7718_v33  ;;  %v5318_v13 = vunpack.i.l.bf16 %v7718_v33  ;;  %3672 = vmatpush1.bf16.msra.mxu0 %v3637_v38  ;;  %v3539_v52 = vsel %vm5835_vm6, %v7622_v58, %v7594_v45  ;;  %v3543_v41 = vsel %vm5835_vm6, %v7654_v30, %v7590_v42  ;;  %3714 = vmatprep.subr.bf16.mxu1 %v3640_v48 }
0x1071   :  { %v5324_v23 = vunpack.i.h.bf16 %v7776_v55  ;;  %v5323_v32 = vunpack.i.l.bf16 %v7776_v55  ;;  %v5309_v24 = vunpack.i.h.bf16 %v7790_v2  ;;  %v5308_v37 = vunpack.i.l.bf16 %v7790_v2  ;;  %3673 = vmatprep.subr.bf16.mxu0 %v7439_v18 }
0x1072   :  { %v5312_v33 = vpop.permute.xlu1 %5311  ;;  %v5329_v46 = vunpack.i.h.bf16 %v5327_v62  ;;  %v5328_v5 = vunpack.i.l.bf16 %v5327_v62  ;;  %v3446_v6 = vsel %vm8469_vm3, %v5319_v53, %v5304_v25  ;;  %v3445_v42 = vsel %vm8470_vm8, %v5318_v13, %v5303_v21  ;;  %vm8476_vm3 = vmmov %vm8471_vm4 }
0x1073   :  { %v5314_v45 = vunpack.i.h.bf16 %v5312_v33  ;;  %v5313_v58 = vunpack.i.l.bf16 %v5312_v33  ;;  %3715 = vmatpush1.bf16.msra.mxu1 %v3639_v28  ;;  %v5332_v30 = vpop.permute.xlu0 %5331  ;;  %v3632_v55 = vpack.c.bf16 %v3544_v40, %v3540_v22  ;;  %v3631_v43 = vpack.c.bf16 %v3543_v41, %v3539_v52  ;;  %vm8477_vm8 = vmmov %vm8476_vm3 }
0x1074   :  { %v5334_v2 = vunpack.i.h.bf16 %v5332_v30  ;;  %v5333_v51 = vunpack.i.l.bf16 %v5332_v30  ;;  %3674 = vmatpush1.bf16.msra.mxu0 %v7441_v26  ;;  %3716 = vmatprep.subr.bf16.mxu1 %v7443_v10  ;;  %v3443_v44 = vsel %vm8473_vm2, %v5303_v21, %v5323_v32  ;;  %v3444_v0 = vsel %vm8474_vm1, %v5304_v25, %v5324_v23  ;;  %vm8480_vm2 = vmmov %vm8476_vm3 }
0x1075   :  { %v3470_v39 = vsel %vm8471_vm4, %v5329_v46, %v5314_v45  ;;  %v3469_v18 = vsel %vm8472_vm7, %v5328_v5, %v5313_v58  ;;  %v3448_v38 = vsel %vm8475_vm5, %v5309_v24, %v5319_v53  ;;  %v3447_v48 = vsel %vm8463_vm0, %v5308_v37, %v5318_v13  ;;  %3675 = vmatprep.subr.bf16.mxu0 %v3630_v60  ;;  %vm8478_vm4 = vmmov %vm8476_vm3 }
0x1076   :  { %v5337_v28 = vpop.permute.xlu1 %5336  ;;  %v3467_v59 = vsel %vm8476_vm3, %v5313_v58, %v5333_v51  ;;  %v3468_v26 = vsel %vm8477_vm8, %v5314_v45, %v5334_v2  ;;  %v3481_v60 = vsel %vm5709_vm10, %v3447_v48, %v3469_v18  ;;  %v3485_v21 = vsel %vm5709_vm10, %v3448_v38, %v3470_v39  ;;  %vm8479_vm7 = vmmov %vm8476_vm3 }
0x1077   :  { %v5339_v10 = vunpack.i.h.bf16 %v5337_v28  ;;  %v5338_v16 = vunpack.i.l.bf16 %v5337_v28  ;;  %3717 = vmatpush1.bf16.msra.mxu1 %v7445_v19  ;;  %v3482_v8 = vsel %vm5704_vm9, %v3445_v42, %v3467_v59  ;;  %v3486_v25 = vsel %vm5704_vm9, %v3446_v6, %v3468_v26  ;;  %vm8481_vm1 = vmmov %vm8480_vm2 }
0x1078   :  { %3676 = vmatpush1.bf16.msra.mxu0 %v3629_v57  ;;  %vm8482_vm5 = vmmov %vm8463_vm0  ;;  %v3441_v13 = vsel %vm8463_vm0, %v5323_v32, %v5308_v37  ;;  %3718 = vmatprep.subr.bf16.mxu1 %v3632_v55  ;;  %v3626_v33 = vpack.c.bf16 %v3486_v25, %v3482_v8  ;;  %v3474_v14 = vsel %vm5783_vm13, %v3467_v59, %v3445_v42 }
0x1079   :  { %v3466_v62 = vsel %vm8478_vm4, %v5334_v2, %v5339_v10  ;;  %v3472_v22 = vsel %vm8479_vm7, %v5339_v10, %v5329_v46  ;;  %v3465_v19 = vsel %vm8480_vm2, %v5333_v51, %v5338_v16  ;;  %v3471_v40 = vsel %vm8481_vm1, %v5338_v16, %v5328_v5  ;;  %v8490_v2 = vld [vmem:[#allocation11_spill] sm:$0xff]  ;;  %v8497_v10 = vld [vmem:[#allocation8_spill] sm:$0xff] }
0x107a   :  { %v3442_v53 = vsel %vm8482_vm5, %v5324_v23, %v5309_v24  ;;  %v3483_v52 = vsel %vm5795_vm14, %v3443_v44, %v3465_v19  ;;  %v3487_v41 = vsel %vm5795_vm14, %v3444_v0, %v3466_v62  ;;  %v3484_v46 = vsel %vm5749_vm11, %v3441_v13, %v3471_v40  ;;  %3677 = vmatprep.subr.bf16.mxu0 %v3626_v33 }
0x107b   :  { %v3488_v57 = vsel %vm5749_vm11, %v3442_v53, %v3472_v22  ;;  %3719 = vmatpush1.bf16.msra.mxu1 %v3631_v43  ;;  %v3625_v5 = vpack.c.bf16 %v3485_v21, %v3481_v60  ;;  %v3627_v24 = vpack.c.bf16 %v3487_v41, %v3483_v52  ;;  %v3478_v32 = vsel %vm5783_vm13, %v3468_v26, %v3446_v6  ;;  %v8488_v43 = vld [vmem:[#allocation17_spill] sm:$0xff] }
0x107c   :  { %v3628_v23 = vpack.c.bf16 %v3488_v57, %v3484_v46  ;;  %v8483_v37 = vpack.c.bf16 %v7467_v61, %v7463_v12  ;;  %v3476_v45 = vsel %vm5831_vm15, %v3471_v40, %v3441_v13  ;;  %v3480_v58 = vsel %vm5831_vm15, %v3472_v22, %v3442_v53  ;;  %v8485_v12 = vld [vmem:[#allocation15_spill] sm:$0xff]  ;;  %v8486_v61 = vld [vmem:[#allocation14_spill] sm:$0xff]  ;;  %v8496_v26 = vld [vmem:[#allocation13_spill] sm:$0xff] }
0x107d   :  { %3678 = vmatpush1.bf16.msra.mxu0 %v3625_v5  ;;  %v8484_v30 = vpack.c.bf16 %v7477_v4, %v7473_v1  ;;  %v3618_v55 = vpack.c.bf16 %v3478_v32, %v3474_v14  ;;  %v3473_v15 = vsel %vm5753_vm12, %v3469_v18, %v3447_v48  ;;  %v3477_v6 = vsel %vm5753_vm12, %v3470_v39, %v3448_v38  ;;  %v8489_v18 = vld [vmem:[#allocation3_spill] sm:$0xff]  ;;  %v8495_v48 = vld [vmem:[#allocation2_spill] sm:$0xff] }
0x107e   :  { %3720 = vmatprep.subr.bf16.mxu1 %v3628_v23  ;;  %3679 = vmatprep.subr.bf16.mxu0 %v8483_v37  ;;  %v8487_v42 = vpack.c.bf16 %v8485_v12, %v8486_v61  ;;  %v3610_v27 = vsel %vm5704_vm9, %v7696_v29, %v7712_v9  ;;  %v3614_v1 = vsel %vm5704_vm9, %v8488_v43, %v7716_v17  ;;  %v8492_v17 = vld [vmem:[#allocation16_spill] sm:$0xff]  ;;  %v8493_v9 = vld [vmem:[#allocation5_spill] sm:$0xff]  ;;  %vm8505_vm12 = vcmask 15360  }
0x107f   :  { %3721 = vmatpush1.bf16.msra.mxu1 %v3627_v24  ;;  %v3475_v4 = vsel %vm5835_vm6, %v3465_v19, %v3443_v44  ;;  %v3479_v49 = vsel %vm5835_vm6, %v3466_v62, %v3444_v0  ;;  %v3620_v39 = vpack.c.bf16 %v3480_v58, %v3476_v45  ;;  %v8491_v51 = vpack.c.bf16 %v8489_v18, %v8490_v2  ;;  %v8494_v0 = vld [vmem:[#allocation10_spill] sm:$0xff]  ;;  %vm8506_vm13 = vmmov %vm8505_vm12 }
0x1080   :  { %3722 = vmatprep.subr.bf16.mxu1 %v8484_v30  ;;  %v3617_v38 = vpack.c.bf16 %v3477_v6, %v3473_v15  ;;  %v3612_v29 = vsel %vm5749_vm11, %v7704_v63, %v7750_v56  ;;  %v3616_v31 = vsel %vm5749_vm11, %v7758_v54, %v7742_v20  ;;  %v3650_v11 = vpack.c.bf16 %v3614_v1, %v3610_v27  ;;  %vm8509_vm3 = vmmov %vm8505_vm12 }
0x1081   :  { %3680 = vmatpush1.bf16.msra.mxu0 %v8487_v42  ;;  %v3609_v44 = vsel %vm5709_vm10, %v8493_v9, %v8492_v17  ;;  %v3613_v28 = vsel %vm5709_vm10, %v8495_v48, %v8494_v0  ;;  %v3619_v59 = vpack.c.bf16 %v3479_v49, %v3475_v4  ;;  %v3652_v56 = vpack.c.bf16 %v3616_v31, %v3612_v29  ;;  %vm8510_vm8 = vmmov %vm8509_vm3 }
0x1082   :  { %3681 = vmatprep.subr.bf16.mxu0 %v3618_v55  ;;  %v3611_v47 = vsel %vm5795_vm14, %v7754_v34, %v7746_v50  ;;  %v3615_v63 = vsel %vm5795_vm14, %v7766_v3, %v7738_v36  ;;  %v3649_v20 = vpack.c.bf16 %v3613_v28, %v3609_v44  ;;  %v8498_v50 = vld [vmem:[#allocation12_spill] sm:$0xff]  ;;  %vm8499_vm6 = vcmask 1041408   ;;  %vm8513_vm2 = vmmov %vm8509_vm3 }
0x1083   :  { %3723 = vmatpush1.bf16.msra.mxu1 %v8491_v51  ;;  %v3651_v54 = vpack.c.bf16 %v3615_v63, %v3611_v47  ;;  %vm8501_vm9 = vmmov %vm8499_vm6  ;;  %v8504_v62 = vmov 0.0  }
0x1084   :  { %3724 = vmatprep.subr.bf16.mxu1 %v3620_v39  ;;  %vm8502_vm10 = vmmov %vm8499_vm6 }
0x1085   :  { %3682 = vmatpush1.bf16.msra.mxu0 %v3617_v38  ;;  %vm8503_vm11 = vmmov %vm8499_vm6 }
0x1086   :  { %3697 = vmatprep.subr.bf16.mxu0 %v3650_v11  ;;  %vm8507_vm14 = vmmov %vm8499_vm6 }
0x1087   :  { %3725 = vmatpush1.bf16.msra.mxu1 %v3619_v59  ;;  %vm8508_vm15 = vmmov %vm8499_vm6 }
0x1088   :  { %3740 = vmatprep.subr.bf16.mxu1 %v3652_v56  ;;  %vm8511_vm4 = vmmov %vm8499_vm6 }
0x1089   :  { %3698 = vmatpush2.bf16.msra.mxu0 %v3649_v20  ;;  %vm8512_vm7 = vmmov %vm8511_vm4  ;;  %v5440_v20 = vmov 0  }
0x108a   :  { %3783 = vmatprep.subr.mxu0 %v8496_v26  ;;  %vm8514_vm1 = vmmov %vm8513_vm2  ;;  %5340 = vset.pattern.permute.xlu0 %v5440_v20 }
0x108b   :  { %3741 = vmatpush2.bf16.msra.mxu1 %v3651_v54  ;;  %vm8515_vm5 = vmmov %vm8514_vm1 }
0x108c   :  { %3700 = vmatmul.mubr.bf16.vlgmr.msra.gmra.mxu0 %v5351_v35  ;;  %3858 = vmatprep.subr.mxu1 %v8497_v10  ;;  %vm8516_vm0 = vmmov %vm8514_vm1 }
0x108d   :  { %3784 = vmatpush1.xpose.msra.mxu0 %v8498_v50 }
0x108e   :  { %3743 = vmatmul.mubr.bf16.vlgmr.msra.gmra.mxu1 %v5351_v35  ;;  %4671 = vmatprep.subr.msk.mxu0 %vm8499_vm6, %v8496_v26  ;;  %v4418_v35 = vld [vmem:[%s8056_s7] sm:$0x7]  ;;  %vm8517_vm6 = vcmask 130048  }
0x108f   :  { %3859 = vmatpush1.xpose.msra.mxu1 %v8500_v7  ;;  %4421 = vperm.xlu0 %5340, %v4418_v35  }
0x1090   :  { %4675 = vmatprep.subr.msk.mxu1 %vm8501_vm9, %v8497_v10  ;;  %vm8518_vm9 = vmmov %vm8517_vm6 }
0x114c   :  { %v3701_v34 = vpop.f32.mrf.mxu0 }
0x114e   :  { %v3703_v36 = vpop.f32.mrf.mxu0  ;;  %v3744_v3 = vpop.f32.mrf.mxu1 }
0x114f   :  { %3817 = vmatprep.mubr.f32.mxu0 %v3703_v36 }
0x1150   :  { %v3705_v16 = vpop.f32.mrf.mxu0  ;;  %3818 = vmatmul.mubr.f32.vlgmr.msra.gmra.mxu0 %v3701_v34  ;;  %v3746_v8 = vpop.f32.mrf.mxu1 }
0x1151   :  { %3892 = vmatprep.mubr.f32.mxu1 %v3746_v8  ;;  %4672 = vmatpush1.msk.msra.mxu0 %vm8502_vm10, %v8498_v50 }
0x1152   :  { %v3707_v25 = vpop.f32.mrf.mxu0  ;;  %v3748_v60 = vpop.f32.mrf.mxu1  ;;  %3893 = vmatmul.mubr.f32.vlgmr.msra.gmra.mxu1 %v3744_v3  ;;  %4111 = vmatprep.subr.mxu0 %v8496_v26 }
0x1153   :  { %3822 = vmatprep.mubr.f32.mxu0 %v3707_v25  ;;  %4676 = vmatpush1.msk.msra.mxu1 %vm8503_vm11, %v8500_v7 }
0x1154   :  { %3823 = vmatmul.mubr.f32.gmra.mxu0 %v3705_v16  ;;  %v3750_v21 = vpop.f32.mrf.mxu1  ;;  %4186 = vmatprep.subr.mxu1 %v8497_v10 }
0x1155   :  { %3897 = vmatprep.mubr.f32.mxu1 %v3750_v21  ;;  %3975 = vmatprep.mubr.f32.mxu0 %v8504_v62 }
0x1156   :  { %3898 = vmatmul.mubr.f32.gmra.mxu1 %v3748_v60 }
0x1157   :  { %4052 = vmatprep.mubr.f32.mxu1 %v8504_v62 }
0x1210   :  { %v3819_v22 = vpop.f32.mrf.mxu0 }
0x1212   :  { %v3821_v19 = vpop.f32.mrf.mxu0  ;;  %v3894_v40 = vpop.f32.mrf.mxu1 }
0x1213   :  { %v3895_v53 = vadd.f32 %v3894_v40, %v3819_v22 }
0x1214   :  { %v3824_v13 = vpop.f32.mrf.mxu0  ;;  %v3896_v52 = vpop.f32.mrf.mxu1 }
0x1215   :  { %v3903_v41 = vmul.f32 0.00390625, %v3895_v53 }
0x1216   :  { %v3826_v33 = vpop.f32.mrf.mxu0  ;;  %v3899_v46 = vpop.f32.mrf.mxu1 }
0x1217   :  { %v3900_v57 = vadd.f32 %v3899_v46, %v3824_v13  ;;  %4673 = vmatmul.mubr.msk.f32.vlgmr.msra.gmra.mxu0 %vm8505_vm12, %v3903_v41  ;;  %4677 = vmatmul.mubr.msk.f32.vlgmr.msra.gmra.mxu1 %vm8506_vm13, %v3903_v41 }
0x1218   :  { %v3901_v5 = vpop.f32.mrf.mxu1  ;;  %3981 = vmatprep.mubr.f32.mxu0 %v8504_v62  ;;  %4058 = vmatprep.mubr.f32.mxu1 %v8504_v62 }
0x1219   :  { %v3904_v23 = vmul.f32 0.00390625, %v3900_v57  ;;  %4112 = vmatpush1.xpose.msra.mxu0 %v8498_v50  ;;  %4187 = vmatpush1.xpose.msra.mxu1 %v8500_v7 }
0x121a   :  { %4679 = vmatprep.subr.msk.mxu0 %vm8507_vm14, %v8496_v26  ;;  %4683 = vmatprep.subr.msk.mxu1 %vm8508_vm15, %v8497_v10 }
0x121b   :  { %4674 = vmatmul.mubr.msk.f32.gmra.mxu0 %vm8509_vm3, %v3904_v23  ;;  %4678 = vmatmul.mubr.msk.f32.gmra.mxu1 %vm8510_vm8, %v3904_v23 }
0x12d7   :  { %v3977_v24 = vpop.f32.mrf.mxu0  ;;  %v4054_v14 = vpop.f32.mrf.mxu1 }
0x12d8   :  { %v7982_v32 = vsub.f32 %v3701_v34, %v3977_v24  ;;  %v7984_v58 = vsub.f32 %v3744_v3, %v4054_v14 }
0x12d9   :  { %v3979_v37 = vpop.f32.mrf.mxu0  ;;  %v4056_v45 = vpop.f32.mrf.mxu1 }
0x12da   :  { %v7986_v30 = vsub.f32 %v3703_v36, %v3979_v37  ;;  %v7988_v55 = vsub.f32 %v3746_v8, %v4056_v45  ;;  %v4073_v42 = vmul.f32 %v7982_v32, %v7982_v32  ;;  %v4075_v4 = vmul.f32 %v7984_v58, %v7984_v58 }
0x12db   :  { %v3983_v15 = vpop.f32.mrf.mxu0  ;;  %v4060_v6 = vpop.f32.mrf.mxu1 }
0x12dc   :  { %v4074_v12 = vmul.f32 %v7986_v30, %v7986_v30  ;;  %v4076_v61 = vmul.f32 %v7988_v55, %v7988_v55  ;;  %v7996_v27 = vsub.f32 %v3705_v16, %v3983_v15  ;;  %v8000_v49 = vsub.f32 %v3748_v60, %v4060_v6 }
0x12dd   :  { %v3985_v43 = vpop.f32.mrf.mxu0  ;;  %v4062_v1 = vpop.f32.mrf.mxu1 }
0x12de   :  { %v8002_v39 = vsub.f32 %v3707_v25, %v3985_v43  ;;  %v8004_v18 = vsub.f32 %v3750_v21, %v4062_v1  ;;  %4145 = vmatprep.mubr.f32.mxu0 %v4074_v12  ;;  %4220 = vmatprep.mubr.f32.mxu1 %v4076_v61  ;;  %v4077_v38 = vmul.f32 %v7996_v27, %v7996_v27 }
0x12df   :  { %4146 = vmatmul.mubr.f32.vlgmr.msra.gmra.mxu0 %v4073_v42  ;;  %4221 = vmatmul.mubr.f32.vlgmr.msra.gmra.mxu1 %v4075_v4  ;;  %v4079_v29 = vmul.f32 %v8000_v49, %v8000_v49 }
0x12e0   :  { %v4078_v2 = vmul.f32 %v8002_v39, %v8002_v39  ;;  %v4080_v51 = vmul.f32 %v8004_v18, %v8004_v18  ;;  %4680 = vmatpush1.msk.msra.mxu0 %vm8511_vm4, %v8498_v50  ;;  %4684 = vmatpush1.msk.msra.mxu1 %vm8512_vm7, %v8500_v7 }
0x12e2   :  { %4150 = vmatprep.mubr.f32.mxu0 %v4078_v2  ;;  %4225 = vmatprep.mubr.f32.mxu1 %v4080_v51 }
0x12e3   :  { %4151 = vmatmul.mubr.f32.gmra.mxu0 %v4077_v38  ;;  %4226 = vmatmul.mubr.f32.gmra.mxu1 %v4079_v29 }
0x12e4   :  { %4303 = vmatprep.mubr.f32.mxu0 %v8504_v62  ;;  %4380 = vmatprep.mubr.f32.mxu1 %v8504_v62 }
0x139f   :  { %v4147_v31 = vpop.f32.mrf.mxu0  ;;  %v4222_v11 = vpop.f32.mrf.mxu1 }
0x13a0   :  { %v4223_v17 = vadd.f32 %v4222_v11, %v4147_v31 }
0x13a1   :  { %v4149_v9 = vpop.f32.mrf.mxu0  ;;  %v4224_v44 = vpop.f32.mrf.mxu1 }
0x13a2   :  { %v4231_v0 = vmul.f32 0.00390625, %v4223_v17 }
0x13a3   :  { %v4152_v48 = vpop.f32.mrf.mxu0  ;;  %v4227_v28 = vpop.f32.mrf.mxu1 }
0x13a4   :  { %v4228_v59 = vadd.f32 %v4227_v28, %v4152_v48  ;;  %4681 = vmatmul.mubr.msk.f32.vlgmr.msra.gmra.mxu0 %vm8513_vm2, %v4231_v0  ;;  %4685 = vmatmul.mubr.msk.f32.vlgmr.msra.gmra.mxu1 %vm8514_vm1, %v4231_v0 }
0x13a5   :  { %v4154_v56 = vpop.f32.mrf.mxu0  ;;  %v4229_v47 = vpop.f32.mrf.mxu1  ;;  %4309 = vmatprep.mubr.f32.mxu0 %v8504_v62  ;;  %4386 = vmatprep.mubr.f32.mxu1 %v8504_v62 }
0x13a6   :  { %v4232_v63 = vmul.f32 0.00390625, %v4228_v59 }
0x13a8   :  { %4682 = vmatmul.mubr.msk.f32.gmra.mxu0 %vm8515_vm5, %v4232_v63  ;;  %4686 = vmatmul.mubr.msk.f32.gmra.mxu1 %vm8516_vm0, %v4232_v63 }
0x13a9   :  { %4491 = vmatprep.mubr.f32.mxu0 %v8504_v62  ;;  %4562 = vmatprep.mubr.f32.mxu1 %v8504_v62 }
0x1464   :  { %v4305_v54 = vpop.f32.mrf.mxu0  ;;  %v4382_v26 = vpop.f32.mrf.mxu1 }
0x1465   :  { %v4306_v10 = vadd.f32 1e-05, %v4305_v54  ;;  %v4383_v50 = vadd.f32 1e-05, %v4382_v26 }
0x1466   :  { %v4307_v7 = vpop.f32.mrf.mxu0  ;;  %v4384_v34 = vpop.f32.mrf.mxu1 }
0x1467   :  { %5402 = vrsqrt.f32 %v4306_v10  ;;  %v4308_v36 = vadd.f32 1e-05, %v4307_v7  ;;  %v4385_v3 = vadd.f32 1e-05, %v4384_v34 }
0x1468   :  { %5404 = vrsqrt.f32 %v4383_v50  ;;  %v4311_v16 = vpop.f32.mrf.mxu0  ;;  %v4388_v8 = vpop.f32.mrf.mxu1 }
0x1469   :  { %5406 = vrsqrt.f32 %v4308_v36  ;;  %v4312_v25 = vadd.f32 1e-05, %v4311_v16  ;;  %v4389_v60 = vadd.f32 1e-05, %v4388_v8 }
0x146a   :  { %5408 = vrsqrt.f32 %v4385_v3  ;;  %v4313_v21 = vpop.f32.mrf.mxu0  ;;  %v4390_v62 = vpop.f32.mrf.mxu1 }
0x146b   :  { %5410 = vrsqrt.f32 %v4312_v25  ;;  %v4314_v22 = vadd.f32 1e-05, %v4313_v21  ;;  %v4391_v19 = vadd.f32 1e-05, %v4390_v62 }
0x146c   :  { %5412 = vrsqrt.f32 %v4389_v60 }
0x146d   :  { %5414 = vrsqrt.f32 %v4314_v22 }
0x146e   :  { %5416 = vrsqrt.f32 %v4391_v19 }
0x1474   :  { %v5403_v40 = vpop.eup %5402 }
0x1475   :  { %v5405_v53 = vpop.eup %5404  ;;  %v4401_v15 = vmul.f32 %v5403_v40, %v7982_v32  ;;  %v4422_v32 = vpop.permute.xlu0 %4421 }
0x1476   :  { %v5407_v13 = vpop.eup %5406  ;;  %v4403_v12 = vmul.f32 %v5405_v53, %v7984_v58 }
0x1477   :  { %v5409_v52 = vpop.eup %5408  ;;  %v4402_v14 = vmul.f32 %v5407_v13, %v7986_v30  ;;  %v4409_v4 = vmax.f32 %v4401_v15, 0.0  ;;  %v4417_v30 = vld [vmem:[%s8057_s6] sm:$0x7] }
0x1478   :  { %v5411_v41 = vpop.eup %5410  ;;  %v4404_v45 = vmul.f32 %v5409_v52, %v7988_v55  ;;  %v4411_v55 = vmax.f32 %v4403_v12, 0.0 }
0x1479   :  { %v5413_v33 = vpop.eup %5412  ;;  %v4405_v57 = vmul.f32 %v5411_v41, %v7996_v27  ;;  %v4410_v43 = vmax.f32 %v4402_v14, 0.0 }
0x147a   :  { %v5415_v46 = vpop.eup %5414  ;;  %v4407_v24 = vmul.f32 %v5413_v33, %v8000_v49  ;;  %v4412_v1 = vmax.f32 %v4404_v45, 0.0 }
0x147b   :  { %v5417_v5 = vpop.eup %5416  ;;  %v4406_v23 = vmul.f32 %v5415_v46, %v8002_v39  ;;  %v4413_v42 = vmax.f32 %v4405_v57, 0.0 }
0x147c   :  { %v4408_v37 = vmul.f32 %v5417_v5, %v8004_v18  ;;  %v4415_v27 = vmax.f32 %v4407_v24, 0.0 }
0x147d   :  { %v4414_v6 = vmax.f32 %v4406_v23, 0.0 }
0x147e   :  { %v4416_v61 = vmax.f32 %v4408_v37, 0.0 }
0x147f   :  { %4455 = vmatprep.subr.mxu0 %v4414_v6 }
0x1480   :  { %4526 = vmatprep.subr.mxu1 %v4416_v61  ;;  %4456 = vmatpush1.msra.mxu0 %v4413_v42 }
0x1481   :  { %4527 = vmatpush1.msra.mxu1 %v4415_v27  ;;  %4457 = vmatprep.subr.mxu0 %v4410_v43 }
0x1482   :  { %4528 = vmatprep.subr.mxu1 %v4412_v1  ;;  %4458 = vmatpush1.msra.mxu0 %v4409_v4 }
0x1483   :  { %4529 = vmatpush1.msra.mxu1 %v4411_v55  ;;  %4687 = vmatmul.mubr.msk.f32.vlgmr.msra.gmra.mxu0 %vm8517_vm6, %v4417_v30 }
0x1484   :  { %4688 = vmatmul.mubr.msk.f32.vlgmr.msra.gmra.mxu1 %vm8518_vm9, %v4417_v30 }
0x1543   :  { %v4493_v58 = vpop.f32.mrf.mxu0 }
0x1544   :  { %v4564_v49 = vpop.f32.mrf.mxu1  ;;  %v4494_v39 = vadd.f32 %v4493_v58, %v4422_v32 }
0x1545   :  { %v4565_v18 = vadd.f32 %v4564_v49, %v4422_v32  ;;  %v4495_v2 = vpop.f32.mrf.mxu0 }
0x1546   :  { %v4689_v51 = vmul.f32 -1.442695, %v4494_v39  ;;  %v4496_v38 = vadd.f32 %v4495_v2, %v4422_v32  ;;  %v4566_v29 = vpop.f32.mrf.mxu1 }
0x1547   :  { %v4691_v31 = vmul.f32 -1.442695, %v4565_v18  ;;  %v4567_v11 = vadd.f32 %v4566_v29, %v4422_v32 }
0x1548   :  { %5418 = vpow2.f32 %v4689_v51  ;;  %v4690_v17 = vmul.f32 -1.442695, %v4496_v38 }
0x1549   :  { %5420 = vpow2.f32 %v4691_v31  ;;  %v4692_v9 = vmul.f32 -1.442695, %v4567_v11 }
0x154a   :  { %5422 = vpow2.f32 %v4690_v17 }
0x154b   :  { %5424 = vpow2.f32 %v4692_v9 }
0x1555   :  { %v5419_v44 = vpop.eup %5418 }
0x1556   :  { %v5421_v0 = vpop.eup %5420  ;;  %v4581_v48 = vadd.f32 1.0, %v5419_v44 }
0x1557   :  { %v5423_v28 = vpop.eup %5422  ;;  %v4583_v59 = vadd.f32 1.0, %v5421_v0 }
0x1558   :  { %v5425_v56 = vpop.eup %5424  ;;  %5426 = vrcp.f32 %v4581_v48  ;;  %v4582_v47 = vadd.f32 1.0, %v5423_v28 }
0x1559   :  { %5428 = vrcp.f32 %v4583_v59  ;;  %v4584_v63 = vadd.f32 1.0, %v5425_v56 }
0x155a   :  { %5430 = vrcp.f32 %v4582_v47 }
0x155b   :  { %5432 = vrcp.f32 %v4584_v63 }
0x1565   :  { %v5427_v20 = vpop.eup %5426 }
0x1566   :  { %v5429_v35 = vpop.eup %5428 }
0x1567   :  { %v5431_v54 = vpop.eup %5430 }
0x1568   :  { %v5433_v26 = vpop.eup %5432  ;;  %v4597_v10 = vcombine.low %v5427_v20, %v5431_v54 }
0x1569   :  { %v4598_v50 = vcombine.low %v5429_v35, %v5433_v26 }
0x156a   :  { %4601 = vst [vmem:[%s8058_s8] sm:$0x77] %v4597_v10 }
0x156b   :  { %4602 = vst [vmem:[%s8058_s8 + $0x8] sm:$0x77] %v4598_v50 }

</bundles_post_ra>
